<compile_context>
chip_gen: v5e
topology: v5e:2x2
jax: 0.10.0
libtpu: 0.0.40
codegen_flags: <defaults>
</compile_context>

<pallas_src>
import math
from functools import partial

import jax
import jax.numpy as jnp
from jax.experimental import pallas as pl
from jax.experimental.pallas import tpu as pltpu


# ---------------------------------------------------------------------------
# Config (synthetic stand-ins for the externally supplied submodules)
# ---------------------------------------------------------------------------
IN_CH = 3
ENC_CH = [32, 64, 128, 256]      # encoder channels at strides 4 / 8 / 16 / 32
ENC_STRIDES = [4, 2, 2, 2]
DEC_DIM = 128                    # proj output / decoder entry dim
DEC_CH = [64, 32, 16]            # decoder stage outputs
OUT_CH = 3
NUM_TASKS = 3


def _nbytes(a):
    return int(a.size) * jnp.dtype(a.dtype).itemsize


def _tm_cap():
    """Row-tile cap: 2048 on v7x (3.2 TB/s HBM, amortize per-step cost),
    1024 on v5e/v6e (v5e scoped-VMEM default is only 16 MiB)."""
    try:
        kind = jax.devices()[0].device_kind.lower()
    except Exception:
        return 1024
    if "v7" in kind or "tpu7" in kind:
        return 2048
    return 1024


def _pick_rows(R, cap):
    """Row-block size: multiple of 8 (or == R when R <= 8), <= ~cap rows,
    keeping the grid >= 2 when R allows (dual-TC sharding on v7x)."""
    if R <= 8:
        return R
    tgt = min(cap, -(-R // 2))               # cap, but keep >= 2 blocks
    t = (tgt // 8) * 8
    if t < 8:
        t = 8
    return min(t, R)


# ---------------------------------------------------------------------------
# Kernel 1: fused space_to_depth (stride s) + linear + GELU   (encoder stages)
#   x_ref : (TR, s, Wp, s*C)  w_ref : (s, s*C, N)  b_ref : (1, N)
#   o_ref : (TR*Wp, N)  -- one whole-block matmul per in-patch row (s of them)
# ---------------------------------------------------------------------------
def _patchify_kernel(x_ref, w_ref, b_ref, o_ref, *, s):
    TR, _, Wp, sC = x_ref.shape
    x = x_ref[...]
    acc = None
    for di in range(s):                                   # static unroll (s in {2,4})
        xr = x[:, di].reshape(TR * Wp, sC).astype(jnp.bfloat16)
        part = jnp.dot(xr, w_ref[di], preferred_element_type=jnp.float32)
        acc = part if acc is None else acc + part
    y = acc + b_ref[...].astype(jnp.float32)
    y = jax.nn.gelu(y)
    o_ref[...] = y.astype(o_ref.dtype)


def patchify_pallas(x_nhwc, w, b, s, out_dtype=jnp.bfloat16, tm_cap=1024):
    """Fused space_to_depth(stride s) + Linear + GELU.
    Returns the feature flattened to 2D: (B*(H//s)*(W//s), N)."""
    B, H, W, C = x_nhwc.shape
    Hp, Wp = H // s, W // s
    sC = s * C
    N = w.shape[1]
    R = B * Hp
    M = R * Wp

    # free, contiguous re-groupings only (no data movement in XLA)
    xv = x_nhwc.reshape(R, s, Wp, sC)
    wv = w.reshape(s, sC, N)

    TR = _pick_rows(R, max(1, tm_cap // max(Wp, 1)))
    grid = (pl.cdiv(R, TR),)

    return pl.pallas_call(
        partial(_patchify_kernel, s=s),
        out_shape=jax.ShapeDtypeStruct((M, N), out_dtype),
        grid_spec=pltpu.PrefetchScalarGridSpec(
            num_scalar_prefetch=0,
            grid=grid,
            in_specs=[
                pl.BlockSpec((TR, s, Wp, sC), lambda i: (i, 0, 0, 0)),
                pl.BlockSpec((s, sC, N), lambda i: (0, 0, 0)),
                pl.BlockSpec((1, N), lambda i: (0, 0)),
            ],
            out_specs=pl.BlockSpec((TR * Wp, N), lambda i: (i, 0)),
        ),
        compiler_params=pltpu.CompilerParams(
            dimension_semantics=("parallel",)),
        cost_estimate=pl.CostEstimate(
            flops=2 * M * s * sC * N,
            transcendentals=M * N,
            bytes_accessed=_nbytes(xv) + _nbytes(wv) + _nbytes(b)
            + M * N * jnp.dtype(out_dtype).itemsize),
    )(xv, wv, b.reshape(1, N))


# ---------------------------------------------------------------------------
# Kernel 2: proj Linear + per-batch task prompt + fused first d-path matmul
#   out = (x @ Wp + bp + prompt[b]) @ [Wd0 | Wd0]   (column-duplicated => the
#   stored result reinterprets for free as the W-upsampled d-path tensor)
# ---------------------------------------------------------------------------
def _proj_kernel(x_ref, w_ref, b_ref, p_ref, wd_ref, o_ref):
    x = x_ref[0].astype(jnp.bfloat16)                              # (TP, K)
    y = jnp.dot(x, w_ref[...], preferred_element_type=jnp.float32)
    y = y + b_ref[...].astype(jnp.float32) + p_ref[0].astype(jnp.float32)
    t = jnp.dot(y.astype(jnp.bfloat16), wd_ref[...],
                preferred_element_type=jnp.float32)
    o_ref[0] = t.astype(o_ref.dtype)


def proj_prompt_pallas(feat, w, b, prompt, wd_wide, out_dtype=jnp.bfloat16,
                       tm_cap=1024):
    B, Hp, Wp, K = feat.shape
    P = Hp * Wp
    N = w.shape[1]
    N2 = wd_wide.shape[1]                      # 2 * DEC_CH[0]
    x = feat.reshape(B, P, K)
    pr = prompt.reshape(B, 1, N)
    TP = _pick_rows(P, tm_cap)
    grid = (B, pl.cdiv(P, TP))

    out = pl.pallas_call(
        _proj_kernel,
        out_shape=jax.ShapeDtypeStruct((B, P, N2), out_dtype),
        grid_spec=pltpu.PrefetchScalarGridSpec(
            num_scalar_prefetch=0,
            grid=grid,
            in_specs=[
                pl.BlockSpec((1, TP, K), lambda bi, pi: (bi, pi, 0)),
                pl.BlockSpec((K, N), lambda bi, pi: (0, 0)),
                pl.BlockSpec((1, N), lambda bi, pi: (0, 0)),
                pl.BlockSpec((1, 1, N), lambda bi, pi: (bi, 0, 0)),
                pl.BlockSpec((N, N2), lambda bi, pi: (0, 0)),
            ],
            out_specs=pl.BlockSpec((1, TP, N2), lambda bi, pi: (bi, pi, 0)),
        ),
        compiler_params=pltpu.CompilerParams(
            dimension_semantics=("parallel", "parallel")),
        cost_estimate=pl.CostEstimate(
            flops=2 * B * P * K * N + 2 * B * P * N * N2,
            transcendentals=0,
            bytes_accessed=_nbytes(x) + _nbytes(w) + _nbytes(b) + _nbytes(pr)
            + _nbytes(wd_wide) + B * P * N2 * jnp.dtype(out_dtype).itemsize),
    )(x, w, b.reshape(1, N), pr, wd_wide)
    # Free reshape: (B, P, 2*Nm) -> (B*Hp, 2*Wp, Nm) == W-upsampled d-path tensor
    return out.reshape(B * Hp, Wp * 2, N2 // 2)


# ---------------------------------------------------------------------------
# Kernel 3: decoder stage
#   y   = gelu(skip @ Ws + up_rows(t) + b)          (t already W-upsampled)
#   out = y @ Wh [+ bh]                              (fused next d-path / head)
#   skip_ref : (2*TRl*Wh, Cs)   t_ref : (TRl, Wh, Nm)   o_ref : (2*TRl*Wh, Nout)
# ---------------------------------------------------------------------------
def _dec_stage_kernel(*refs, has_head_bias):
    if has_head_bias:
        skip_ref, t_ref, ws_ref, b_ref, wh_ref, bh_ref, o_ref = refs
    else:
        skip_ref, t_ref, ws_ref, b_ref, wh_ref, o_ref = refs
        bh_ref = None

    TRl, Wh, Nm = t_ref.shape
    skip = skip_ref[...].astype(jnp.bfloat16)
    y = jnp.dot(skip, ws_ref[...], preferred_element_type=jnp.float32)

    # H-direction nearest upsample of the low-res d-path tile, in VMEM
    # (leading-dim broadcast, then collapse back into matmul rows).
    t = t_ref[...].astype(jnp.float32)                              # (TRl, Wh, Nm)
    t = jnp.broadcast_to(t[:, None, :, :], (TRl, 2, Wh, Nm))
    t = t.reshape(2 * TRl * Wh, Nm)

    y = jax.nn.gelu(y + t + b_ref[...].astype(jnp.float32))
    out = jnp.dot(y.astype(jnp.bfloat16), wh_ref[...],
                  preferred_element_type=jnp.float32)
    if bh_ref is not None:
        out = out + bh_ref[...].astype(jnp.float32)
    o_ref[...] = out.astype(o_ref.dtype)


def decoder_stage_pallas(skip2d, t3d, ws, b, wh, bh=None,
                         out_dtype=jnp.bfloat16, tm_cap=1024):
    M_hi, Cs = skip2d.shape
    R_lo, Wh, Nm = t3d.shape
    assert M_hi == 2 * R_lo * Wh
    Nout = wh.shape[1]

    TRl = _pick_rows(R_lo, max(1, tm_cap // max(2 * Wh, 1)))
    BR = 2 * TRl * Wh
    grid = (pl.cdiv(R_lo, TRl),)

    in_specs = [
        pl.BlockSpec((BR, Cs), lambda i: (i, 0)),
        pl.BlockSpec((TRl, Wh, Nm), lambda i: (i, 0, 0)),
        pl.BlockSpec((Cs, Nm), lambda i: (0, 0)),
        pl.BlockSpec((1, Nm), lambda i: (0, 0)),
        pl.BlockSpec((Nm, Nout), lambda i: (0, 0)),
    ]
    args = [skip2d, t3d, ws, b.reshape(1, Nm), wh]
    if bh is not None:
        in_specs.append(pl.BlockSpec((1, Nout), lambda i: (0, 0)))
        args.append(bh.reshape(1, Nout))

    return pl.pallas_call(
        partial(_dec_stage_kernel, has_head_bias=bh is not None),
        out_shape=jax.ShapeDtypeStruct((M_hi, Nout), out_dtype),
        grid_spec=pltpu.PrefetchScalarGridSpec(
            num_scalar_prefetch=0,
            grid=grid,
            in_specs=in_specs,
            out_specs=pl.BlockSpec((BR, Nout), lambda i: (i, 0)),
        ),
        compiler_params=pltpu.CompilerParams(
            dimension_semantics=("parallel",)),
        cost_estimate=pl.CostEstimate(
            flops=2 * M_hi * Cs * Nm + 2 * M_hi * Nm * Nout,
            transcendentals=M_hi * Nm,
            bytes_accessed=sum(_nbytes(a) for a in args)
            + M_hi * Nout * jnp.dtype(out_dtype).itemsize),
    )(*args)


# ---------------------------------------------------------------------------
# Parameters (deterministic synthetic init; bf16 weights, f32 biases)
# ---------------------------------------------------------------------------
def init_params(key):
    def dense(key, k_in, k_out):
        kw, kb = jax.random.split(key)
        scale = 1.0 / math.sqrt(k_in)
        w = jax.random.uniform(kw, (k_in, k_out), jnp.float32, -scale, scale)
        b = jax.random.uniform(kb, (k_out,), jnp.float32, -scale, scale)
        return w.astype(jnp.bfloat16), b

    keys = jax.random.split(key, 16)
    p = {}
    c_in = IN_CH
    for i, (s, c_out) in enumerate(zip(ENC_STRIDES, ENC_CH)):
        p[f"enc_w{i}"], p[f"enc_b{i}"] = dense(keys[i], c_in * s * s, c_out)
        c_in = c_out
    p["proj_w"], p["proj_b"] = dense(keys[4], ENC_CH[-1], DEC_DIM)
    p["task_embed"] = 0.02 * jax.random.normal(keys[5], (NUM_TASKS, DEC_DIM),
                                               jnp.float32)
    d_in = DEC_DIM
    skips = [ENC_CH[2], ENC_CH[1], ENC_CH[0]]
    for i, (skip_c, c_out) in enumerate(zip(skips, DEC_CH)):
        p[f"dec_w{i}"], p[f"dec_b{i}"] = dense(keys[6 + i], d_in + skip_c, c_out)
        d_in = c_out
    p["head_w"], p["head_b"] = dense(keys[9], DEC_CH[-1], OUT_CH)
    return p


# ---------------------------------------------------------------------------
# UPOCR forward
# ---------------------------------------------------------------------------
def upocr_forward(params, images_nchw, tasks):
    # images_nchw: (B, 3, H, W) float32, tasks: (B,) int32
    x = jnp.transpose(images_nchw, (0, 2, 3, 1)).astype(jnp.bfloat16)   # NHWC bf16
    B, H, W, _ = x.shape
    assert H % 32 == 0 and W % 32 == 0
    cap = _tm_cap()

    # ---- encoder: 4 fused patchify stages -> multi-scale features (2D) -----
    enc2d, dims = [], []
    cur = x
    Hs, Ws = H, W
    for i, s in enumerate(ENC_STRIDES):
        out2d = patchify_pallas(cur, params[f"enc_w{i}"], params[f"enc_b{i}"],
                                s, tm_cap=cap)
        Hs, Ws = Hs // s, Ws // s
        enc2d.append(out2d)
        dims.append((Hs, Ws))
        if i + 1 < len(ENC_STRIDES):
            cur = out2d.reshape(B, Hs, Ws, ENC_CH[i])         # free regroup

    # ---- proj(last feature) + task prompt + first d-path matmul (one kernel)
    H32, W32 = dims[3]
    feat = enc2d[3].reshape(B, H32, W32, ENC_CH[3])
    prompt = params["task_embed"][tasks]                      # (B, DEC_DIM)
    wd0 = params["dec_w0"][:DEC_DIM]                          # (128, 64)
    t = proj_prompt_pallas(feat, params["proj_w"], params["proj_b"], prompt,
                           jnp.concatenate([wd0, wd0], axis=1), tm_cap=cap)
    # t: (B*H/32, W/16, DEC_CH[0])  -- d-path pre-activation, already W-upsampled

    # ---- decoder: 1x1 mixes commuted past 2x nearest upsampling; each stage
    #      also computes the NEXT stage's d-path matmul (or the output head).
    cd_list = [DEC_DIM, DEC_CH[0], DEC_CH[1]]
    d_low = None
    for i in range(3):
        Hh, Wh = dims[2 - i]                                  # skip resolution
        w_full = params[f"dec_w{i}"]
        ws = w_full[cd_list[i]:]                              # skip-path weight
        bias = params[f"dec_b{i}"]
        if i < 2:
            wd_next = params[f"dec_w{i + 1}"][:DEC_CH[i]]     # next d-path weight
            wh = jnp.concatenate([wd_next, wd_next], axis=1)  # column-dup => W up2
            bh = None
        else:
            wh = params["head_w"]                             # fused output head
            bh = params["head_b"]
        out2d = decoder_stage_pallas(enc2d[2 - i], t, ws, bias, wh, bh,
                                     tm_cap=cap)
        if i < 2:
            # Free reshape: (B*Hh*Wh, 2*Nm_next) -> (B*Hh, 2*Wh, Nm_next)
            t = out2d.reshape(B * Hh, 2 * Wh, DEC_CH[i + 1])
        else:
            d_low = out2d.reshape(B, Hh, Wh, OUT_CH)          # (B, H/4, W/4, 3)

    # ---- output tail: transpose/cast at LOW resolution, then lane-dense 4x
    #      nearest upsample (1x1 head already hoisted before the upsample).
    d_low = jnp.transpose(d_low, (0, 3, 1, 2)).astype(jnp.float32)   # (B,3,H/4,W/4)
    out = jnp.repeat(jnp.repeat(d_low, 4, axis=2), 4, axis=3)        # (B,3,H,W)
    return out


# ---------------------------------------------------------------------------
if __name__ == "__main__":
    key = jax.random.PRNGKey(0)
    k_param, k_img = jax.random.split(key)

    params = init_params(k_param)

    B, H, W = 2, 64, 64                                   # H, W divisible by 32
    images = jax.random.normal(k_img, (B, IN_CH, H, W), jnp.float32)
    tasks = jnp.array([0, 2], dtype=jnp.int32)

    fwd = jax.jit(upocr_forward)
    out = fwd(params, images, tasks)
    jax.block_until_ready(out)

    assert out.shape == (B, OUT_CH, H, W), out.shape
    assert bool(jnp.all(jnp.isfinite(out)))
    print("KERNEL_OK")
</pallas_src>

<mosaic_0001>
module attributes {stable_mosaic.version = 11 : i64} {
  func.func @_patchify_kernel(%arg0: i32, %arg1: memref<16x4x16x12xbf16, #tpu.memory_space<vmem>>, %arg2: memref<4x12x32xbf16, #tpu.memory_space<vmem>>, %arg3: memref<1x32xf32, #tpu.memory_space<vmem>>, %arg4: memref<256x32xbf16, #tpu.memory_space<vmem>>) attributes {dimension_semantics = [#tpu.dimension_semantics<parallel>], iteration_bounds = array<i64: 2>, scalar_prefetch = 0 : i64, scratch_operands = 0 : i64, tpu.core_type = #tpu.core_type<tc>, window_params = [{transform_indices = @transform_0, window_bounds = array<i64: 16, 4, 16, 12>}, {pipeline_mode = #tpu.pipeline_mode<synchronous>, transform_indices = @transform_1, window_bounds = array<i64: 4, 12, 32>}, {pipeline_mode = #tpu.pipeline_mode<synchronous>, transform_indices = @transform_2, window_bounds = array<i64: 1, 32>}, {transform_indices = @transform_3, window_bounds = array<i64: 256, 32>}]} {
    %c0 = arith.constant 0 : index
    %c0_0 = arith.constant 0 : index
    %c0_1 = arith.constant 0 : index
    %c0_2 = arith.constant 0 : index
    %0 = vector.load %arg1[%c0, %c0_0, %c0_1, %c0_2] : memref<16x4x16x12xbf16, #tpu.memory_space<vmem>>, vector<16x4x16x12xbf16>
    %1 = vector.extract_strided_slice %0 {offsets = [0, 0, 0, 0], sizes = [16, 1, 16, 12], strides = [1, 1, 1, 1]} : vector<16x4x16x12xbf16> to vector<16x1x16x12xbf16>
    %2 = vector.shape_cast %1 : vector<16x1x16x12xbf16> to vector<16x16x12xbf16>
    %3 = vector.shape_cast %2 : vector<16x16x12xbf16> to vector<256x12xbf16>
    %c0_3 = arith.constant 0 : index
    %c0_4 = arith.constant 0 : index
    %c0_5 = arith.constant 0 : index
    %4 = vector.load %arg2[%c0_3, %c0_4, %c0_5] : memref<4x12x32xbf16, #tpu.memory_space<vmem>>, vector<1x12x32xbf16>
    %5 = vector.shape_cast %4 : vector<1x12x32xbf16> to vector<12x32xbf16>
    %cst = arith.constant dense<0.000000e+00> : vector<256x32xf32>
    %6 = tpu.matmul %3, %5, %cst {dimension_numbers = #tpu.dot_dimension_numbers<[1], [0], [0], [1], [0, 0, 1, 1], [], []>} : vector<256x12xbf16>, vector<12x32xbf16>, vector<256x32xf32> -> vector<256x32xf32>
    %7 = vector.extract_strided_slice %0 {offsets = [0, 1, 0, 0], sizes = [16, 1, 16, 12], strides = [1, 1, 1, 1]} : vector<16x4x16x12xbf16> to vector<16x1x16x12xbf16>
    %8 = vector.shape_cast %7 : vector<16x1x16x12xbf16> to vector<16x16x12xbf16>
    %9 = vector.shape_cast %8 : vector<16x16x12xbf16> to vector<256x12xbf16>
    %c1 = arith.constant 1 : index
    %c0_6 = arith.constant 0 : index
    %c0_7 = arith.constant 0 : index
    %10 = vector.load %arg2[%c1, %c0_6, %c0_7] : memref<4x12x32xbf16, #tpu.memory_space<vmem>>, vector<1x12x32xbf16>
    %11 = vector.shape_cast %10 : vector<1x12x32xbf16> to vector<12x32xbf16>
    %cst_8 = arith.constant dense<0.000000e+00> : vector<256x32xf32>
    %12 = tpu.matmul %9, %11, %cst_8 {dimension_numbers = #tpu.dot_dimension_numbers<[1], [0], [0], [1], [0, 0, 1, 1], [], []>} : vector<256x12xbf16>, vector<12x32xbf16>, vector<256x32xf32> -> vector<256x32xf32>
    %13 = arith.addf %6, %12 : vector<256x32xf32>
    %14 = vector.extract_strided_slice %0 {offsets = [0, 2, 0, 0], sizes = [16, 1, 16, 12], strides = [1, 1, 1, 1]} : vector<16x4x16x12xbf16> to vector<16x1x16x12xbf16>
    %15 = vector.shape_cast %14 : vector<16x1x16x12xbf16> to vector<16x16x12xbf16>
    %16 = vector.shape_cast %15 : vector<16x16x12xbf16> to vector<256x12xbf16>
    %c2 = arith.constant 2 : index
    %c0_9 = arith.constant 0 : index
    %c0_10 = arith.constant 0 : index
    %17 = vector.load %arg2[%c2, %c0_9, %c0_10] : memref<4x12x32xbf16, #tpu.memory_space<vmem>>, vector<1x12x32xbf16>
    %18 = vector.shape_cast %17 : vector<1x12x32xbf16> to vector<12x32xbf16>
    %cst_11 = arith.constant dense<0.000000e+00> : vector<256x32xf32>
    %19 = tpu.matmul %16, %18, %cst_11 {dimension_numbers = #tpu.dot_dimension_numbers<[1], [0], [0], [1], [0, 0, 1, 1], [], []>} : vector<256x12xbf16>, vector<12x32xbf16>, vector<256x32xf32> -> vector<256x32xf32>
    %20 = arith.addf %13, %19 : vector<256x32xf32>
    %21 = vector.extract_strided_slice %0 {offsets = [0, 3, 0, 0], sizes = [16, 1, 16, 12], strides = [1, 1, 1, 1]} : vector<16x4x16x12xbf16> to vector<16x1x16x12xbf16>
    %22 = vector.shape_cast %21 : vector<16x1x16x12xbf16> to vector<16x16x12xbf16>
    %23 = vector.shape_cast %22 : vector<16x16x12xbf16> to vector<256x12xbf16>
    %c3 = arith.constant 3 : index
    %c0_12 = arith.constant 0 : index
    %c0_13 = arith.constant 0 : index
    %24 = vector.load %arg2[%c3, %c0_12, %c0_13] : memref<4x12x32xbf16, #tpu.memory_space<vmem>>, vector<1x12x32xbf16>
    %25 = vector.shape_cast %24 : vector<1x12x32xbf16> to vector<12x32xbf16>
    %cst_14 = arith.constant dense<0.000000e+00> : vector<256x32xf32>
    %26 = tpu.matmul %23, %25, %cst_14 {dimension_numbers = #tpu.dot_dimension_numbers<[1], [0], [0], [1], [0, 0, 1, 1], [], []>} : vector<256x12xbf16>, vector<12x32xbf16>, vector<256x32xf32> -> vector<256x32xf32>
    %27 = arith.addf %20, %26 : vector<256x32xf32>
    %c0_15 = arith.constant 0 : index
    %c0_16 = arith.constant 0 : index
    %28 = vector.load %arg3[%c0_15, %c0_16] : memref<1x32xf32, #tpu.memory_space<vmem>>, vector<1x32xf32>
    %29 = vector.broadcast %28 : vector<1x32xf32> to vector<256x32xf32>
    %30 = arith.addf %27, %29 : vector<256x32xf32>
    %31 = arith.mulf %30, %30 : vector<256x32xf32>
    %32 = arith.mulf %30, %31 : vector<256x32xf32>
    %cst_17 = arith.constant 4.471500e-02 : f32
    %33 = vector.broadcast %cst_17 : f32 to vector<256x32xf32>
    %34 = arith.mulf %33, %32 : vector<256x32xf32>
    %35 = arith.addf %30, %34 : vector<256x32xf32>
    %cst_18 = arith.constant 0.797884583 : f32
    %36 = vector.broadcast %cst_18 : f32 to vector<256x32xf32>
    %37 = arith.mulf %36, %35 : vector<256x32xf32>
    %38 = math.tanh %37 : vector<256x32xf32>
    %cst_19 = arith.constant 1.000000e+00 : f32
    %39 = vector.broadcast %cst_19 : f32 to vector<256x32xf32>
    %40 = arith.addf %39, %38 : vector<256x32xf32>
    %cst_20 = arith.constant 5.000000e-01 : f32
    %41 = vector.broadcast %cst_20 : f32 to vector<256x32xf32>
    %42 = arith.mulf %41, %40 : vector<256x32xf32>
    %43 = arith.mulf %30, %42 : vector<256x32xf32>
    %44 = arith.truncf %43 : vector<256x32xf32> to vector<256x32xbf16>
    %c0_21 = arith.constant 0 : index
    %c0_22 = arith.constant 0 : index
    %45 = vector.load %arg4[%c0_21, %c0_22] : memref<256x32xbf16, #tpu.memory_space<vmem>>, vector<256x32xbf16>
    tpu.vector_store %arg4[%c0_21, %c0_22], %44 {strides = array<i32>} : memref<256x32xbf16, #tpu.memory_space<vmem>>, vector<256x32xbf16>,
    return
  }
  func.func @transform_0(%arg0: i32) -> (i32, i32, i32, i32) {
    %c0_i32 = arith.constant 0 : i32
    %c0_i32_0 = arith.constant 0 : i32
    %c0_i32_1 = arith.constant 0 : i32
    %c0_i32_2 = arith.constant 0 : i32
    return %arg0, %c0_i32, %c0_i32_0, %c0_i32_1 : i32, i32, i32, i32
  }
  func.func @transform_1(%arg0: i32) -> (i32, i32, i32) {
    %c0_i32 = arith.constant 0 : i32
    %c0_i32_0 = arith.constant 0 : i32
    %c0_i32_1 = arith.constant 0 : i32
    %c0_i32_2 = arith.constant 0 : i32
    return %c0_i32, %c0_i32_0, %c0_i32_1 : i32, i32, i32
  }
  func.func @transform_2(%arg0: i32) -> (i32, i32) {
    %c0_i32 = arith.constant 0 : i32
    %c0_i32_0 = arith.constant 0 : i32
    %c0_i32_1 = arith.constant 0 : i32
    return %c0_i32, %c0_i32_0 : i32, i32
  }
  func.func @transform_3(%arg0: i32) -> (i32, i32) {
    %c0_i32 = arith.constant 0 : i32
    %c0_i32_0 = arith.constant 0 : i32
    return %arg0, %c0_i32 : i32, i32
  }
}

module attributes {stable_mosaic.version = 11 : i64} {
  func.func @_patchify_kernel(%arg0: i32, %arg1: memref<8x2x8x64xbf16, #tpu.memory_space<vmem>>, %arg2: memref<2x64x64xbf16, #tpu.memory_space<vmem>>, %arg3: memref<1x64xf32, #tpu.memory_space<vmem>>, %arg4: memref<64x64xbf16, #tpu.memory_space<vmem>>) attributes {dimension_semantics = [#tpu.dimension_semantics<parallel>], iteration_bounds = array<i64: 2>, scalar_prefetch = 0 : i64, scratch_operands = 0 : i64, tpu.core_type = #tpu.core_type<tc>, window_params = [{transform_indices = @transform_0, window_bounds = array<i64: 8, 2, 8, 64>}, {pipeline_mode = #tpu.pipeline_mode<synchronous>, transform_indices = @transform_1, window_bounds = array<i64: 2, 64, 64>}, {pipeline_mode = #tpu.pipeline_mode<synchronous>, transform_indices = @transform_2, window_bounds = array<i64: 1, 64>}, {transform_indices = @transform_3, window_bounds = array<i64: 64, 64>}]} {
    %c0 = arith.constant 0 : index
    %c0_0 = arith.constant 0 : index
    %c0_1 = arith.constant 0 : index
    %c0_2 = arith.constant 0 : index
    %0 = vector.load %arg1[%c0, %c0_0, %c0_1, %c0_2] : memref<8x2x8x64xbf16, #tpu.memory_space<vmem>>, vector<8x2x8x64xbf16>
    %1 = vector.extract_strided_slice %0 {offsets = [0, 0, 0, 0], sizes = [8, 1, 8, 64], strides = [1, 1, 1, 1]} : vector<8x2x8x64xbf16> to vector<8x1x8x64xbf16>
    %2 = vector.shape_cast %1 : vector<8x1x8x64xbf16> to vector<8x8x64xbf16>
    %3 = vector.shape_cast %2 : vector<8x8x64xbf16> to vector<64x64xbf16>
    %c0_3 = arith.constant 0 : index
    %c0_4 = arith.constant 0 : index
    %c0_5 = arith.constant 0 : index
    %4 = vector.load %arg2[%c0_3, %c0_4, %c0_5] : memref<2x64x64xbf16, #tpu.memory_space<vmem>>, vector<1x64x64xbf16>
    %5 = vector.shape_cast %4 : vector<1x64x64xbf16> to vector<64x64xbf16>
    %cst = arith.constant dense<0.000000e+00> : vector<64x64xf32>
    %6 = tpu.matmul %3, %5, %cst {dimension_numbers = #tpu.dot_dimension_numbers<[1], [0], [0], [1], [0, 0, 1, 1], [], []>} : vector<64x64xbf16>, vector<64x64xbf16>, vector<64x64xf32> -> vector<64x64xf32>
    %7 = vector.extract_strided_slice %0 {offsets = [0, 1, 0, 0], sizes = [8, 1, 8, 64], strides = [1, 1, 1, 1]} : vector<8x2x8x64xbf16> to vector<8x1x8x64xbf16>
    %8 = vector.shape_cast %7 : vector<8x1x8x64xbf16> to vector<8x8x64xbf16>
    %9 = vector.shape_cast %8 : vector<8x8x64xbf16> to vector<64x64xbf16>
    %c1 = arith.constant 1 : index
    %c0_6 = arith.constant 0 : index
    %c0_7 = arith.constant 0 : index
    %10 = vector.load %arg2[%c1, %c0_6, %c0_7] : memref<2x64x64xbf16, #tpu.memory_space<vmem>>, vector<1x64x64xbf16>
    %11 = vector.shape_cast %10 : vector<1x64x64xbf16> to vector<64x64xbf16>
    %cst_8 = arith.constant dense<0.000000e+00> : vector<64x64xf32>
    %12 = tpu.matmul %9, %11, %cst_8 {dimension_numbers = #tpu.dot_dimension_numbers<[1], [0], [0], [1], [0, 0, 1, 1], [], []>} : vector<64x64xbf16>, vector<64x64xbf16>, vector<64x64xf32> -> vector<64x64xf32>
    %13 = arith.addf %6, %12 : vector<64x64xf32>
    %c0_9 = arith.constant 0 : index
    %c0_10 = arith.constant 0 : index
    %14 = vector.load %arg3[%c0_9, %c0_10] : memref<1x64xf32, #tpu.memory_space<vmem>>, vector<1x64xf32>
    %15 = vector.broadcast %14 : vector<1x64xf32> to vector<64x64xf32>
    %16 = arith.addf %13, %15 : vector<64x64xf32>
    %17 = arith.mulf %16, %16 : vector<64x64xf32>
    %18 = arith.mulf %16, %17 : vector<64x64xf32>
    %cst_11 = arith.constant 4.471500e-02 : f32
    %19 = vector.broadcast %cst_11 : f32 to vector<64x64xf32>
    %20 = arith.mulf %19, %18 : vector<64x64xf32>
    %21 = arith.addf %16, %20 : vector<64x64xf32>
    %cst_12 = arith.constant 0.797884583 : f32
    %22 = vector.broadcast %cst_12 : f32 to vector<64x64xf32>
    %23 = arith.mulf %22, %21 : vector<64x64xf32>
    %24 = math.tanh %23 : vector<64x64xf32>
    %cst_13 = arith.constant 1.000000e+00 : f32
    %25 = vector.broadcast %cst_13 : f32 to vector<64x64xf32>
    %26 = arith.addf %25, %24 : vector<64x64xf32>
    %cst_14 = arith.constant 5.000000e-01 : f32
    %27 = vector.broadcast %cst_14 : f32 to vector<64x64xf32>
    %28 = arith.mulf %27, %26 : vector<64x64xf32>
    %29 = arith.mulf %16, %28 : vector<64x64xf32>
    %30 = arith.truncf %29 : vector<64x64xf32> to vector<64x64xbf16>
    %c0_15 = arith.constant 0 : index
    %c0_16 = arith.constant 0 : index
    %31 = vector.load %arg4[%c0_15, %c0_16] : memref<64x64xbf16, #tpu.memory_space<vmem>>, vector<64x64xbf16>
    tpu.vector_store %arg4[%c0_15, %c0_16], %30 {strides = array<i32>} : memref<64x64xbf16, #tpu.memory_space<vmem>>, vector<64x64xbf16>,
    return
  }
  func.func @transform_0(%arg0: i32) -> (i32, i32, i32, i32) {
    %c0_i32 = arith.constant 0 : i32
    %c0_i32_0 = arith.constant 0 : i32
    %c0_i32_1 = arith.constant 0 : i32
    %c0_i32_2 = arith.constant 0 : i32
    return %arg0, %c0_i32, %c0_i32_0, %c0_i32_1 : i32, i32, i32, i32
  }
  func.func @transform_1(%arg0: i32) -> (i32, i32, i32) {
    %c0_i32 = arith.constant 0 : i32
    %c0_i32_0 = arith.constant 0 : i32
    %c0_i32_1 = arith.constant 0 : i32
    %c0_i32_2 = arith.constant 0 : i32
    return %c0_i32, %c0_i32_0, %c0_i32_1 : i32, i32, i32
  }
  func.func @transform_2(%arg0: i32) -> (i32, i32) {
    %c0_i32 = arith.constant 0 : i32
    %c0_i32_0 = arith.constant 0 : i32
    %c0_i32_1 = arith.constant 0 : i32
    return %c0_i32, %c0_i32_0 : i32, i32
  }
  func.func @transform_3(%arg0: i32) -> (i32, i32) {
    %c0_i32 = arith.constant 0 : i32
    %c0_i32_0 = arith.constant 0 : i32
    return %arg0, %c0_i32 : i32, i32
  }
}

module attributes {stable_mosaic.version = 11 : i64} {
  func.func @_patchify_kernel(%arg0: i32, %arg1: memref<8x2x4x128xbf16, #tpu.memory_space<vmem>>, %arg2: memref<2x128x128xbf16, #tpu.memory_space<vmem>>, %arg3: memref<1x128xf32, #tpu.memory_space<vmem>>, %arg4: memref<32x128xbf16, #tpu.memory_space<vmem>>) attributes {dimension_semantics = [#tpu.dimension_semantics<parallel>], iteration_bounds = array<i64: 1>, scalar_prefetch = 0 : i64, scratch_operands = 0 : i64, tpu.core_type = #tpu.core_type<tc>, window_params = [{transform_indices = @transform_0, window_bounds = array<i64: 8, 2, 4, 128>}, {pipeline_mode = #tpu.pipeline_mode<synchronous>, transform_indices = @transform_1, window_bounds = array<i64: 2, 128, 128>}, {pipeline_mode = #tpu.pipeline_mode<synchronous>, transform_indices = @transform_2, window_bounds = array<i64: 1, 128>}, {transform_indices = @transform_3, window_bounds = array<i64: 32, 128>}]} {
    %c0 = arith.constant 0 : index
    %c0_0 = arith.constant 0 : index
    %c0_1 = arith.constant 0 : index
    %c0_2 = arith.constant 0 : index
    %0 = vector.load %arg1[%c0, %c0_0, %c0_1, %c0_2] : memref<8x2x4x128xbf16, #tpu.memory_space<vmem>>, vector<8x2x4x128xbf16>
    %1 = vector.extract_strided_slice %0 {offsets = [0, 0, 0, 0], sizes = [8, 1, 4, 128], strides = [1, 1, 1, 1]} : vector<8x2x4x128xbf16> to vector<8x1x4x128xbf16>
    %2 = vector.shape_cast %1 : vector<8x1x4x128xbf16> to vector<8x4x128xbf16>
    %3 = vector.shape_cast %2 : vector<8x4x128xbf16> to vector<32x128xbf16>
    %c0_3 = arith.constant 0 : index
    %c0_4 = arith.constant 0 : index
    %c0_5 = arith.constant 0 : index
    %4 = vector.load %arg2[%c0_3, %c0_4, %c0_5] : memref<2x128x128xbf16, #tpu.memory_space<vmem>>, vector<1x128x128xbf16>
    %5 = vector.shape_cast %4 : vector<1x128x128xbf16> to vector<128x128xbf16>
    %cst = arith.constant dense<0.000000e+00> : vector<32x128xf32>
    %6 = tpu.matmul %3, %5, %cst {dimension_numbers = #tpu.dot_dimension_numbers<[1], [0], [0], [1], [0, 0, 1, 1], [], []>} : vector<32x128xbf16>, vector<128x128xbf16>, vector<32x128xf32> -> vector<32x128xf32>
    %7 = vector.extract_strided_slice %0 {offsets = [0, 1, 0, 0], sizes = [8, 1, 4, 128], strides = [1, 1, 1, 1]} : vector<8x2x4x128xbf16> to vector<8x1x4x128xbf16>
    %8 = vector.shape_cast %7 : vector<8x1x4x128xbf16> to vector<8x4x128xbf16>
    %9 = vector.shape_cast %8 : vector<8x4x128xbf16> to vector<32x128xbf16>
    %c1 = arith.constant 1 : index
    %c0_6 = arith.constant 0 : index
    %c0_7 = arith.constant 0 : index
    %10 = vector.load %arg2[%c1, %c0_6, %c0_7] : memref<2x128x128xbf16, #tpu.memory_space<vmem>>, vector<1x128x128xbf16>
    %11 = vector.shape_cast %10 : vector<1x128x128xbf16> to vector<128x128xbf16>
    %cst_8 = arith.constant dense<0.000000e+00> : vector<32x128xf32>
    %12 = tpu.matmul %9, %11, %cst_8 {dimension_numbers = #tpu.dot_dimension_numbers<[1], [0], [0], [1], [0, 0, 1, 1], [], []>} : vector<32x128xbf16>, vector<128x128xbf16>, vector<32x128xf32> -> vector<32x128xf32>
    %13 = arith.addf %6, %12 : vector<32x128xf32>
    %c0_9 = arith.constant 0 : index
    %c0_10 = arith.constant 0 : index
    %14 = vector.load %arg3[%c0_9, %c0_10] : memref<1x128xf32, #tpu.memory_space<vmem>>, vector<1x128xf32>
    %15 = vector.broadcast %14 : vector<1x128xf32> to vector<32x128xf32>
    %16 = arith.addf %13, %15 : vector<32x128xf32>
    %17 = arith.mulf %16, %16 : vector<32x128xf32>
    %18 = arith.mulf %16, %17 : vector<32x128xf32>
    %cst_11 = arith.constant 4.471500e-02 : f32
    %19 = vector.broadcast %cst_11 : f32 to vector<32x128xf32>
    %20 = arith.mulf %19, %18 : vector<32x128xf32>
    %21 = arith.addf %16, %20 : vector<32x128xf32>
    %cst_12 = arith.constant 0.797884583 : f32
    %22 = vector.broadcast %cst_12 : f32 to vector<32x128xf32>
    %23 = arith.mulf %22, %21 : vector<32x128xf32>
    %24 = math.tanh %23 : vector<32x128xf32>
    %cst_13 = arith.constant 1.000000e+00 : f32
    %25 = vector.broadcast %cst_13 : f32 to vector<32x128xf32>
    %26 = arith.addf %25, %24 : vector<32x128xf32>
    %cst_14 = arith.constant 5.000000e-01 : f32
    %27 = vector.broadcast %cst_14 : f32 to vector<32x128xf32>
    %28 = arith.mulf %27, %26 : vector<32x128xf32>
    %29 = arith.mulf %16, %28 : vector<32x128xf32>
    %30 = arith.truncf %29 : vector<32x128xf32> to vector<32x128xbf16>
    %c0_15 = arith.constant 0 : index
    %c0_16 = arith.constant 0 : index
    %31 = vector.load %arg4[%c0_15, %c0_16] : memref<32x128xbf16, #tpu.memory_space<vmem>>, vector<32x128xbf16>
    tpu.vector_store %arg4[%c0_15, %c0_16], %30 {strides = array<i32>} : memref<32x128xbf16, #tpu.memory_space<vmem>>, vector<32x128xbf16>,
    return
  }
  func.func @transform_0(%arg0: i32) -> (i32, i32, i32, i32) {
    %c0_i32 = arith.constant 0 : i32
    %c0_i32_0 = arith.constant 0 : i32
    %c0_i32_1 = arith.constant 0 : i32
    %c0_i32_2 = arith.constant 0 : i32
    return %arg0, %c0_i32, %c0_i32_0, %c0_i32_1 : i32, i32, i32, i32
  }
  func.func @transform_1(%arg0: i32) -> (i32, i32, i32) {
    %c0_i32 = arith.constant 0 : i32
    %c0_i32_0 = arith.constant 0 : i32
    %c0_i32_1 = arith.constant 0 : i32
    %c0_i32_2 = arith.constant 0 : i32
    return %c0_i32, %c0_i32_0, %c0_i32_1 : i32, i32, i32
  }
  func.func @transform_2(%arg0: i32) -> (i32, i32) {
    %c0_i32 = arith.constant 0 : i32
    %c0_i32_0 = arith.constant 0 : i32
    %c0_i32_1 = arith.constant 0 : i32
    return %c0_i32, %c0_i32_0 : i32, i32
  }
  func.func @transform_3(%arg0: i32) -> (i32, i32) {
    %c0_i32 = arith.constant 0 : i32
    %c0_i32_0 = arith.constant 0 : i32
    return %arg0, %c0_i32 : i32, i32
  }
}

module attributes {stable_mosaic.version = 11 : i64} {
  func.func @_patchify_kernel(%arg0: i32, %arg1: memref<4x2x2x256xbf16, #tpu.memory_space<vmem>>, %arg2: memref<2x256x256xbf16, #tpu.memory_space<vmem>>, %arg3: memref<1x256xf32, #tpu.memory_space<vmem>>, %arg4: memref<8x256xbf16, #tpu.memory_space<vmem>>) attributes {dimension_semantics = [#tpu.dimension_semantics<parallel>], iteration_bounds = array<i64: 1>, scalar_prefetch = 0 : i64, scratch_operands = 0 : i64, tpu.core_type = #tpu.core_type<tc>, window_params = [{transform_indices = @transform_0, window_bounds = array<i64: 4, 2, 2, 256>}, {pipeline_mode = #tpu.pipeline_mode<synchronous>, transform_indices = @transform_1, window_bounds = array<i64: 2, 256, 256>}, {pipeline_mode = #tpu.pipeline_mode<synchronous>, transform_indices = @transform_2, window_bounds = array<i64: 1, 256>}, {transform_indices = @transform_3, window_bounds = array<i64: 8, 256>}]} {
    %c0 = arith.constant 0 : index
    %c0_0 = arith.constant 0 : index
    %c0_1 = arith.constant 0 : index
    %c0_2 = arith.constant 0 : index
    %0 = vector.load %arg1[%c0, %c0_0, %c0_1, %c0_2] : memref<4x2x2x256xbf16, #tpu.memory_space<vmem>>, vector<4x2x2x256xbf16>
    %1 = vector.extract_strided_slice %0 {offsets = [0, 0, 0, 0], sizes = [4, 1, 2, 256], strides = [1, 1, 1, 1]} : vector<4x2x2x256xbf16> to vector<4x1x2x256xbf16>
    %2 = vector.shape_cast %1 : vector<4x1x2x256xbf16> to vector<4x2x256xbf16>
    %3 = vector.shape_cast %2 : vector<4x2x256xbf16> to vector<8x256xbf16>
    %c0_3 = arith.constant 0 : index
    %c0_4 = arith.constant 0 : index
    %c0_5 = arith.constant 0 : index
    %4 = vector.load %arg2[%c0_3, %c0_4, %c0_5] : memref<2x256x256xbf16, #tpu.memory_space<vmem>>, vector<1x256x256xbf16>
    %5 = vector.shape_cast %4 : vector<1x256x256xbf16> to vector<256x256xbf16>
    %cst = arith.constant dense<0.000000e+00> : vector<8x256xf32>
    %6 = tpu.matmul %3, %5, %cst {dimension_numbers = #tpu.dot_dimension_numbers<[1], [0], [0], [1], [0, 0, 1, 1], [], []>} : vector<8x256xbf16>, vector<256x256xbf16>, vector<8x256xf32> -> vector<8x256xf32>
    %7 = vector.extract_strided_slice %0 {offsets = [0, 1, 0, 0], sizes = [4, 1, 2, 256], strides = [1, 1, 1, 1]} : vector<4x2x2x256xbf16> to vector<4x1x2x256xbf16>
    %8 = vector.shape_cast %7 : vector<4x1x2x256xbf16> to vector<4x2x256xbf16>
    %9 = vector.shape_cast %8 : vector<4x2x256xbf16> to vector<8x256xbf16>
    %c1 = arith.constant 1 : index
    %c0_6 = arith.constant 0 : index
    %c0_7 = arith.constant 0 : index
    %10 = vector.load %arg2[%c1, %c0_6, %c0_7] : memref<2x256x256xbf16, #tpu.memory_space<vmem>>, vector<1x256x256xbf16>
    %11 = vector.shape_cast %10 : vector<1x256x256xbf16> to vector<256x256xbf16>
    %cst_8 = arith.constant dense<0.000000e+00> : vector<8x256xf32>
    %12 = tpu.matmul %9, %11, %cst_8 {dimension_numbers = #tpu.dot_dimension_numbers<[1], [0], [0], [1], [0, 0, 1, 1], [], []>} : vector<8x256xbf16>, vector<256x256xbf16>, vector<8x256xf32> -> vector<8x256xf32>
    %13 = arith.addf %6, %12 : vector<8x256xf32>
    %c0_9 = arith.constant 0 : index
    %c0_10 = arith.constant 0 : index
    %14 = vector.load %arg3[%c0_9, %c0_10] : memref<1x256xf32, #tpu.memory_space<vmem>>, vector<1x256xf32>
    %15 = vector.broadcast %14 : vector<1x256xf32> to vector<8x256xf32>
    %16 = arith.addf %13, %15 : vector<8x256xf32>
    %17 = arith.mulf %16, %16 : vector<8x256xf32>
    %18 = arith.mulf %16, %17 : vector<8x256xf32>
    %cst_11 = arith.constant 4.471500e-02 : f32
    %19 = vector.broadcast %cst_11 : f32 to vector<8x256xf32>
    %20 = arith.mulf %19, %18 : vector<8x256xf32>
    %21 = arith.addf %16, %20 : vector<8x256xf32>
    %cst_12 = arith.constant 0.797884583 : f32
    %22 = vector.broadcast %cst_12 : f32 to vector<8x256xf32>
    %23 = arith.mulf %22, %21 : vector<8x256xf32>
    %24 = math.tanh %23 : vector<8x256xf32>
    %cst_13 = arith.constant 1.000000e+00 : f32
    %25 = vector.broadcast %cst_13 : f32 to vector<8x256xf32>
    %26 = arith.addf %25, %24 : vector<8x256xf32>
    %cst_14 = arith.constant 5.000000e-01 : f32
    %27 = vector.broadcast %cst_14 : f32 to vector<8x256xf32>
    %28 = arith.mulf %27, %26 : vector<8x256xf32>
    %29 = arith.mulf %16, %28 : vector<8x256xf32>
    %30 = arith.truncf %29 : vector<8x256xf32> to vector<8x256xbf16>
    %c0_15 = arith.constant 0 : index
    %c0_16 = arith.constant 0 : index
    %31 = vector.load %arg4[%c0_15, %c0_16] : memref<8x256xbf16, #tpu.memory_space<vmem>>, vector<8x256xbf16>
    tpu.vector_store %arg4[%c0_15, %c0_16], %30 {strides = array<i32>} : memref<8x256xbf16, #tpu.memory_space<vmem>>, vector<8x256xbf16>,
    return
  }
  func.func @transform_0(%arg0: i32) -> (i32, i32, i32, i32) {
    %c0_i32 = arith.constant 0 : i32
    %c0_i32_0 = arith.constant 0 : i32
    %c0_i32_1 = arith.constant 0 : i32
    %c0_i32_2 = arith.constant 0 : i32
    return %arg0, %c0_i32, %c0_i32_0, %c0_i32_1 : i32, i32, i32, i32
  }
  func.func @transform_1(%arg0: i32) -> (i32, i32, i32) {
    %c0_i32 = arith.constant 0 : i32
    %c0_i32_0 = arith.constant 0 : i32
    %c0_i32_1 = arith.constant 0 : i32
    %c0_i32_2 = arith.constant 0 : i32
    return %c0_i32, %c0_i32_0, %c0_i32_1 : i32, i32, i32
  }
  func.func @transform_2(%arg0: i32) -> (i32, i32) {
    %c0_i32 = arith.constant 0 : i32
    %c0_i32_0 = arith.constant 0 : i32
    %c0_i32_1 = arith.constant 0 : i32
    return %c0_i32, %c0_i32_0 : i32, i32
  }
  func.func @transform_3(%arg0: i32) -> (i32, i32) {
    %c0_i32 = arith.constant 0 : i32
    %c0_i32_0 = arith.constant 0 : i32
    return %arg0, %c0_i32 : i32, i32
  }
}

module attributes {stable_mosaic.version = 11 : i64} {
  func.func @_proj_kernel(%arg0: i32, %arg1: i32, %arg2: memref<1x4x256xbf16, #tpu.memory_space<vmem>>, %arg3: memref<256x128xbf16, #tpu.memory_space<vmem>>, %arg4: memref<1x128xf32, #tpu.memory_space<vmem>>, %arg5: memref<1x1x128xf32, #tpu.memory_space<vmem>>, %arg6: memref<128x128xbf16, #tpu.memory_space<vmem>>, %arg7: memref<1x4x128xbf16, #tpu.memory_space<vmem>>) attributes {dimension_semantics = [#tpu.dimension_semantics<parallel>, #tpu.dimension_semantics<parallel>], iteration_bounds = array<i64: 2, 1>, scalar_prefetch = 0 : i64, scratch_operands = 0 : i64, tpu.core_type = #tpu.core_type<tc>, window_params = [{transform_indices = @transform_0, window_bounds = array<i64: 1, 4, 256>}, {pipeline_mode = #tpu.pipeline_mode<synchronous>, transform_indices = @transform_1, window_bounds = array<i64: 256, 128>}, {pipeline_mode = #tpu.pipeline_mode<synchronous>, transform_indices = @transform_2, window_bounds = array<i64: 1, 128>}, {transform_indices = @transform_3, window_bounds = array<i64: 1, 1, 128>}, {pipeline_mode = #tpu.pipeline_mode<synchronous>, transform_indices = @transform_4, window_bounds = array<i64: 128, 128>}, {transform_indices = @transform_5, window_bounds = array<i64: 1, 4, 128>}]} {
    %c0 = arith.constant 0 : index
    %c0_0 = arith.constant 0 : index
    %c0_1 = arith.constant 0 : index
    %0 = vector.load %arg2[%c0, %c0_0, %c0_1] : memref<1x4x256xbf16, #tpu.memory_space<vmem>>, vector<1x4x256xbf16>
    %1 = vector.shape_cast %0 : vector<1x4x256xbf16> to vector<4x256xbf16>
    %c0_2 = arith.constant 0 : index
    %c0_3 = arith.constant 0 : index
    %2 = vector.load %arg3[%c0_2, %c0_3] : memref<256x128xbf16, #tpu.memory_space<vmem>>, vector<256x128xbf16>
    %cst = arith.constant dense<0.000000e+00> : vector<4x128xf32>
    %3 = tpu.matmul %1, %2, %cst {dimension_numbers = #tpu.dot_dimension_numbers<[1], [0], [0], [1], [0, 0, 1, 1], [], []>} : vector<4x256xbf16>, vector<256x128xbf16>, vector<4x128xf32> -> vector<4x128xf32>
    %c0_4 = arith.constant 0 : index
    %c0_5 = arith.constant 0 : index
    %4 = vector.load %arg4[%c0_4, %c0_5] : memref<1x128xf32, #tpu.memory_space<vmem>>, vector<1x128xf32>
    %5 = vector.broadcast %4 : vector<1x128xf32> to vector<4x128xf32>
    %6 = arith.addf %3, %5 : vector<4x128xf32>
    %c0_6 = arith.constant 0 : index
    %c0_7 = arith.constant 0 : index
    %c0_8 = arith.constant 0 : index
    %7 = vector.load %arg5[%c0_6, %c0_7, %c0_8] : memref<1x1x128xf32, #tpu.memory_space<vmem>>, vector<1x1x128xf32>
    %8 = vector.shape_cast %7 : vector<1x1x128xf32> to vector<1x128xf32>
    %9 = vector.broadcast %8 : vector<1x128xf32> to vector<4x128xf32>
    %10 = arith.addf %6, %9 : vector<4x128xf32>
    %11 = arith.truncf %10 : vector<4x128xf32> to vector<4x128xbf16>
    %c0_9 = arith.constant 0 : index
    %c0_10 = arith.constant 0 : index
    %12 = vector.load %arg6[%c0_9, %c0_10] : memref<128x128xbf16, #tpu.memory_space<vmem>>, vector<128x128xbf16>
    %cst_11 = arith.constant dense<0.000000e+00> : vector<4x128xf32>
    %13 = tpu.matmul %11, %12, %cst_11 {dimension_numbers = #tpu.dot_dimension_numbers<[1], [0], [0], [1], [0, 0, 1, 1], [], []>} : vector<4x128xbf16>, vector<128x128xbf16>, vector<4x128xf32> -> vector<4x128xf32>
    %14 = arith.truncf %13 : vector<4x128xf32> to vector<4x128xbf16>
    %c0_12 = arith.constant 0 : index
    %c0_13 = arith.constant 0 : index
    %c0_14 = arith.constant 0 : index
    %15 = vector.load %arg7[%c0_12, %c0_13, %c0_14] : memref<1x4x128xbf16, #tpu.memory_space<vmem>>, vector<1x4x128xbf16>
    %16 = vector.shape_cast %15 : vector<1x4x128xbf16> to vector<4x128xbf16>
    %17 = vector.shape_cast %14 : vector<4x128xbf16> to vector<1x4x128xbf16>
    tpu.vector_store %arg7[%c0_12, %c0_13, %c0_14], %17 {strides = array<i32>} : memref<1x4x128xbf16, #tpu.memory_space<vmem>>, vector<1x4x128xbf16>,
    return
  }
  func.func @transform_0(%arg0: i32, %arg1: i32) -> (i32, i32, i32) {
    %c0_i32 = arith.constant 0 : i32
    %c0_i32_0 = arith.constant 0 : i32
    return %arg0, %arg1, %c0_i32 : i32, i32, i32
  }
  func.func @transform_1(%arg0: i32, %arg1: i32) -> (i32, i32) {
    %c0_i32 = arith.constant 0 : i32
    %c0_i32_0 = arith.constant 0 : i32
    %c0_i32_1 = arith.constant 0 : i32
    return %c0_i32, %c0_i32_0 : i32, i32
  }
  func.func @transform_2(%arg0: i32, %arg1: i32) -> (i32, i32) {
    %c0_i32 = arith.constant 0 : i32
    %c0_i32_0 = arith.constant 0 : i32
    %c0_i32_1 = arith.constant 0 : i32
    return %c0_i32, %c0_i32_0 : i32, i32
  }
  func.func @transform_3(%arg0: i32, %arg1: i32) -> (i32, i32, i32) {
    %c0_i32 = arith.constant 0 : i32
    %c0_i32_0 = arith.constant 0 : i32
    %c0_i32_1 = arith.constant 0 : i32
    return %arg0, %c0_i32, %c0_i32_0 : i32, i32, i32
  }
  func.func @transform_4(%arg0: i32, %arg1: i32) -> (i32, i32) {
    %c0_i32 = arith.constant 0 : i32
    %c0_i32_0 = arith.constant 0 : i32
    %c0_i32_1 = arith.constant 0 : i32
    return %c0_i32, %c0_i32_0 : i32, i32
  }
  func.func @transform_5(%arg0: i32, %arg1: i32) -> (i32, i32, i32) {
    %c0_i32 = arith.constant 0 : i32
    %c0_i32_0 = arith.constant 0 : i32
    return %arg0, %arg1, %c0_i32 : i32, i32, i32
  }
}

module attributes {stable_mosaic.version = 11 : i64} {
  func.func @_dec_stage_kernel(%arg0: i32, %arg1: memref<32x128xbf16, #tpu.memory_space<vmem>>, %arg2: memref<4x4x64xbf16, #tpu.memory_space<vmem>>, %arg3: memref<128x64xbf16, #tpu.memory_space<vmem>>, %arg4: memref<1x64xf32, #tpu.memory_space<vmem>>, %arg5: memref<64x64xbf16, #tpu.memory_space<vmem>>, %arg6: memref<32x64xbf16, #tpu.memory_space<vmem>>) attributes {dimension_semantics = [#tpu.dimension_semantics<parallel>], iteration_bounds = array<i64: 1>, scalar_prefetch = 0 : i64, scratch_operands = 0 : i64, tpu.core_type = #tpu.core_type<tc>, window_params = [{transform_indices = @transform_0, window_bounds = array<i64: 32, 128>}, {transform_indices = @transform_1, window_bounds = array<i64: 4, 4, 64>}, {pipeline_mode = #tpu.pipeline_mode<synchronous>, transform_indices = @transform_2, window_bounds = array<i64: 128, 64>}, {pipeline_mode = #tpu.pipeline_mode<synchronous>, transform_indices = @transform_3, window_bounds = array<i64: 1, 64>}, {pipeline_mode = #tpu.pipeline_mode<synchronous>, transform_indices = @transform_4, window_bounds = array<i64: 64, 64>}, {transform_indices = @transform_5, window_bounds = array<i64: 32, 64>}]} {
    %c0 = arith.constant 0 : index
    %c0_0 = arith.constant 0 : index
    %0 = vector.load %arg1[%c0, %c0_0] : memref<32x128xbf16, #tpu.memory_space<vmem>>, vector<32x128xbf16>
    %c0_1 = arith.constant 0 : index
    %c0_2 = arith.constant 0 : index
    %1 = vector.load %arg3[%c0_1, %c0_2] : memref<128x64xbf16, #tpu.memory_space<vmem>>, vector<128x64xbf16>
    %cst = arith.constant dense<0.000000e+00> : vector<32x64xf32>
    %2 = tpu.matmul %0, %1, %cst {dimension_numbers = #tpu.dot_dimension_numbers<[1], [0], [0], [1], [0, 0, 1, 1], [], []>} : vector<32x128xbf16>, vector<128x64xbf16>, vector<32x64xf32> -> vector<32x64xf32>
    %c0_3 = arith.constant 0 : index
    %c0_4 = arith.constant 0 : index
    %c0_5 = arith.constant 0 : index
    %3 = vector.load %arg2[%c0_3, %c0_4, %c0_5] : memref<4x4x64xbf16, #tpu.memory_space<vmem>>, vector<4x4x64xbf16>
    %4 = arith.extf %3 : vector<4x4x64xbf16> to vector<4x4x64xf32>
    %5 = vector.shape_cast %4 : vector<4x4x64xf32> to vector<4x1x4x64xf32>
    %6 = vector.shape_cast %5 : vector<4x1x4x64xf32> to vector<4x1x4x64xf32>
    %7 = vector.broadcast %6 : vector<4x1x4x64xf32> to vector<4x2x4x64xf32>
    %8 = vector.shape_cast %7 : vector<4x2x4x64xf32> to vector<32x64xf32>
    %9 = arith.addf %2, %8 : vector<32x64xf32>
    %c0_6 = arith.constant 0 : index
    %c0_7 = arith.constant 0 : index
    %10 = vector.load %arg4[%c0_6, %c0_7] : memref<1x64xf32, #tpu.memory_space<vmem>>, vector<1x64xf32>
    %11 = vector.broadcast %10 : vector<1x64xf32> to vector<32x64xf32>
    %12 = arith.addf %9, %11 : vector<32x64xf32>
    %13 = arith.mulf %12, %12 : vector<32x64xf32>
    %14 = arith.mulf %12, %13 : vector<32x64xf32>
    %cst_8 = arith.constant 4.471500e-02 : f32
    %15 = vector.broadcast %cst_8 : f32 to vector<32x64xf32>
    %16 = arith.mulf %15, %14 : vector<32x64xf32>
    %17 = arith.addf %12, %16 : vector<32x64xf32>
    %cst_9 = arith.constant 0.797884583 : f32
    %18 = vector.broadcast %cst_9 : f32 to vector<32x64xf32>
    %19 = arith.mulf %18, %17 : vector<32x64xf32>
    %20 = math.tanh %19 : vector<32x64xf32>
    %cst_10 = arith.constant 1.000000e+00 : f32
    %21 = vector.broadcast %cst_10 : f32 to vector<32x64xf32>
    %22 = arith.addf %21, %20 : vector<32x64xf32>
    %cst_11 = arith.constant 5.000000e-01 : f32
    %23 = vector.broadcast %cst_11 : f32 to vector<32x64xf32>
    %24 = arith.mulf %23, %22 : vector<32x64xf32>
    %25 = arith.mulf %12, %24 : vector<32x64xf32>
    %26 = arith.truncf %25 : vector<32x64xf32> to vector<32x64xbf16>
    %c0_12 = arith.constant 0 : index
    %c0_13 = arith.constant 0 : index
    %27 = vector.load %arg5[%c0_12, %c0_13] : memref<64x64xbf16, #tpu.memory_space<vmem>>, vector<64x64xbf16>
    %cst_14 = arith.constant dense<0.000000e+00> : vector<32x64xf32>
    %28 = tpu.matmul %26, %27, %cst_14 {dimension_numbers = #tpu.dot_dimension_numbers<[1], [0], [0], [1], [0, 0, 1, 1], [], []>} : vector<32x64xbf16>, vector<64x64xbf16>, vector<32x64xf32> -> vector<32x64xf32>
    %29 = arith.truncf %28 : vector<32x64xf32> to vector<32x64xbf16>
    %c0_15 = arith.constant 0 : index
    %c0_16 = arith.constant 0 : index
    %30 = vector.load %arg6[%c0_15, %c0_16] : memref<32x64xbf16, #tpu.memory_space<vmem>>, vector<32x64xbf16>
    tpu.vector_store %arg6[%c0_15, %c0_16], %29 {strides = array<i32>} : memref<32x64xbf16, #tpu.memory_space<vmem>>, vector<32x64xbf16>,
    return
  }
  func.func @transform_0(%arg0: i32) -> (i32, i32) {
    %c0_i32 = arith.constant 0 : i32
    %c0_i32_0 = arith.constant 0 : i32
    return %arg0, %c0_i32 : i32, i32
  }
  func.func @transform_1(%arg0: i32) -> (i32, i32, i32) {
    %c0_i32 = arith.constant 0 : i32
    %c0_i32_0 = arith.constant 0 : i32
    %c0_i32_1 = arith.constant 0 : i32
    return %arg0, %c0_i32, %c0_i32_0 : i32, i32, i32
  }
  func.func @transform_2(%arg0: i32) -> (i32, i32) {
    %c0_i32 = arith.constant 0 : i32
    %c0_i32_0 = arith.constant 0 : i32
    %c0_i32_1 = arith.constant 0 : i32
    return %c0_i32, %c0_i32_0 : i32, i32
  }
  func.func @transform_3(%arg0: i32) -> (i32, i32) {
    %c0_i32 = arith.constant 0 : i32
    %c0_i32_0 = arith.constant 0 : i32
    %c0_i32_1 = arith.constant 0 : i32
    return %c0_i32, %c0_i32_0 : i32, i32
  }
  func.func @transform_4(%arg0: i32) -> (i32, i32) {
    %c0_i32 = arith.constant 0 : i32
    %c0_i32_0 = arith.constant 0 : i32
    %c0_i32_1 = arith.constant 0 : i32
    return %c0_i32, %c0_i32_0 : i32, i32
  }
  func.func @transform_5(%arg0: i32) -> (i32, i32) {
    %c0_i32 = arith.constant 0 : i32
    %c0_i32_0 = arith.constant 0 : i32
    return %arg0, %c0_i32 : i32, i32
  }
}

module attributes {stable_mosaic.version = 11 : i64} {
  func.func @_dec_stage_kernel(%arg0: i32, %arg1: memref<128x64xbf16, #tpu.memory_space<vmem>>, %arg2: memref<8x8x32xbf16, #tpu.memory_space<vmem>>, %arg3: memref<64x32xbf16, #tpu.memory_space<vmem>>, %arg4: memref<1x32xf32, #tpu.memory_space<vmem>>, %arg5: memref<32x32xbf16, #tpu.memory_space<vmem>>, %arg6: memref<128x32xbf16, #tpu.memory_space<vmem>>) attributes {dimension_semantics = [#tpu.dimension_semantics<parallel>], iteration_bounds = array<i64: 1>, scalar_prefetch = 0 : i64, scratch_operands = 0 : i64, tpu.core_type = #tpu.core_type<tc>, window_params = [{transform_indices = @transform_0, window_bounds = array<i64: 128, 64>}, {transform_indices = @transform_1, window_bounds = array<i64: 8, 8, 32>}, {pipeline_mode = #tpu.pipeline_mode<synchronous>, transform_indices = @transform_2, window_bounds = array<i64: 64, 32>}, {pipeline_mode = #tpu.pipeline_mode<synchronous>, transform_indices = @transform_3, window_bounds = array<i64: 1, 32>}, {pipeline_mode = #tpu.pipeline_mode<synchronous>, transform_indices = @transform_4, window_bounds = array<i64: 32, 32>}, {transform_indices = @transform_5, window_bounds = array<i64: 128, 32>}]} {
    %c0 = arith.constant 0 : index
    %c0_0 = arith.constant 0 : index
    %0 = vector.load %arg1[%c0, %c0_0] : memref<128x64xbf16, #tpu.memory_space<vmem>>, vector<128x64xbf16>
    %c0_1 = arith.constant 0 : index
    %c0_2 = arith.constant 0 : index
    %1 = vector.load %arg3[%c0_1, %c0_2] : memref<64x32xbf16, #tpu.memory_space<vmem>>, vector<64x32xbf16>
    %cst = arith.constant dense<0.000000e+00> : vector<128x32xf32>
    %2 = tpu.matmul %0, %1, %cst {dimension_numbers = #tpu.dot_dimension_numbers<[1], [0], [0], [1], [0, 0, 1, 1], [], []>} : vector<128x64xbf16>, vector<64x32xbf16>, vector<128x32xf32> -> vector<128x32xf32>
    %c0_3 = arith.constant 0 : index
    %c0_4 = arith.constant 0 : index
    %c0_5 = arith.constant 0 : index
    %3 = vector.load %arg2[%c0_3, %c0_4, %c0_5] : memref<8x8x32xbf16, #tpu.memory_space<vmem>>, vector<8x8x32xbf16>
    %4 = arith.extf %3 : vector<8x8x32xbf16> to vector<8x8x32xf32>
    %5 = vector.shape_cast %4 : vector<8x8x32xf32> to vector<8x1x8x32xf32>
    %6 = vector.shape_cast %5 : vector<8x1x8x32xf32> to vector<8x1x8x32xf32>
    %7 = vector.broadcast %6 : vector<8x1x8x32xf32> to vector<8x2x8x32xf32>
    %8 = vector.shape_cast %7 : vector<8x2x8x32xf32> to vector<128x32xf32>
    %9 = arith.addf %2, %8 : vector<128x32xf32>
    %c0_6 = arith.constant 0 : index
    %c0_7 = arith.constant 0 : index
    %10 = vector.load %arg4[%c0_6, %c0_7] : memref<1x32xf32, #tpu.memory_space<vmem>>, vector<1x32xf32>
    %11 = vector.broadcast %10 : vector<1x32xf32> to vector<128x32xf32>
    %12 = arith.addf %9, %11 : vector<128x32xf32>
    %13 = arith.mulf %12, %12 : vector<128x32xf32>
    %14 = arith.mulf %12, %13 : vector<128x32xf32>
    %cst_8 = arith.constant 4.471500e-02 : f32
    %15 = vector.broadcast %cst_8 : f32 to vector<128x32xf32>
    %16 = arith.mulf %15, %14 : vector<128x32xf32>
    %17 = arith.addf %12, %16 : vector<128x32xf32>
    %cst_9 = arith.constant 0.797884583 : f32
    %18 = vector.broadcast %cst_9 : f32 to vector<128x32xf32>
    %19 = arith.mulf %18, %17 : vector<128x32xf32>
    %20 = math.tanh %19 : vector<128x32xf32>
    %cst_10 = arith.constant 1.000000e+00 : f32
    %21 = vector.broadcast %cst_10 : f32 to vector<128x32xf32>
    %22 = arith.addf %21, %20 : vector<128x32xf32>
    %cst_11 = arith.constant 5.000000e-01 : f32
    %23 = vector.broadcast %cst_11 : f32 to vector<128x32xf32>
    %24 = arith.mulf %23, %22 : vector<128x32xf32>
    %25 = arith.mulf %12, %24 : vector<128x32xf32>
    %26 = arith.truncf %25 : vector<128x32xf32> to vector<128x32xbf16>
    %c0_12 = arith.constant 0 : index
    %c0_13 = arith.constant 0 : index
    %27 = vector.load %arg5[%c0_12, %c0_13] : memref<32x32xbf16, #tpu.memory_space<vmem>>, vector<32x32xbf16>
    %cst_14 = arith.constant dense<0.000000e+00> : vector<128x32xf32>
    %28 = tpu.matmul %26, %27, %cst_14 {dimension_numbers = #tpu.dot_dimension_numbers<[1], [0], [0], [1], [0, 0, 1, 1], [], []>} : vector<128x32xbf16>, vector<32x32xbf16>, vector<128x32xf32> -> vector<128x32xf32>
    %29 = arith.truncf %28 : vector<128x32xf32> to vector<128x32xbf16>
    %c0_15 = arith.constant 0 : index
    %c0_16 = arith.constant 0 : index
    %30 = vector.load %arg6[%c0_15, %c0_16] : memref<128x32xbf16, #tpu.memory_space<vmem>>, vector<128x32xbf16>
    tpu.vector_store %arg6[%c0_15, %c0_16], %29 {strides = array<i32>} : memref<128x32xbf16, #tpu.memory_space<vmem>>, vector<128x32xbf16>,
    return
  }
  func.func @transform_0(%arg0: i32) -> (i32, i32) {
    %c0_i32 = arith.constant 0 : i32
    %c0_i32_0 = arith.constant 0 : i32
    return %arg0, %c0_i32 : i32, i32
  }
  func.func @transform_1(%arg0: i32) -> (i32, i32, i32) {
    %c0_i32 = arith.constant 0 : i32
    %c0_i32_0 = arith.constant 0 : i32
    %c0_i32_1 = arith.constant 0 : i32
    return %arg0, %c0_i32, %c0_i32_0 : i32, i32, i32
  }
  func.func @transform_2(%arg0: i32) -> (i32, i32) {
    %c0_i32 = arith.constant 0 : i32
    %c0_i32_0 = arith.constant 0 : i32
    %c0_i32_1 = arith.constant 0 : i32
    return %c0_i32, %c0_i32_0 : i32, i32
  }
  func.func @transform_3(%arg0: i32) -> (i32, i32) {
    %c0_i32 = arith.constant 0 : i32
    %c0_i32_0 = arith.constant 0 : i32
    %c0_i32_1 = arith.constant 0 : i32
    return %c0_i32, %c0_i32_0 : i32, i32
  }
  func.func @transform_4(%arg0: i32) -> (i32, i32) {
    %c0_i32 = arith.constant 0 : i32
    %c0_i32_0 = arith.constant 0 : i32
    %c0_i32_1 = arith.constant 0 : i32
    return %c0_i32, %c0_i32_0 : i32, i32
  }
  func.func @transform_5(%arg0: i32) -> (i32, i32) {
    %c0_i32 = arith.constant 0 : i32
    %c0_i32_0 = arith.constant 0 : i32
    return %arg0, %c0_i32 : i32, i32
  }
}

module attributes {stable_mosaic.version = 11 : i64} {
  func.func @_dec_stage_kernel(%arg0: i32, %arg1: memref<256x32xbf16, #tpu.memory_space<vmem>>, %arg2: memref<8x16x16xbf16, #tpu.memory_space<vmem>>, %arg3: memref<32x16xbf16, #tpu.memory_space<vmem>>, %arg4: memref<1x16xf32, #tpu.memory_space<vmem>>, %arg5: memref<16x3xbf16, #tpu.memory_space<vmem>>, %arg6: memref<1x3xf32, #tpu.memory_space<vmem>>, %arg7: memref<256x3xbf16, #tpu.memory_space<vmem>>) attributes {dimension_semantics = [#tpu.dimension_semantics<parallel>], iteration_bounds = array<i64: 2>, scalar_prefetch = 0 : i64, scratch_operands = 0 : i64, tpu.core_type = #tpu.core_type<tc>, window_params = [{transform_indices = @transform_0, window_bounds = array<i64: 256, 32>}, {transform_indices = @transform_1, window_bounds = array<i64: 8, 16, 16>}, {pipeline_mode = #tpu.pipeline_mode<synchronous>, transform_indices = @transform_2, window_bounds = array<i64: 32, 16>}, {pipeline_mode = #tpu.pipeline_mode<synchronous>, transform_indices = @transform_3, window_bounds = array<i64: 1, 16>}, {pipeline_mode = #tpu.pipeline_mode<synchronous>, transform_indices = @transform_4, window_bounds = array<i64: 16, 3>}, {pipeline_mode = #tpu.pipeline_mode<synchronous>, transform_indices = @transform_5, window_bounds = array<i64: 1, 3>}, {transform_indices = @transform_6, window_bounds = array<i64: 256, 3>}]} {
    %c0 = arith.constant 0 : index
    %c0_0 = arith.constant 0 : index
    %0 = vector.load %arg1[%c0, %c0_0] : memref<256x32xbf16, #tpu.memory_space<vmem>>, vector<256x32xbf16>
    %c0_1 = arith.constant 0 : index
    %c0_2 = arith.constant 0 : index
    %1 = vector.load %arg3[%c0_1, %c0_2] : memref<32x16xbf16, #tpu.memory_space<vmem>>, vector<32x16xbf16>
    %cst = arith.constant dense<0.000000e+00> : vector<256x16xf32>
    %2 = tpu.matmul %0, %1, %cst {dimension_numbers = #tpu.dot_dimension_numbers<[1], [0], [0], [1], [0, 0, 1, 1], [], []>} : vector<256x32xbf16>, vector<32x16xbf16>, vector<256x16xf32> -> vector<256x16xf32>
    %c0_3 = arith.constant 0 : index
    %c0_4 = arith.constant 0 : index
    %c0_5 = arith.constant 0 : index
    %3 = vector.load %arg2[%c0_3, %c0_4, %c0_5] : memref<8x16x16xbf16, #tpu.memory_space<vmem>>, vector<8x16x16xbf16>
    %4 = arith.extf %3 : vector<8x16x16xbf16> to vector<8x16x16xf32>
    %5 = vector.shape_cast %4 : vector<8x16x16xf32> to vector<8x1x16x16xf32>
    %6 = vector.shape_cast %5 : vector<8x1x16x16xf32> to vector<8x1x16x16xf32>
    %7 = vector.broadcast %6 : vector<8x1x16x16xf32> to vector<8x2x16x16xf32>
    %8 = vector.shape_cast %7 : vector<8x2x16x16xf32> to vector<256x16xf32>
    %9 = arith.addf %2, %8 : vector<256x16xf32>
    %c0_6 = arith.constant 0 : index
    %c0_7 = arith.constant 0 : index
    %10 = vector.load %arg4[%c0_6, %c0_7] : memref<1x16xf32, #tpu.memory_space<vmem>>, vector<1x16xf32>
    %11 = vector.broadcast %10 : vector<1x16xf32> to vector<256x16xf32>
    %12 = arith.addf %9, %11 : vector<256x16xf32>
    %13 = arith.mulf %12, %12 : vector<256x16xf32>
    %14 = arith.mulf %12, %13 : vector<256x16xf32>
    %cst_8 = arith.constant 4.471500e-02 : f32
    %15 = vector.broadcast %cst_8 : f32 to vector<256x16xf32>
    %16 = arith.mulf %15, %14 : vector<256x16xf32>
    %17 = arith.addf %12, %16 : vector<256x16xf32>
    %cst_9 = arith.constant 0.797884583 : f32
    %18 = vector.broadcast %cst_9 : f32 to vector<256x16xf32>
    %19 = arith.mulf %18, %17 : vector<256x16xf32>
    %20 = math.tanh %19 : vector<256x16xf32>
    %cst_10 = arith.constant 1.000000e+00 : f32
    %21 = vector.broadcast %cst_10 : f32 to vector<256x16xf32>
    %22 = arith.addf %21, %20 : vector<256x16xf32>
    %cst_11 = arith.constant 5.000000e-01 : f32
    %23 = vector.broadcast %cst_11 : f32 to vector<256x16xf32>
    %24 = arith.mulf %23, %22 : vector<256x16xf32>
    %25 = arith.mulf %12, %24 : vector<256x16xf32>
    %26 = arith.truncf %25 : vector<256x16xf32> to vector<256x16xbf16>
    %c0_12 = arith.constant 0 : index
    %c0_13 = arith.constant 0 : index
    %27 = vector.load %arg5[%c0_12, %c0_13] : memref<16x3xbf16, #tpu.memory_space<vmem>>, vector<16x3xbf16>
    %cst_14 = arith.constant dense<0.000000e+00> : vector<256x3xf32>
    %28 = tpu.matmul %26, %27, %cst_14 {dimension_numbers = #tpu.dot_dimension_numbers<[1], [0], [0], [1], [0, 0, 1, 1], [], []>} : vector<256x16xbf16>, vector<16x3xbf16>, vector<256x3xf32> -> vector<256x3xf32>
    %c0_15 = arith.constant 0 : index
    %c0_16 = arith.constant 0 : index
    %29 = vector.load %arg6[%c0_15, %c0_16] : memref<1x3xf32, #tpu.memory_space<vmem>>, vector<1x3xf32>
    %30 = vector.broadcast %29 : vector<1x3xf32> to vector<256x3xf32>
    %31 = arith.addf %28, %30 : vector<256x3xf32>
    %32 = arith.truncf %31 : vector<256x3xf32> to vector<256x3xbf16>
    %c0_17 = arith.constant 0 : index
    %c0_18 = arith.constant 0 : index
    %33 = vector.load %arg7[%c0_17, %c0_18] : memref<256x3xbf16, #tpu.memory_space<vmem>>, vector<256x3xbf16>
    tpu.vector_store %arg7[%c0_17, %c0_18], %32 {strides = array<i32>} : memref<256x3xbf16, #tpu.memory_space<vmem>>, vector<256x3xbf16>,
    return
  }
  func.func @transform_0(%arg0: i32) -> (i32, i32) {
    %c0_i32 = arith.constant 0 : i32
    %c0_i32_0 = arith.constant 0 : i32
    return %arg0, %c0_i32 : i32, i32
  }
  func.func @transform_1(%arg0: i32) -> (i32, i32, i32) {
    %c0_i32 = arith.constant 0 : i32
    %c0_i32_0 = arith.constant 0 : i32
    %c0_i32_1 = arith.constant 0 : i32
    return %arg0, %c0_i32, %c0_i32_0 : i32, i32, i32
  }
  func.func @transform_2(%arg0: i32) -> (i32, i32) {
    %c0_i32 = arith.constant 0 : i32
    %c0_i32_0 = arith.constant 0 : i32
    %c0_i32_1 = arith.constant 0 : i32
    return %c0_i32, %c0_i32_0 : i32, i32
  }
  func.func @transform_3(%arg0: i32) -> (i32, i32) {
    %c0_i32 = arith.constant 0 : i32
    %c0_i32_0 = arith.constant 0 : i32
    %c0_i32_1 = arith.constant 0 : i32
    return %c0_i32, %c0_i32_0 : i32, i32
  }
  func.func @transform_4(%arg0: i32) -> (i32, i32) {
    %c0_i32 = arith.constant 0 : i32
    %c0_i32_0 = arith.constant 0 : i32
    %c0_i32_1 = arith.constant 0 : i32
    return %c0_i32, %c0_i32_0 : i32, i32
  }
  func.func @transform_5(%arg0: i32) -> (i32, i32) {
    %c0_i32 = arith.constant 0 : i32
    %c0_i32_0 = arith.constant 0 : i32
    %c0_i32_1 = arith.constant 0 : i32
    return %c0_i32, %c0_i32_0 : i32, i32
  }
  func.func @transform_6(%arg0: i32) -> (i32, i32) {
    %c0_i32 = arith.constant 0 : i32
    %c0_i32_0 = arith.constant 0 : i32
    return %arg0, %c0_i32 : i32, i32
  }
}

</mosaic_0001>

<bundles_post_ra>
// kernel: upocr_forward.9
= control target key start
LH: loop header
LB: loop body
LE: loop exit
PB: predicated region body
PF: predicated region fallthrough
CT: control target
= control target key end

     0   :  { %s709_s12 = smov 0   ;;  %s846_s0 = inlined_call_operand.vmem [shape: bf16[16,2,8,64], index: 0, kind: input, shape index: {}]   ;;  %s847_s1 = inlined_call_operand.vmem [shape: bf16[2,64,64], index: 1, kind: input, shape index: {}]   ;;  %s848_s2 = inlined_call_operand.vmem [shape: f32[1,64], index: 2, kind: input, shape index: {}]   ;;  %s849_s3 = inlined_call_operand.vmem [shape: bf16[128,64], index: 3, kind: output, shape index: {}]  }
   0x1 LB: > { %s539_s13 = sadd.s32 4294967295, %s687_s12   ;;  %p543_p0 = scmp.ge.s32.totalorder %s687_s12, 1  ;;  %s687_s12 = sphi %s709_s12, %s13_s12  }
   0x2   : > { %p139_p1 = scmp.lt.s32.totalorder %s687_s12, 3 }
   0x4   : > { %p140_p2 = pnand %p543_p0, %p139_p1 }
   0x5   : > { %s544_s18 = sshll.u32 (!%p140_p2), %s539_s13, 3 }
   0x6   : > { %143 = sbr.rel (%p140_p2) target bundleno = 214 (0xd6), region = 32  ;;  %p165_p3 = scmp.lt.s32.totalorder (!%p140_p2), %s544_s18, 15 }
   0xb   : > { %v647_v0 = vld [vmem:[%s847_s1 + $0x38] sm:$0xff]  ;;  %v646_v2 = vld [vmem:[%s847_s1 + $0x30] sm:$0xff]  ;;  %s851_s18 = smov (!%p165_p3, %s544_s18), 15  ;;  %v645_v4 = vld [vmem:[%s847_s1 + $0x28] sm:$0xff]  ;;  %vm255_vm0 = vcmask 523264   ;;  %vm474_vm1 = vcmask 519168  }
   0xc   : > { %v643_v1 = vld [vmem:[%s847_s1 + $0x18] sm:$0xff]  ;;  %272 = vmatpush.bf16.msra.mxu0 %v647_v0  ;;  %648 = vmatpush.bf16.msra.mxu2 %v647_v0  ;;  %v642_v3 = vld [vmem:[%s847_s1 + $0x10] sm:$0xff]  ;;  %s631_s23 = sshll.u32 %s851_s18, 3  ;;  %v641_v5 = vld [vmem:[%s847_s1 + $0x8] sm:$0xff]  ;;  %s548_s10 = sshll.u32 %s851_s18, 2 }
   0xd   : > { %357 = vmatpush.bf16.msra.mxu1 %v643_v1  ;;  %652 = vmatpush.bf16.msra.mxu3 %v643_v1  ;;  %s738_s28 = scalar_lea.vmem %s846_s0, %s631_s23  ;;  %v644_v6 = vld [vmem:[%s847_s1 + $0x20] sm:$0xff]  ;;  %s813_s14 = scalar_lea.vmem %s849_s3, %s548_s10 }
   0xe   : > { %v640_v7 = vld [vmem:[%s847_s1] sm:$0xff]  ;;  %v633_v9 = vld [vmem:[%s738_s28 + $0x8] sm:$0xf0]  ;;  %v632_v13 = vld [vmem:[%s738_s28 + $0x4] sm:$0xf0] }
   0xf   : > { %v559_v8 = vld [vmem:[%s738_s28 + $0x4] sm:$0xf]  ;;  %v637_v11 = vld [vmem:[%s738_s28 + $0x28] sm:$0xf0]  ;;  %v595_v12 = vld [vmem:[%s738_s28] sm:$0xf] }
  0x10   : > { %273 = vmatpush.bf16.msra.mxu0 %v646_v2  ;;  %649 = vmatpush.bf16.msra.mxu2 %v646_v2  ;;  %v567_v10 = vld [vmem:[%s738_s28 + $0x24] sm:$0xf]  ;;  %v603_v14 = vld [vmem:[%s738_s28 + $0x20] sm:$0xf]  ;;  %v636_v15 = vld [vmem:[%s738_s28 + $0x24] sm:$0xf0]  ;;  %v560_v16 = vor.u32 %v633_v9, %v559_v8  ;;  %v596_v18 = vor.u32 %v632_v13, %v595_v12 }
  0x11   : > { %358 = vmatpush.bf16.msra.mxu1 %v642_v3  ;;  %653 = vmatpush.bf16.msra.mxu3 %v642_v3  ;;  %v568_v17 = vor.u32 %v637_v11, %v567_v10  ;;  %v604_v19 = vor.u32 %v636_v15, %v603_v14  ;;  %v563_v20 = vld [vmem:[%s738_s28 + $0x14] sm:$0xf]  ;;  %v635_v21 = vld [vmem:[%s738_s28 + $0x18] sm:$0xf0]  ;;  %v599_v24 = vld [vmem:[%s738_s28 + $0x10] sm:$0xf] }
  0x12   : > { %v571_v22 = vld [vmem:[%s738_s28 + $0x34] sm:$0xf]  ;;  %v639_v23 = vld [vmem:[%s738_s28 + $0x38] sm:$0xf0]  ;;  %v634_v25 = vld [vmem:[%s738_s28 + $0x14] sm:$0xf0]  ;;  %v564_v28 = vor.u32 %v635_v21, %v563_v20 }
  0x13   : > { %v607_v26 = vld [vmem:[%s738_s28 + $0x30] sm:$0xf]  ;;  %v638_v27 = vld [vmem:[%s738_s28 + $0x34] sm:$0xf0]  ;;  %v572_v29 = vor.u32 %v639_v23, %v571_v22  ;;  %v600_v30 = vor.u32 %v634_v25, %v599_v24  ;;  %v776_v33 = vld [vmem:[%s848_s2] ss:$0 sm:$0xff] }
  0x14   : > { %274 = vmatpush.bf16.msra.mxu0 %v645_v4  ;;  %650 = vmatpush.bf16.msra.mxu2 %v645_v4  ;;  %v608_v31 = vor.u32 %v638_v27, %v607_v26 }
  0x15   : > { %359 = vmatpush.bf16.msra.mxu1 %v641_v5  ;;  %654 = vmatpush.bf16.msra.mxu3 %v641_v5 }
  0x18   : > { %275 = vmatpush.bf16.msra.mxu0 %v644_v6  ;;  %651 = vmatpush.bf16.msra.mxu2 %v644_v6 }
  0x19   : > { %360 = vmatpush.bf16.msra.mxu1 %v640_v7  ;;  %655 = vmatpush.bf16.msra.mxu3 %v640_v7 }
  0x1b   : > { %589 = vmatmul.msk.bf16.vlgmr.msra.gmra.mxu0 %vm255_vm0, %v560_v16  ;;  %591 = vmatmul.msk.bf16.vlgmr.msra.gmra.mxu2 %vm255_vm0, %v568_v17 }
  0x1c   : > { %625 = vmatmul.msk.bf16.vlgmr.msra.gmra.mxu1 %vm255_vm0, %v596_v18  ;;  %627 = vmatmul.msk.bf16.vlgmr.msra.gmra.mxu3 %vm255_vm0, %v604_v19 }
  0x2b   : > { %590 = vmatmul.msk.bf16.gmra.mxu0 %vm255_vm0, %v564_v28  ;;  %592 = vmatmul.msk.bf16.gmra.mxu2 %vm255_vm0, %v572_v29 }
  0x2c   : > { %626 = vmatmul.msk.bf16.gmra.mxu1 %vm255_vm0, %v600_v30  ;;  %628 = vmatmul.msk.bf16.gmra.mxu3 %vm255_vm0, %v608_v31 }
  0x98   : > { %v277_v32 = vpop.f32.mrf.mxu0 }
  0x99   : > { %v362_v34 = vpop.f32.mrf.mxu1 }
  0x9a   : > { %v363_v35 = vadd.f32 %v362_v34, %v277_v32 }
  0x9c   : > { %v386_v36 = vadd.f32 %v776_v33, %v363_v35 }
  0x9e   : > { %v394_v37 = vmul.f32 %v386_v36, %v386_v36  ;;  %v287_v38 = vpop.f32.mrf.mxu2 }
  0x9f   : > { %v372_v39 = vpop.f32.mrf.mxu3 }
  0xa0   : > { %v402_v40 = vmul.f32 %v394_v37, %v386_v36  ;;  %v373_v41 = vadd.f32 %v372_v39, %v287_v38  ;;  %v279_v42 = vpop.f32.mrf.mxu0 }
  0xa1   : > { %v364_v43 = vpop.f32.mrf.mxu1 }
  0xa2   : > { %v410_v44 = vmul.f32 0.044715, %v402_v40  ;;  %v780_v45 = vadd.f32 %v776_v33, %v373_v41  ;;  %v365_v46 = vadd.f32 %v364_v43, %v279_v42 }
  0xa4   : > { %v418_v47 = vadd.f32 %v410_v44, %v386_v36  ;;  %v398_v48 = vmul.f32 %v780_v45, %v780_v45  ;;  %v785_v49 = vadd.f32 %v776_v33, %v365_v46 }
  0xa6   : > { %v426_v50 = vmul.f32 0.7978846, %v418_v47  ;;  %v406_v51 = vmul.f32 %v398_v48, %v780_v45  ;;  %v395_v52 = vmul.f32 %v785_v49, %v785_v49  ;;  %v289_v53 = vpop.f32.mrf.mxu2 }
  0xa7   : > { %v374_v54 = vpop.f32.mrf.mxu3 }
  0xa8   : > { %665 = vtanh.f32 %v426_v50  ;;  %v414_v55 = vmul.f32 0.044715, %v406_v51  ;;  %v403_v56 = vmul.f32 %v395_v52, %v785_v49  ;;  %v375_v57 = vadd.f32 %v374_v54, %v289_v53  ;;  %v282_v58 = vpop.f32.mrf.mxu0 }
  0xa9   : > { %v367_v59 = vpop.f32.mrf.mxu1 }
  0xaa   : > { %v422_v60 = vadd.f32 %v414_v55, %v780_v45  ;;  %v411_v61 = vmul.f32 0.044715, %v403_v56  ;;  %v793_v62 = vadd.f32 %v776_v33, %v375_v57  ;;  %v368_v63 = vadd.f32 %v367_v59, %v282_v58 }
  0xac   : > { %v430_v0 = vmul.f32 0.7978846, %v422_v60  ;;  %v419_v1 = vadd.f32 %v411_v61, %v785_v49  ;;  %v399_v2 = vmul.f32 %v793_v62, %v793_v62  ;;  %v799_v3 = vadd.f32 %v776_v33, %v368_v63 }
  0xae   : > { %v666_v4 = vpop.eup %665  ;;  %667 = vtanh.f32 %v430_v0  ;;  %v427_v5 = vmul.f32 0.7978846, %v419_v1  ;;  %v407_v6 = vmul.f32 %v399_v2, %v793_v62  ;;  %v396_v7 = vmul.f32 %v799_v3, %v799_v3  ;;  %v292_v8 = vpop.f32.mrf.mxu2 }
  0xaf   : > { %v442_v9 = vadd.f32 1.0, %v666_v4  ;;  %v377_v10 = vpop.f32.mrf.mxu3 }
  0xb0   : > { %669 = vtanh.f32 %v427_v5  ;;  %v415_v11 = vmul.f32 0.044715, %v407_v6  ;;  %v404_v12 = vmul.f32 %v396_v7, %v799_v3  ;;  %v378_v13 = vadd.f32 %v377_v10, %v292_v8  ;;  %v284_v14 = vpop.f32.mrf.mxu0 }
  0xb1   : > { %v450_v15 = vmul.f32 0.5, %v442_v9  ;;  %v369_v16 = vpop.f32.mrf.mxu1 }
  0xb2   : > { %v423_v17 = vadd.f32 %v415_v11, %v793_v62  ;;  %v412_v18 = vmul.f32 0.044715, %v404_v12  ;;  %v808_v19 = vadd.f32 %v776_v33, %v378_v13  ;;  %v370_v20 = vadd.f32 %v369_v16, %v284_v14 }
  0xb3   : > { %v458_v21 = vmul.f32 %v450_v15, %v386_v36 }
  0xb4   : > { %v668_v22 = vpop.eup %667  ;;  %v431_v23 = vmul.f32 0.7978846, %v423_v17  ;;  %v420_v24 = vadd.f32 %v412_v18, %v799_v3  ;;  %v400_v25 = vmul.f32 %v808_v19, %v808_v19  ;;  %v389_v26 = vadd.f32 %v776_v33, %v370_v20 }
  0xb5   : > { %v466_v27 = vpack.c.bf16 %v458_v21, %v458_v21  ;;  %v446_v28 = vadd.f32 1.0, %v668_v22 }
  0xb6   : > { %v670_v29 = vpop.eup %669  ;;  %671 = vtanh.f32 %v431_v23  ;;  %v428_v30 = vmul.f32 0.7978846, %v420_v24  ;;  %v408_v31 = vmul.f32 %v400_v25, %v808_v19  ;;  %v397_v32 = vmul.f32 %v389_v26, %v389_v26  ;;  %v294_v34 = vpop.f32.mrf.mxu2 }
  0xb7   : > { %475 = vst.msk [vmem:[%s813_s14] sm:$0xf] %vm474_vm1, %v466_v27  ;;  %v454_v35 = vmul.f32 0.5, %v446_v28  ;;  %v443_v36 = vadd.f32 1.0, %v670_v29  ;;  %v379_v37 = vpop.f32.mrf.mxu3 }
  0xb8   : > { %673 = vtanh.f32 %v428_v30  ;;  %v416_v38 = vmul.f32 0.044715, %v408_v31  ;;  %v405_v39 = vmul.f32 %v397_v32, %v389_v26  ;;  %v380_v40 = vadd.f32 %v379_v37, %v294_v34 }
  0xb9   : > { %v462_v41 = vmul.f32 %v454_v35, %v780_v45  ;;  %v451_v42 = vmul.f32 0.5, %v443_v36 }
  0xba   : > { %v424_v43 = vadd.f32 %v416_v38, %v808_v19  ;;  %v413_v44 = vmul.f32 0.044715, %v405_v39  ;;  %v393_v46 = vadd.f32 %v776_v33, %v380_v40 }
  0xbb   : > { %v470_v47 = vpack.c.bf16 %v462_v41, %v462_v41  ;;  %v459_v48 = vmul.f32 %v451_v42, %v785_v49 }
  0xbc   : > { %v672_v50 = vpop.eup %671  ;;  %v432_v51 = vmul.f32 0.7978846, %v424_v43  ;;  %v421_v52 = vadd.f32 %v413_v44, %v389_v26  ;;  %v401_v53 = vmul.f32 %v393_v46, %v393_v46 }
  0xbd   : > { %479 = vst.msk [vmem:[%s813_s14 + $0x10] sm:$0xf] %vm474_vm1, %v470_v47  ;;  %v467_v54 = vpack.c.bf16 %v459_v48, %v459_v48  ;;  %v447_v55 = vadd.f32 1.0, %v672_v50 }
  0xbe   : > { %v674_v56 = vpop.eup %673  ;;  %675 = vtanh.f32 %v432_v51  ;;  %v429_v45 = vmul.f32 0.7978846, %v421_v52  ;;  %v409_v57 = vmul.f32 %v401_v53, %v393_v46 }
  0xbf   : > { %476 = vst.msk [vmem:[%s813_s14 + $0x4] sm:$0xf] %vm474_vm1, %v467_v54  ;;  %v455_v58 = vmul.f32 0.5, %v447_v55  ;;  %v444_v33 = vadd.f32 1.0, %v674_v56 }
  0xc0   : > { %677 = vtanh.f32 %v429_v45  ;;  %v417_v49 = vmul.f32 0.044715, %v409_v57 }
  0xc1   : > { %v463_v59 = vmul.f32 %v455_v58, %v793_v62  ;;  %v452_v60 = vmul.f32 0.5, %v444_v33 }
  0xc2   : > { %v425_v61 = vadd.f32 %v417_v49, %v393_v46 }
  0xc3   : > { %v471_v63 = vpack.c.bf16 %v463_v59, %v463_v59  ;;  %v460_v0 = vmul.f32 %v452_v60, %v799_v3 }
  0xc4   : > { %v676_v1 = vpop.eup %675  ;;  %v433_v2 = vmul.f32 0.7978846, %v425_v61 }
  0xc5   : > { %480 = vst.msk [vmem:[%s813_s14 + $0x14] sm:$0xf] %vm474_vm1, %v471_v63  ;;  %v468_v4 = vpack.c.bf16 %v460_v0, %v460_v0  ;;  %v448_v5 = vadd.f32 1.0, %v676_v1 }
  0xc6   : > { %v678_v6 = vpop.eup %677  ;;  %679 = vtanh.f32 %v433_v2 }
  0xc7   : > { %477 = vst.msk [vmem:[%s813_s14 + $0x8] sm:$0xf] %vm474_vm1, %v468_v4  ;;  %v456_v7 = vmul.f32 0.5, %v448_v5  ;;  %v445_v62 = vadd.f32 1.0, %v678_v6 }
  0xc9   : > { %v464_v8 = vmul.f32 %v456_v7, %v808_v19  ;;  %v453_v9 = vmul.f32 0.5, %v445_v62 }
  0xcb   : > { %v472_v10 = vpack.c.bf16 %v464_v8, %v464_v8  ;;  %v461_v3 = vmul.f32 %v453_v9, %v389_v26 }
  0xcc   : > { %v680_v11 = vpop.eup %679 }
  0xcd   : > { %481 = vst.msk [vmem:[%s813_s14 + $0x18] sm:$0xf] %vm474_vm1, %v472_v10  ;;  %v469_v12 = vpack.c.bf16 %v461_v3, %v461_v3  ;;  %v449_v13 = vadd.f32 1.0, %v680_v11 }
  0xcf   : > { %478 = vst.msk [vmem:[%s813_s14 + $0xc] sm:$0xf] %vm474_vm1, %v469_v12  ;;  %v457_v14 = vmul.f32 0.5, %v449_v13 }
  0xd1   : > { %v465_v15 = vmul.f32 %v457_v14, %v393_v46 }
  0xd3   : > { %v473_v16 = vpack.c.bf16 %v465_v15, %v465_v15 }
  0xd5   : > { %482 = vst.msk [vmem:[%s813_s14 + $0x1c] sm:$0xf] %vm474_vm1, %v473_v16 }
  0xd6 PF: > { %s13_s12 = sadd.s32 1, %s687_s12  }
  0xd7   : > { %p10_p4 = scmp.ge.s32.totalorder %s13_s12, 4  }
  0xd9   :  { %12 = sbr.rel (!%p10_p4) target bundleno = 1 (0x1), region = 63 }

// kernel: upocr_forward.8
= control target key start
LH: loop header
LB: loop body
LE: loop exit
PB: predicated region body
PF: predicated region fallthrough
CT: control target
= control target key end

     0   :  { %s2253_s12 = smov 0   ;;  %s2624_s0 = inlined_call_operand.vmem [shape: bf16[32,4,16,12], index: 0, kind: input, shape index: {}]   ;;  %s2625_s1 = inlined_call_operand.vmem [shape: bf16[4,12,32], index: 1, kind: input, shape index: {}]   ;;  %s2626_s2 = inlined_call_operand.vmem [shape: f32[1,32], index: 2, kind: input, shape index: {}]   ;;  %s2627_s3 = inlined_call_operand.vmem [shape: bf16[512,32], index: 3, kind: output, shape index: {}]  }
   0x1 LB: > { %s1728_s13 = sadd.s32 4294967295, %s2231_s12   ;;  %p1732_p0 = scmp.ge.s32.totalorder %s2231_s12, 1  ;;  %s2231_s12 = sphi %s2253_s12, %s13_s12  }
   0x2   : > { %p139_p1 = scmp.lt.s32.totalorder %s2231_s12, 3 }
   0x4   : > { %p140_p2 = pnand %p1732_p0, %p139_p1 }
   0x5   : > { %s1733_s18 = sshll.u32 (!%p140_p2), %s1728_s13, 4  ;;  %s1736_s10 = sshll.u32 (!%p140_p2), %s1728_s13, 5 }
   0x6   : > { %143 = sbr.rel (%p140_p2) target bundleno = 432 (0x1b0), region = 32  ;;  %p165_p3 = scmp.lt.s32.totalorder (!%p140_p2), %s1733_s18, 31 }
   0x7   : > { %p172_p4 = scmp.lt.s32.totalorder (!%p140_p2), %s1736_s10, 63 }
   0xb   : > { %v1806_v0 = vld [vmem:[%s2625_s1 + $0x8] sm:$0xf]  ;;  %v2148_v1 = vld [vmem:[%s2625_s1 + $0x8] sm:$0x30]  ;;  %vm445_vm0 = vcmask 1045504   ;;  %s2629_s18 = smov (!%p165_p3, %s1733_s18), 31 }
   0xc   : > { %v1807_v2 = vor.u32 %v2148_v1, %v1806_v0  ;;  %v1890_v3 = vld [vmem:[%s2625_s1] sm:$0xf]  ;;  %v2147_v4 = vld [vmem:[%s2625_s1] sm:$0x30]  ;;  %v1976_v5 = vld [vmem:[%s2625_s1 + $0x10] sm:$0xf] }
   0xd   : > { %v1891_v6 = vor.u32 %v2147_v4, %v1890_v3  ;;  %v2149_v7 = vld [vmem:[%s2625_s1 + $0x10] sm:$0x30]  ;;  %v2062_v8 = vld [vmem:[%s2625_s1 + $0x18] sm:$0xf]  ;;  %v2150_v9 = vld [vmem:[%s2625_s1 + $0x18] sm:$0x30] }
   0xe   : > { %v447_v10 = vsel %vm445_vm0, %v1807_v2, 0  ;;  %v1977_v11 = vor.u32 %v2149_v7, %v1976_v5  ;;  %v2063_v12 = vor.u32 %v2150_v9, %v2062_v8  ;;  %s2082_s4 = sshll.u32 %s2629_s18, 5  ;;  %vm396_vm1 = vcmask 97280   ;;  %v2371_v58 = vld [vmem:[%s2626_s2] ss:$0 sm:$0xff]  ;;  %s2631_s10 = smov (!%p172_p4, %s1736_s10), 63 }
   0xf   : > { %456 = vmatpush.bf16.msra.mxu0 %v447_v10  ;;  %v672_v13 = vsel %vm445_vm0, %v1891_v6, 0  ;;  %s2294_s7 = scalar_lea.vmem %s2624_s0, %s2082_s4  ;;  %s1737_s11 = sshll.u32 %s2631_s10, 2  ;;  %vm1639_vm2 = vcmask 257024  }
  0x10   : > { %681 = vmatpush.bf16.msra.mxu1 %v672_v13  ;;  %v900_v14 = vsel %vm445_vm0, %v1977_v11, 0  ;;  %v1160_v15 = vsel %vm445_vm0, %v2063_v12, 0  ;;  %v2084_v16 = vld [vmem:[%s2294_s7 + $0x8] sm:$0xff]  ;;  %v2083_v17 = vld [vmem:[%s2294_s7] sm:$0xff]  ;;  %v2085_v18 = vld [vmem:[%s2294_s7 + $0x10] sm:$0xff]  ;;  %s2406_s15 = scalar_lea.vmem %s2627_s3, %s1737_s11 }
  0x11   : > { %909 = vmatpush.bf16.msra.mxu2 %v900_v14  ;;  %1169 = vmatpush.bf16.msra.mxu3 %v1160_v15  ;;  %v2086_v19 = vld [vmem:[%s2294_s7 + $0x18] sm:$0xff]  ;;  %v2088_v20 = vld [vmem:[%s2294_s7 + $0x28] sm:$0xff]  ;;  %v2087_v21 = vld [vmem:[%s2294_s7 + $0x20] sm:$0xff] }
  0x12   : > { %1808 = vmatmul.msk.bf16.vlgmr.msra.gmra.mxu0 %vm396_vm1, %v2084_v16  ;;  %v2089_v22 = vld [vmem:[%s2294_s7 + $0x30] sm:$0xff]  ;;  %v2090_v23 = vld [vmem:[%s2294_s7 + $0x38] sm:$0xff]  ;;  %v2092_v24 = vld [vmem:[%s2294_s7 + $0x48] sm:$0xff] }
  0x13   : > { %1892 = vmatmul.msk.bf16.vlgmr.msra.gmra.mxu1 %vm396_vm1, %v2083_v17  ;;  %v2091_v25 = vld [vmem:[%s2294_s7 + $0x40] sm:$0xff]  ;;  %v2093_v26 = vld [vmem:[%s2294_s7 + $0x50] sm:$0xff]  ;;  %v2094_v27 = vld [vmem:[%s2294_s7 + $0x58] sm:$0xff] }
  0x14   : > { %1978 = vmatmul.msk.bf16.vlgmr.msra.gmra.mxu2 %vm396_vm1, %v2085_v18  ;;  %2064 = vmatmul.msk.bf16.vlgmr.msra.gmra.mxu3 %vm396_vm1, %v2086_v19  ;;  %v2096_v28 = vld [vmem:[%s2294_s7 + $0x68] sm:$0xff]  ;;  %v2095_v29 = vld [vmem:[%s2294_s7 + $0x60] sm:$0xff]  ;;  %v2097_v30 = vld [vmem:[%s2294_s7 + $0x70] sm:$0xff] }
  0x15   : > { %v2098_v31 = vld [vmem:[%s2294_s7 + $0x78] sm:$0xff]  ;;  %v2100_v32 = vld [vmem:[%s2294_s7 + $0x88] sm:$0xff]  ;;  %v2099_v33 = vld [vmem:[%s2294_s7 + $0x80] sm:$0xff] }
  0x16   : > { %v2101_v34 = vld [vmem:[%s2294_s7 + $0x90] sm:$0xff]  ;;  %v2102_v35 = vld [vmem:[%s2294_s7 + $0x98] sm:$0xff]  ;;  %v2104_v36 = vld [vmem:[%s2294_s7 + $0xa8] sm:$0xff] }
  0x17   : > { %v2103_v37 = vld [vmem:[%s2294_s7 + $0xa0] sm:$0xff]  ;;  %v2105_v38 = vld [vmem:[%s2294_s7 + $0xb0] sm:$0xff]  ;;  %v2106_v39 = vld [vmem:[%s2294_s7 + $0xb8] sm:$0xff] }
  0x18   : > { %v2108_v40 = vld [vmem:[%s2294_s7 + $0xc8] sm:$0xff]  ;;  %v2107_v41 = vld [vmem:[%s2294_s7 + $0xc0] sm:$0xff]  ;;  %v2109_v42 = vld [vmem:[%s2294_s7 + $0xd0] sm:$0xff] }
  0x19   : > { %v2110_v43 = vld [vmem:[%s2294_s7 + $0xd8] sm:$0xff]  ;;  %v2112_v44 = vld [vmem:[%s2294_s7 + $0xe8] sm:$0xff]  ;;  %v2111_v45 = vld [vmem:[%s2294_s7 + $0xe0] sm:$0xff] }
  0x1a   : > { %v2113_v46 = vld [vmem:[%s2294_s7 + $0xf0] sm:$0xff]  ;;  %v2114_v47 = vld [vmem:[%s2294_s7 + $0xf8] sm:$0xff]  ;;  %v2116_v48 = vld [vmem:[%s2294_s7 + $0x108] sm:$0xff] }
  0x1b   : > { %v2115_v49 = vld [vmem:[%s2294_s7 + $0x100] sm:$0xff]  ;;  %v2117_v52 = vld [vmem:[%s2294_s7 + $0x110] sm:$0xff]  ;;  %v2118_v53 = vld [vmem:[%s2294_s7 + $0x118] sm:$0xff] }
  0x1c   : > { %v2120_v3 = vld [vmem:[%s2294_s7 + $0x128] sm:$0xff]  ;;  %v2119_v4 = vld [vmem:[%s2294_s7 + $0x120] sm:$0xff]  ;;  %v2121_v9 = vld [vmem:[%s2294_s7 + $0x130] sm:$0xff] }
  0x1d   : > { %v2122_v10 = vld [vmem:[%s2294_s7 + $0x138] sm:$0xff] }
  0x22   : > { %1809 = vmatmul.msk.bf16.gmra.mxu0 %vm396_vm1, %v2088_v20 }
  0x23   : > { %1893 = vmatmul.msk.bf16.gmra.mxu1 %vm396_vm1, %v2087_v21 }
  0x24   : > { %1979 = vmatmul.msk.bf16.gmra.mxu2 %vm396_vm1, %v2089_v22  ;;  %2065 = vmatmul.msk.bf16.gmra.mxu3 %vm396_vm1, %v2090_v23 }
  0x32   : > { %1810 = vmatmul.msk.bf16.gmra.mxu0 %vm396_vm1, %v2092_v24 }
  0x33   : > { %1894 = vmatmul.msk.bf16.gmra.mxu1 %vm396_vm1, %v2091_v25 }
  0x34   : > { %1980 = vmatmul.msk.bf16.gmra.mxu2 %vm396_vm1, %v2093_v26  ;;  %2066 = vmatmul.msk.bf16.gmra.mxu3 %vm396_vm1, %v2094_v27 }
  0x42   : > { %1811 = vmatmul.msk.bf16.gmra.mxu0 %vm396_vm1, %v2096_v28 }
  0x43   : > { %1895 = vmatmul.msk.bf16.gmra.mxu1 %vm396_vm1, %v2095_v29 }
  0x44   : > { %1981 = vmatmul.msk.bf16.gmra.mxu2 %vm396_vm1, %v2097_v30  ;;  %2067 = vmatmul.msk.bf16.gmra.mxu3 %vm396_vm1, %v2098_v31 }
  0x52   : > { %1812 = vmatmul.msk.bf16.gmra.mxu0 %vm396_vm1, %v2100_v32 }
  0x53   : > { %1896 = vmatmul.msk.bf16.gmra.mxu1 %vm396_vm1, %v2099_v33 }
  0x54   : > { %1982 = vmatmul.msk.bf16.gmra.mxu2 %vm396_vm1, %v2101_v34  ;;  %2068 = vmatmul.msk.bf16.gmra.mxu3 %vm396_vm1, %v2102_v35  ;;  %v2124_v35 = vld [vmem:[%s2294_s7 + $0x148] sm:$0xff] }
  0x62   : > { %1813 = vmatmul.msk.bf16.gmra.mxu0 %vm396_vm1, %v2104_v36  ;;  %v2123_v36 = vld [vmem:[%s2294_s7 + $0x140] sm:$0xff] }
  0x63   : > { %1897 = vmatmul.msk.bf16.gmra.mxu1 %vm396_vm1, %v2103_v37 }
  0x64   : > { %1983 = vmatmul.msk.bf16.gmra.mxu2 %vm396_vm1, %v2105_v38  ;;  %2069 = vmatmul.msk.bf16.gmra.mxu3 %vm396_vm1, %v2106_v39 }
  0x72   : > { %1814 = vmatmul.msk.bf16.gmra.mxu0 %vm396_vm1, %v2108_v40 }
  0x73   : > { %1898 = vmatmul.msk.bf16.gmra.mxu1 %vm396_vm1, %v2107_v41  ;;  %v2125_v41 = vld [vmem:[%s2294_s7 + $0x150] sm:$0xff] }
  0x74   : > { %1984 = vmatmul.msk.bf16.gmra.mxu2 %vm396_vm1, %v2109_v42  ;;  %2070 = vmatmul.msk.bf16.gmra.mxu3 %vm396_vm1, %v2110_v43  ;;  %v2126_v42 = vld [vmem:[%s2294_s7 + $0x158] sm:$0xff] }
  0x82   : > { %1815 = vmatmul.msk.bf16.gmra.mxu0 %vm396_vm1, %v2112_v44 }
  0x83   : > { %1899 = vmatmul.msk.bf16.gmra.mxu1 %vm396_vm1, %v2111_v45 }
  0x84   : > { %1985 = vmatmul.msk.bf16.gmra.mxu2 %vm396_vm1, %v2113_v46  ;;  %2071 = vmatmul.msk.bf16.gmra.mxu3 %vm396_vm1, %v2114_v47 }
  0x8f   : > { %v458_v50 = vpop.f32.mrf.mxu0 }
  0x90   : > { %v683_v51 = vpop.f32.mrf.mxu1 }
  0x91   : > { %v684_v54 = vadd.f32 %v683_v51, %v458_v50 }
  0x92   : > { %1816 = vmatmul.msk.bf16.gmra.mxu0 %vm396_vm1, %v2116_v48 }
  0x93   : > { %1900 = vmatmul.msk.bf16.gmra.mxu1 %vm396_vm1, %v2115_v49 }
  0x94   : > { %1986 = vmatmul.msk.bf16.gmra.mxu2 %vm396_vm1, %v2117_v52  ;;  %2072 = vmatmul.msk.bf16.gmra.mxu3 %vm396_vm1, %v2118_v53 }
  0x97   : > { %v911_v55 = vpop.f32.mrf.mxu2  ;;  %v1171_v56 = vpop.f32.mrf.mxu3 }
  0x98   : > { %v991_v57 = vadd.f32 %v911_v55, %v684_v54  ;;  %v460_v59 = vpop.f32.mrf.mxu0  ;;  %v685_v60 = vpop.f32.mrf.mxu1 }
  0x99   : > { %v686_v0 = vadd.f32 %v685_v60, %v460_v59 }
  0x9a   : > { %v1251_v61 = vadd.f32 %v1171_v56, %v991_v57 }
  0x9c   : > { %v1287_v62 = vadd.f32 %v2371_v58, %v1251_v61 }
  0x9e   : > { %v1319_v63 = vmul.f32 %v1287_v62, %v1287_v62 }
  0x9f   : > { %v913_v1 = vpop.f32.mrf.mxu2  ;;  %v1173_v2 = vpop.f32.mrf.mxu3 }
  0xa0   : > { %v1351_v5 = vmul.f32 %v1319_v63, %v1287_v62  ;;  %v992_v6 = vadd.f32 %v913_v1, %v686_v0  ;;  %v463_v7 = vpop.f32.mrf.mxu0  ;;  %v688_v8 = vpop.f32.mrf.mxu1 }
  0xa1   : > { %v689_v15 = vadd.f32 %v688_v8, %v463_v7 }
  0xa2   : > { %v1383_v11 = vmul.f32 0.044715, %v1351_v5  ;;  %v1252_v12 = vadd.f32 %v1173_v2, %v992_v6  ;;  %1817 = vmatmul.msk.bf16.gmra.mxu0 %vm396_vm1, %v2120_v3 }
  0xa3   : > { %1901 = vmatmul.msk.bf16.gmra.mxu1 %vm396_vm1, %v2119_v4 }
  0xa4   : > { %v1415_v13 = vadd.f32 %v1383_v11, %v1287_v62  ;;  %v2381_v14 = vadd.f32 %v2371_v58, %v1252_v12  ;;  %1987 = vmatmul.msk.bf16.gmra.mxu2 %vm396_vm1, %v2121_v9  ;;  %2073 = vmatmul.msk.bf16.gmra.mxu3 %vm396_vm1, %v2122_v10  ;;  %v2128_v12 = vld [vmem:[%s2294_s7 + $0x168] sm:$0xff] }
  0xa6   : > { %v1447_v16 = vmul.f32 0.7978846, %v1415_v13  ;;  %v1320_v17 = vmul.f32 %v2381_v14, %v2381_v14  ;;  %v2127_v13 = vld [vmem:[%s2294_s7 + $0x160] sm:$0xff] }
  0xa7   : > { %v916_v18 = vpop.f32.mrf.mxu2  ;;  %v1176_v19 = vpop.f32.mrf.mxu3 }
  0xa8   : > { %2160 = vtanh.f32 %v1447_v16  ;;  %v1352_v20 = vmul.f32 %v1320_v17, %v2381_v14  ;;  %v993_v21 = vadd.f32 %v916_v18, %v689_v15  ;;  %v465_v22 = vpop.f32.mrf.mxu0  ;;  %v690_v23 = vpop.f32.mrf.mxu1  ;;  %v2129_v18 = vld [vmem:[%s2294_s7 + $0x170] sm:$0xff] }
  0xa9   : > { %v691_v31 = vadd.f32 %v690_v23, %v465_v22 }
  0xaa   : > { %v1384_v24 = vmul.f32 0.044715, %v1352_v20  ;;  %v1253_v25 = vadd.f32 %v1176_v19, %v993_v21  ;;  %v2130_v19 = vld [vmem:[%s2294_s7 + $0x178] sm:$0xff] }
  0xac   : > { %v1416_v26 = vadd.f32 %v1384_v24, %v2381_v14  ;;  %v2392_v27 = vadd.f32 %v2371_v58, %v1253_v25 }
  0xae   : > { %v2161_v28 = vpop.eup %2160  ;;  %v1448_v29 = vmul.f32 0.7978846, %v1416_v26  ;;  %v1321_v30 = vmul.f32 %v2392_v27, %v2392_v27 }
  0xaf   : > { %v1511_v32 = vadd.f32 1.0, %v2161_v28  ;;  %v918_v33 = vpop.f32.mrf.mxu2  ;;  %v1178_v34 = vpop.f32.mrf.mxu3 }
  0xb0   : > { %2162 = vtanh.f32 %v1448_v29  ;;  %v1353_v37 = vmul.f32 %v1321_v30, %v2392_v27  ;;  %v994_v38 = vadd.f32 %v918_v33, %v691_v31  ;;  %v468_v39 = vpop.f32.mrf.mxu0  ;;  %v693_v40 = vpop.f32.mrf.mxu1 }
  0xb1   : > { %v1543_v43 = vmul.f32 0.5, %v1511_v32  ;;  %v694_v49 = vadd.f32 %v693_v40, %v468_v39 }
  0xb2   : > { %v1385_v44 = vmul.f32 0.044715, %v1353_v37  ;;  %v1254_v45 = vadd.f32 %v1178_v34, %v994_v38  ;;  %1818 = vmatmul.msk.bf16.gmra.mxu0 %vm396_vm1, %v2124_v35 }
  0xb3   : > { %v1575_v46 = vmul.f32 %v1543_v43, %v1287_v62  ;;  %1902 = vmatmul.msk.bf16.gmra.mxu1 %vm396_vm1, %v2123_v36 }
  0xb4   : > { %v1417_v47 = vadd.f32 %v1385_v44, %v2392_v27  ;;  %v2410_v48 = vadd.f32 %v2371_v58, %v1254_v45  ;;  %1988 = vmatmul.msk.bf16.gmra.mxu2 %vm396_vm1, %v2125_v41  ;;  %2074 = vmatmul.msk.bf16.gmra.mxu3 %vm396_vm1, %v2126_v42 }
  0xb5   : > { %v1607_v50 = vpack.c.bf16 %v1575_v46, %v1575_v46 }
  0xb6   : > { %v2163_v51 = vpop.eup %2162  ;;  %v1449_v52 = vmul.f32 0.7978846, %v1417_v47  ;;  %v1322_v53 = vmul.f32 %v2410_v48, %v2410_v48 }
  0xb7   : > { %1640 = vst.msk [vmem:[%s2406_s15] sm:$0xf] %vm1639_vm2, %v1607_v50  ;;  %v1512_v54 = vadd.f32 1.0, %v2163_v51  ;;  %v921_v55 = vpop.f32.mrf.mxu2  ;;  %v1181_v56 = vpop.f32.mrf.mxu3 }
  0xb8   : > { %2164 = vtanh.f32 %v1449_v52  ;;  %v1354_v57 = vmul.f32 %v1322_v53, %v2410_v48  ;;  %v995_v59 = vadd.f32 %v921_v55, %v694_v49  ;;  %v470_v60 = vpop.f32.mrf.mxu0  ;;  %v695_v61 = vpop.f32.mrf.mxu1  ;;  %v2131_v53 = vld [vmem:[%s2294_s7 + $0x180] sm:$0xff] }
  0xb9   : > { %v1544_v62 = vmul.f32 0.5, %v1512_v54  ;;  %v696_v8 = vadd.f32 %v695_v61, %v470_v60  ;;  %v2134_v60 = vld [vmem:[%s2294_s7 + $0x198] sm:$0xff] }
  0xba   : > { %v1386_v63 = vmul.f32 0.044715, %v1354_v57  ;;  %v1255_v0 = vadd.f32 %v1181_v56, %v995_v59  ;;  %v2133_v59 = vld [vmem:[%s2294_s7 + $0x190] sm:$0xff] }
  0xbb   : > { %v1576_v1 = vmul.f32 %v1544_v62, %v2381_v14 }
  0xbc   : > { %v1418_v2 = vadd.f32 %v1386_v63, %v2410_v48  ;;  %v2422_v3 = vadd.f32 %v2371_v58, %v1255_v0 }
  0xbd   : > { %v1608_v4 = vpack.c.bf16 %v1576_v1, %v1576_v1 }
  0xbe   : > { %v2165_v5 = vpop.eup %2164  ;;  %v1450_v6 = vmul.f32 0.7978846, %v1418_v2  ;;  %v1323_v7 = vmul.f32 %v2422_v3, %v2422_v3 }
  0xbf   : > { %1641 = vst.msk [vmem:[%s2406_s15 + $0x4] sm:$0xf] %vm1639_vm2, %v1608_v4  ;;  %v1513_v9 = vadd.f32 1.0, %v2165_v5  ;;  %v923_v10 = vpop.f32.mrf.mxu2  ;;  %v1183_v11 = vpop.f32.mrf.mxu3 }
  0xc0   : > { %2166 = vtanh.f32 %v1450_v6  ;;  %v1355_v14 = vmul.f32 %v1323_v7, %v2422_v3  ;;  %v996_v15 = vadd.f32 %v923_v10, %v696_v8  ;;  %v473_v16 = vpop.f32.mrf.mxu0  ;;  %v698_v17 = vpop.f32.mrf.mxu1 }
  0xc1   : > { %v1545_v20 = vmul.f32 0.5, %v1513_v9  ;;  %v699_v26 = vadd.f32 %v698_v17, %v473_v16 }
  0xc2   : > { %v1387_v21 = vmul.f32 0.044715, %v1355_v14  ;;  %v1256_v22 = vadd.f32 %v1183_v11, %v996_v15  ;;  %1819 = vmatmul.msk.bf16.gmra.mxu0 %vm396_vm1, %v2128_v12 }
  0xc3   : > { %v1577_v23 = vmul.f32 %v1545_v20, %v2392_v27  ;;  %1903 = vmatmul.msk.bf16.gmra.mxu1 %vm396_vm1, %v2127_v13 }
  0xc4   : > { %v1419_v24 = vadd.f32 %v1387_v21, %v2422_v3  ;;  %v2438_v25 = vadd.f32 %v2371_v58, %v1256_v22  ;;  %1989 = vmatmul.msk.bf16.gmra.mxu2 %vm396_vm1, %v2129_v18  ;;  %2075 = vmatmul.msk.bf16.gmra.mxu3 %vm396_vm1, %v2130_v19 }
  0xc5   : > { %v1609_v28 = vpack.c.bf16 %v1577_v23, %v1577_v23 }
  0xc6   : > { %v2167_v29 = vpop.eup %2166  ;;  %v1451_v30 = vmul.f32 0.7978846, %v1419_v24  ;;  %v1324_v27 = vmul.f32 %v2438_v25, %v2438_v25 }
  0xc7   : > { %1642 = vst.msk [vmem:[%s2406_s15 + $0x8] sm:$0xf] %vm1639_vm2, %v1609_v28  ;;  %v1514_v31 = vadd.f32 1.0, %v2167_v29  ;;  %v926_v32 = vpop.f32.mrf.mxu2  ;;  %v1186_v33 = vpop.f32.mrf.mxu3 }
  0xc8   : > { %2168 = vtanh.f32 %v1451_v30  ;;  %v1356_v34 = vmul.f32 %v1324_v27, %v2438_v25  ;;  %v997_v35 = vadd.f32 %v926_v32, %v699_v26  ;;  %v475_v36 = vpop.f32.mrf.mxu0  ;;  %v700_v37 = vpop.f32.mrf.mxu1  ;;  %v2135_v27 = vld [vmem:[%s2294_s7 + $0x1a0] sm:$0xff] }
  0xc9   : > { %v1546_v38 = vmul.f32 0.5, %v1514_v31  ;;  %v701_v49 = vadd.f32 %v700_v37, %v475_v36  ;;  %v2138_v36 = vld [vmem:[%s2294_s7 + $0x1b8] sm:$0xff] }
  0xca   : > { %v1388_v39 = vmul.f32 0.044715, %v1356_v34  ;;  %v1257_v40 = vadd.f32 %v1186_v33, %v997_v35  ;;  %v2137_v35 = vld [vmem:[%s2294_s7 + $0x1b0] sm:$0xff] }
  0xcb   : > { %v1578_v41 = vmul.f32 %v1546_v38, %v2410_v48  ;;  %v2132_v48 = vld [vmem:[%s2294_s7 + $0x188] sm:$0xff] }
  0xcc   : > { %v1420_v42 = vadd.f32 %v1388_v39, %v2438_v25  ;;  %v2450_v43 = vadd.f32 %v2371_v58, %v1257_v40 }
  0xcd   : > { %v1610_v44 = vpack.c.bf16 %v1578_v41, %v1578_v41 }
  0xce   : > { %v2169_v45 = vpop.eup %2168  ;;  %v1452_v46 = vmul.f32 0.7978846, %v1420_v42  ;;  %v1325_v47 = vmul.f32 %v2450_v43, %v2450_v43 }
  0xcf   : > { %1643 = vst.msk [vmem:[%s2406_s15 + $0xc] sm:$0xf] %vm1639_vm2, %v1610_v44  ;;  %v1515_v50 = vadd.f32 1.0, %v2169_v45  ;;  %v928_v51 = vpop.f32.mrf.mxu2  ;;  %v1188_v52 = vpop.f32.mrf.mxu3 }
  0xd0   : > { %2170 = vtanh.f32 %v1452_v46  ;;  %v1357_v54 = vmul.f32 %v1325_v47, %v2450_v43  ;;  %v998_v55 = vadd.f32 %v928_v51, %v701_v49  ;;  %v478_v56 = vpop.f32.mrf.mxu0  ;;  %v703_v57 = vpop.f32.mrf.mxu1 }
  0xd1   : > { %v1547_v61 = vmul.f32 0.5, %v1515_v50  ;;  %v704_v4 = vadd.f32 %v703_v57, %v478_v56 }
  0xd2   : > { %v1389_v62 = vmul.f32 0.044715, %v1357_v54  ;;  %v1258_v63 = vadd.f32 %v1188_v52, %v998_v55  ;;  %1820 = vmatmul.msk.bf16.gmra.mxu0 %vm396_vm1, %v2132_v48 }
  0xd3   : > { %v1579_v0 = vmul.f32 %v1547_v61, %v2422_v3  ;;  %1904 = vmatmul.msk.bf16.gmra.mxu1 %vm396_vm1, %v2131_v53 }
  0xd4   : > { %v1421_v1 = vadd.f32 %v1389_v62, %v2450_v43  ;;  %v2466_v2 = vadd.f32 %v2371_v58, %v1258_v63  ;;  %1990 = vmatmul.msk.bf16.gmra.mxu2 %vm396_vm1, %v2133_v59  ;;  %2076 = vmatmul.msk.bf16.gmra.mxu3 %vm396_vm1, %v2134_v60 }
  0xd5   : > { %v1611_v5 = vpack.c.bf16 %v1579_v0, %v1579_v0 }
  0xd6   : > { %v2171_v6 = vpop.eup %2170  ;;  %v1453_v7 = vmul.f32 0.7978846, %v1421_v1  ;;  %v1326_v3 = vmul.f32 %v2466_v2, %v2466_v2 }
  0xd7   : > { %1644 = vst.msk [vmem:[%s2406_s15 + $0x10] sm:$0xf] %vm1639_vm2, %v1611_v5  ;;  %v1516_v8 = vadd.f32 1.0, %v2171_v6  ;;  %v931_v9 = vpop.f32.mrf.mxu2  ;;  %v1191_v10 = vpop.f32.mrf.mxu3 }
  0xd8   : > { %2172 = vtanh.f32 %v1453_v7  ;;  %v1358_v11 = vmul.f32 %v1326_v3, %v2466_v2  ;;  %v999_v12 = vadd.f32 %v931_v9, %v704_v4  ;;  %v480_v13 = vpop.f32.mrf.mxu0  ;;  %v705_v14 = vpop.f32.mrf.mxu1  ;;  %v2139_v3 = vld [vmem:[%s2294_s7 + $0x1c0] sm:$0xff] }
  0xd9   : > { %v1548_v15 = vmul.f32 0.5, %v1516_v8  ;;  %v706_v26 = vadd.f32 %v705_v14, %v480_v13  ;;  %v2142_v13 = vld [vmem:[%s2294_s7 + $0x1d8] sm:$0xff] }
  0xda   : > { %v1390_v16 = vmul.f32 0.044715, %v1358_v11  ;;  %v1259_v17 = vadd.f32 %v1191_v10, %v999_v12  ;;  %v2141_v12 = vld [vmem:[%s2294_s7 + $0x1d0] sm:$0xff] }
  0xdb   : > { %v1580_v18 = vmul.f32 %v1548_v15, %v2438_v25  ;;  %v2136_v25 = vld [vmem:[%s2294_s7 + $0x1a8] sm:$0xff] }
  0xdc   : > { %v1422_v19 = vadd.f32 %v1390_v16, %v2466_v2  ;;  %v2478_v20 = vadd.f32 %v2371_v58, %v1259_v17 }
  0xdd   : > { %v1612_v21 = vpack.c.bf16 %v1580_v18, %v1580_v18 }
  0xde   : > { %v2173_v22 = vpop.eup %2172  ;;  %v1454_v23 = vmul.f32 0.7978846, %v1422_v19  ;;  %v1327_v24 = vmul.f32 %v2478_v20, %v2478_v20 }
  0xdf   : > { %1645 = vst.msk [vmem:[%s2406_s15 + $0x14] sm:$0xf] %vm1639_vm2, %v1612_v21  ;;  %v1517_v28 = vadd.f32 1.0, %v2173_v22  ;;  %v933_v29 = vpop.f32.mrf.mxu2  ;;  %v1193_v30 = vpop.f32.mrf.mxu3 }
  0xe0   : > { %2174 = vtanh.f32 %v1454_v23  ;;  %v1359_v31 = vmul.f32 %v1327_v24, %v2478_v20  ;;  %v1000_v32 = vadd.f32 %v933_v29, %v706_v26  ;;  %v483_v33 = vpop.f32.mrf.mxu0  ;;  %v708_v34 = vpop.f32.mrf.mxu1 }
  0xe1   : > { %v1549_v37 = vmul.f32 0.5, %v1517_v28  ;;  %v709_v44 = vadd.f32 %v708_v34, %v483_v33 }
  0xe2   : > { %v1391_v38 = vmul.f32 0.044715, %v1359_v31  ;;  %v1260_v39 = vadd.f32 %v1193_v30, %v1000_v32  ;;  %1821 = vmatmul.msk.bf16.gmra.mxu0 %vm396_vm1, %v2136_v25 }
  0xe3   : > { %v1581_v40 = vmul.f32 %v1549_v37, %v2450_v43  ;;  %1905 = vmatmul.msk.bf16.gmra.mxu1 %vm396_vm1, %v2135_v27 }
  0xe4   : > { %v1423_v41 = vadd.f32 %v1391_v38, %v2478_v20  ;;  %v2494_v42 = vadd.f32 %v2371_v58, %v1260_v39  ;;  %1991 = vmatmul.msk.bf16.gmra.mxu2 %vm396_vm1, %v2137_v35  ;;  %2077 = vmatmul.msk.bf16.gmra.mxu3 %vm396_vm1, %v2138_v36 }
  0xe5   : > { %v1613_v45 = vpack.c.bf16 %v1581_v40, %v1581_v40 }
  0xe6   : > { %v2175_v46 = vpop.eup %2174  ;;  %v1455_v47 = vmul.f32 0.7978846, %v1423_v41  ;;  %v1328_v43 = vmul.f32 %v2494_v42, %v2494_v42 }
  0xe7   : > { %1646 = vst.msk [vmem:[%s2406_s15 + $0x18] sm:$0xf] %vm1639_vm2, %v1613_v45  ;;  %v1518_v49 = vadd.f32 1.0, %v2175_v46  ;;  %v936_v50 = vpop.f32.mrf.mxu2  ;;  %v1196_v51 = vpop.f32.mrf.mxu3 }
  0xe8   : > { %2176 = vtanh.f32 %v1455_v47  ;;  %v1360_v52 = vmul.f32 %v1328_v43, %v2494_v42  ;;  %v1001_v48 = vadd.f32 %v936_v50, %v709_v44  ;;  %v485_v53 = vpop.f32.mrf.mxu0  ;;  %v710_v54 = vpop.f32.mrf.mxu1  ;;  %v2143_v43 = vld [vmem:[%s2294_s7 + $0x1e0] sm:$0xff] }
  0xe9   : > { %v1550_v55 = vmul.f32 0.5, %v1518_v49  ;;  %v711_v4 = vadd.f32 %v710_v54, %v485_v53  ;;  %v2146_v53 = vld [vmem:[%s2294_s7 + $0x1f8] sm:$0xff] }
  0xea   : > { %v1392_v56 = vmul.f32 0.044715, %v1360_v52  ;;  %v1261_v57 = vadd.f32 %v1196_v51, %v1001_v48  ;;  %v2145_v48 = vld [vmem:[%s2294_s7 + $0x1f0] sm:$0xff] }
  0xeb   : > { %v1582_v59 = vmul.f32 %v1550_v55, %v2466_v2  ;;  %v2140_v2 = vld [vmem:[%s2294_s7 + $0x1c8] sm:$0xff] }
  0xec   : > { %v1424_v60 = vadd.f32 %v1392_v56, %v2494_v42  ;;  %v2506_v61 = vadd.f32 %v2371_v58, %v1261_v57 }
  0xed   : > { %v1614_v62 = vpack.c.bf16 %v1582_v59, %v1582_v59 }
  0xee   : > { %v2177_v63 = vpop.eup %2176  ;;  %v1456_v0 = vmul.f32 0.7978846, %v1424_v60  ;;  %v1329_v1 = vmul.f32 %v2506_v61, %v2506_v61 }
  0xef   : > { %1647 = vst.msk [vmem:[%s2406_s15 + $0x1c] sm:$0xf] %vm1639_vm2, %v1614_v62  ;;  %v1519_v5 = vadd.f32 1.0, %v2177_v63  ;;  %v938_v6 = vpop.f32.mrf.mxu2  ;;  %v1198_v7 = vpop.f32.mrf.mxu3 }
  0xf0   : > { %2178 = vtanh.f32 %v1456_v0  ;;  %v1361_v8 = vmul.f32 %v1329_v1, %v2506_v61  ;;  %v1002_v9 = vadd.f32 %v938_v6, %v711_v4  ;;  %v488_v10 = vpop.f32.mrf.mxu0  ;;  %v713_v11 = vpop.f32.mrf.mxu1 }
  0xf1   : > { %v1551_v14 = vmul.f32 0.5, %v1519_v5  ;;  %v714_v21 = vadd.f32 %v713_v11, %v488_v10 }
  0xf2   : > { %v1393_v15 = vmul.f32 0.044715, %v1361_v8  ;;  %v1262_v16 = vadd.f32 %v1198_v7, %v1002_v9  ;;  %1822 = vmatmul.msk.bf16.gmra.mxu0 %vm396_vm1, %v2140_v2 }
  0xf3   : > { %v1583_v17 = vmul.f32 %v1551_v14, %v2478_v20  ;;  %1906 = vmatmul.msk.bf16.gmra.mxu1 %vm396_vm1, %v2139_v3 }
  0xf4   : > { %v1425_v18 = vadd.f32 %v1393_v15, %v2506_v61  ;;  %v2522_v19 = vadd.f32 %v2371_v58, %v1262_v16  ;;  %1992 = vmatmul.msk.bf16.gmra.mxu2 %vm396_vm1, %v2141_v12  ;;  %2078 = vmatmul.msk.bf16.gmra.mxu3 %vm396_vm1, %v2142_v13 }
  0xf5   : > { %v1615_v22 = vpack.c.bf16 %v1583_v17, %v1583_v17 }
  0xf6   : > { %v2179_v23 = vpop.eup %2178  ;;  %v1457_v24 = vmul.f32 0.7978846, %v1425_v18  ;;  %v1330_v20 = vmul.f32 %v2522_v19, %v2522_v19 }
  0xf7   : > { %1648 = vst.msk [vmem:[%s2406_s15 + $0x20] sm:$0xf] %vm1639_vm2, %v1615_v22  ;;  %v1520_v26 = vadd.f32 1.0, %v2179_v23  ;;  %v941_v28 = vpop.f32.mrf.mxu2  ;;  %v1201_v29 = vpop.f32.mrf.mxu3 }
  0xf8   : > { %2180 = vtanh.f32 %v1457_v24  ;;  %v1362_v30 = vmul.f32 %v1330_v20, %v2522_v19  ;;  %v1003_v25 = vadd.f32 %v941_v28, %v714_v21  ;;  %v490_v27 = vpop.f32.mrf.mxu0  ;;  %v715_v31 = vpop.f32.mrf.mxu1 }
  0xf9   : > { %v1552_v32 = vmul.f32 0.5, %v1520_v26  ;;  %v716_v44 = vadd.f32 %v715_v31, %v490_v27 }
  0xfa   : > { %v1394_v33 = vmul.f32 0.044715, %v1362_v30  ;;  %v1263_v34 = vadd.f32 %v1201_v29, %v1003_v25 }
  0xfb   : > { %v1584_v35 = vmul.f32 %v1552_v32, %v2494_v42  ;;  %v2144_v42 = vld [vmem:[%s2294_s7 + $0x1e8] sm:$0xff] }
  0xfc   : > { %v1426_v36 = vadd.f32 %v1394_v33, %v2522_v19  ;;  %v2534_v37 = vadd.f32 %v2371_v58, %v1263_v34 }
  0xfd   : > { %v1616_v38 = vpack.c.bf16 %v1584_v35, %v1584_v35 }
  0xfe   : > { %v2181_v39 = vpop.eup %2180  ;;  %v1458_v40 = vmul.f32 0.7978846, %v1426_v36  ;;  %v1331_v41 = vmul.f32 %v2534_v37, %v2534_v37 }
  0xff   : > { %1649 = vst.msk [vmem:[%s2406_s15 + $0x24] sm:$0xf] %vm1639_vm2, %v1616_v38  ;;  %v1521_v45 = vadd.f32 1.0, %v2181_v39  ;;  %v943_v46 = vpop.f32.mrf.mxu2  ;;  %v1203_v47 = vpop.f32.mrf.mxu3 }
 0x100   : > { %2182 = vtanh.f32 %v1458_v40  ;;  %v1363_v49 = vmul.f32 %v1331_v41, %v2534_v37  ;;  %v1004_v50 = vadd.f32 %v943_v46, %v716_v44  ;;  %v493_v51 = vpop.f32.mrf.mxu0  ;;  %v718_v52 = vpop.f32.mrf.mxu1 }
 0x101   : > { %v1553_v54 = vmul.f32 0.5, %v1521_v45  ;;  %v719_v62 = vadd.f32 %v718_v52, %v493_v51 }
 0x102   : > { %v1395_v55 = vmul.f32 0.044715, %v1363_v49  ;;  %v1264_v56 = vadd.f32 %v1203_v47, %v1004_v50  ;;  %1823 = vmatmul.msk.bf16.gmra.mxu0 %vm396_vm1, %v2144_v42 }
 0x103   : > { %v1585_v57 = vmul.f32 %v1553_v54, %v2506_v61  ;;  %1907 = vmatmul.msk.bf16.gmra.mxu1 %vm396_vm1, %v2143_v43 }
 0x104   : > { %v1427_v59 = vadd.f32 %v1395_v55, %v2534_v37  ;;  %v1300_v60 = vadd.f32 %v2371_v58, %v1264_v56  ;;  %1993 = vmatmul.msk.bf16.gmra.mxu2 %vm396_vm1, %v2145_v48  ;;  %2079 = vmatmul.msk.bf16.gmra.mxu3 %vm396_vm1, %v2146_v53 }
 0x105   : > { %v1617_v63 = vpack.c.bf16 %v1585_v57, %v1585_v57 }
 0x106   : > { %v2183_v0 = vpop.eup %2182  ;;  %v1459_v1 = vmul.f32 0.7978846, %v1427_v59  ;;  %v1332_v4 = vmul.f32 %v1300_v60, %v1300_v60 }
 0x107   : > { %1650 = vst.msk [vmem:[%s2406_s15 + $0x28] sm:$0xf] %vm1639_vm2, %v1617_v63  ;;  %v1522_v61 = vadd.f32 1.0, %v2183_v0  ;;  %v946_v5 = vpop.f32.mrf.mxu2  ;;  %v1206_v6 = vpop.f32.mrf.mxu3 }
 0x108   : > { %2184 = vtanh.f32 %v1459_v1  ;;  %v1364_v7 = vmul.f32 %v1332_v4, %v1300_v60  ;;  %v1005_v2 = vadd.f32 %v946_v5, %v719_v62  ;;  %v495_v3 = vpop.f32.mrf.mxu0  ;;  %v720_v8 = vpop.f32.mrf.mxu1 }
 0x109   : > { %v1554_v9 = vmul.f32 0.5, %v1522_v61  ;;  %v721_v21 = vadd.f32 %v720_v8, %v495_v3 }
 0x10a   : > { %v1396_v10 = vmul.f32 0.044715, %v1364_v7  ;;  %v1265_v11 = vadd.f32 %v1206_v6, %v1005_v2 }
 0x10b   : > { %v1586_v12 = vmul.f32 %v1554_v9, %v2522_v19 }
 0x10c   : > { %v1428_v13 = vadd.f32 %v1396_v10, %v1300_v60  ;;  %v1301_v14 = vadd.f32 %v2371_v58, %v1265_v11 }
 0x10d   : > { %v1618_v15 = vpack.c.bf16 %v1586_v12, %v1586_v12 }
 0x10e   : > { %v2185_v16 = vpop.eup %2184  ;;  %v1460_v17 = vmul.f32 0.7978846, %v1428_v13  ;;  %v1333_v18 = vmul.f32 %v1301_v14, %v1301_v14 }
 0x10f   : > { %1651 = vst.msk [vmem:[%s2406_s15 + $0x2c] sm:$0xf] %vm1639_vm2, %v1618_v15  ;;  %v1523_v22 = vadd.f32 1.0, %v2185_v16  ;;  %v948_v23 = vpop.f32.mrf.mxu2  ;;  %v1208_v24 = vpop.f32.mrf.mxu3 }
 0x110   : > { %2186 = vtanh.f32 %v1460_v17  ;;  %v1365_v20 = vmul.f32 %v1333_v18, %v1301_v14  ;;  %v1006_v26 = vadd.f32 %v948_v23, %v721_v21  ;;  %v498_v28 = vpop.f32.mrf.mxu0  ;;  %v723_v29 = vpop.f32.mrf.mxu1 }
 0x111   : > { %v1555_v19 = vmul.f32 0.5, %v1523_v22  ;;  %v724_v33 = vadd.f32 %v723_v29, %v498_v28 }
 0x112   : > { %v1397_v30 = vmul.f32 0.044715, %v1365_v20  ;;  %v1266_v25 = vadd.f32 %v1208_v24, %v1006_v26 }
 0x113   : > { %v1587_v27 = vmul.f32 %v1555_v19, %v2534_v37 }
 0x114   : > { %v1429_v31 = vadd.f32 %v1397_v30, %v1301_v14  ;;  %v1302_v32 = vadd.f32 %v2371_v58, %v1266_v25 }
 0x115   : > { %v1619_v34 = vpack.c.bf16 %v1587_v27, %v1587_v27 }
 0x116   : > { %v2187_v35 = vpop.eup %2186  ;;  %v1461_v36 = vmul.f32 0.7978846, %v1429_v31  ;;  %v1334_v38 = vmul.f32 %v1302_v32, %v1302_v32 }
 0x117   : > { %1652 = vst.msk [vmem:[%s2406_s15 + $0x30] sm:$0xf] %vm1639_vm2, %v1619_v34  ;;  %v1524_v39 = vadd.f32 1.0, %v2187_v35  ;;  %v951_v40 = vpop.f32.mrf.mxu2  ;;  %v1211_v41 = vpop.f32.mrf.mxu3 }
 0x118   : > { %2188 = vtanh.f32 %v1461_v36  ;;  %v1366_v44 = vmul.f32 %v1334_v38, %v1302_v32  ;;  %v1007_v45 = vadd.f32 %v951_v40, %v724_v33  ;;  %v500_v46 = vpop.f32.mrf.mxu0  ;;  %v725_v47 = vpop.f32.mrf.mxu1 }
 0x119   : > { %v1556_v37 = vmul.f32 0.5, %v1524_v39  ;;  %v726_v55 = vadd.f32 %v725_v47, %v500_v46 }
 0x11a   : > { %v1398_v42 = vmul.f32 0.044715, %v1366_v44  ;;  %v1267_v43 = vadd.f32 %v1211_v41, %v1007_v45 }
 0x11b   : > { %v1588_v49 = vmul.f32 %v1556_v37, %v1300_v60 }
 0x11c   : > { %v1430_v50 = vadd.f32 %v1398_v42, %v1302_v32  ;;  %v1303_v51 = vadd.f32 %v2371_v58, %v1267_v43 }
 0x11d   : > { %v1620_v52 = vpack.c.bf16 %v1588_v49, %v1588_v49 }
 0x11e   : > { %v2189_v48 = vpop.eup %2188  ;;  %v1462_v53 = vmul.f32 0.7978846, %v1430_v50  ;;  %v1335_v54 = vmul.f32 %v1303_v51, %v1303_v51 }
 0x11f   : > { %1653 = vst.msk [vmem:[%s2406_s15 + $0x34] sm:$0xf] %vm1639_vm2, %v1620_v52  ;;  %v1525_v56 = vadd.f32 1.0, %v2189_v48  ;;  %v953_v57 = vpop.f32.mrf.mxu2  ;;  %v1213_v59 = vpop.f32.mrf.mxu3 }
 0x120   : > { %2190 = vtanh.f32 %v1462_v53  ;;  %v1367_v62 = vmul.f32 %v1335_v54, %v1303_v51  ;;  %v1008_v63 = vadd.f32 %v953_v57, %v726_v55  ;;  %v503_v0 = vpop.f32.mrf.mxu0  ;;  %v728_v1 = vpop.f32.mrf.mxu1 }
 0x121   : > { %v1557_v60 = vmul.f32 0.5, %v1525_v56  ;;  %v729_v2 = vadd.f32 %v728_v1, %v503_v0 }
 0x122   : > { %v1399_v4 = vmul.f32 0.044715, %v1367_v62  ;;  %v1268_v61 = vadd.f32 %v1213_v59, %v1008_v63 }
 0x123   : > { %v1589_v5 = vmul.f32 %v1557_v60, %v1301_v14 }
 0x124   : > { %v1431_v6 = vadd.f32 %v1399_v4, %v1303_v51  ;;  %v1304_v7 = vadd.f32 %v2371_v58, %v1268_v61 }
 0x125   : > { %v1621_v3 = vpack.c.bf16 %v1589_v5, %v1589_v5 }
 0x126   : > { %v2191_v8 = vpop.eup %2190  ;;  %v1463_v9 = vmul.f32 0.7978846, %v1431_v6  ;;  %v1336_v10 = vmul.f32 %v1304_v7, %v1304_v7 }
 0x127   : > { %1654 = vst.msk [vmem:[%s2406_s15 + $0x38] sm:$0xf] %vm1639_vm2, %v1621_v3  ;;  %v1526_v11 = vadd.f32 1.0, %v2191_v8  ;;  %v956_v12 = vpop.f32.mrf.mxu2  ;;  %v1216_v13 = vpop.f32.mrf.mxu3 }
 0x128   : > { %2192 = vtanh.f32 %v1463_v9  ;;  %v1368_v15 = vmul.f32 %v1336_v10, %v1304_v7  ;;  %v1009_v16 = vadd.f32 %v956_v12, %v729_v2  ;;  %v505_v17 = vpop.f32.mrf.mxu0  ;;  %v730_v18 = vpop.f32.mrf.mxu1 }
 0x129   : > { %v1558_v14 = vmul.f32 0.5, %v1526_v11  ;;  %v731_v30 = vadd.f32 %v730_v18, %v505_v17 }
 0x12a   : > { %v1400_v21 = vmul.f32 0.044715, %v1368_v15  ;;  %v1269_v22 = vadd.f32 %v1216_v13, %v1009_v16 }
 0x12b   : > { %v1590_v23 = vmul.f32 %v1558_v14, %v1302_v32 }
 0x12c   : > { %v1432_v24 = vadd.f32 %v1400_v21, %v1304_v7  ;;  %v1305_v20 = vadd.f32 %v2371_v58, %v1269_v22 }
 0x12d   : > { %v1622_v26 = vpack.c.bf16 %v1590_v23, %v1590_v23 }
 0x12e   : > { %v2193_v28 = vpop.eup %2192  ;;  %v1464_v29 = vmul.f32 0.7978846, %v1432_v24  ;;  %v1337_v19 = vmul.f32 %v1305_v20, %v1305_v20 }
 0x12f   : > { %1655 = vst.msk [vmem:[%s2406_s15 + $0x3c] sm:$0xf] %vm1639_vm2, %v1622_v26  ;;  %v1527_v25 = vadd.f32 1.0, %v2193_v28  ;;  %v958_v27 = vpop.f32.mrf.mxu2  ;;  %v1218_v31 = vpop.f32.mrf.mxu3 }
 0x130   : > { %2194 = vtanh.f32 %v1464_v29  ;;  %v1369_v33 = vmul.f32 %v1337_v19, %v1305_v20  ;;  %v1010_v34 = vadd.f32 %v958_v27, %v731_v30  ;;  %v508_v35 = vpop.f32.mrf.mxu0  ;;  %v733_v36 = vpop.f32.mrf.mxu1 }
 0x131   : > { %v1559_v32 = vmul.f32 0.5, %v1527_v25  ;;  %v734_v45 = vadd.f32 %v733_v36, %v508_v35 }
 0x132   : > { %v1401_v38 = vmul.f32 0.044715, %v1369_v33  ;;  %v1270_v39 = vadd.f32 %v1218_v31, %v1010_v34 }
 0x133   : > { %v1591_v40 = vmul.f32 %v1559_v32, %v1303_v51 }
 0x134   : > { %v1433_v41 = vadd.f32 %v1401_v38, %v1305_v20  ;;  %v1306_v44 = vadd.f32 %v2371_v58, %v1270_v39 }
 0x135   : > { %v1623_v46 = vpack.c.bf16 %v1591_v40, %v1591_v40 }
 0x136   : > { %v2195_v47 = vpop.eup %2194  ;;  %v1465_v37 = vmul.f32 0.7978846, %v1433_v41  ;;  %v1338_v42 = vmul.f32 %v1306_v44, %v1306_v44 }
 0x137   : > { %1656 = vst.msk [vmem:[%s2406_s15 + $0x40] sm:$0xf] %vm1639_vm2, %v1623_v46  ;;  %v1528_v43 = vadd.f32 1.0, %v2195_v47  ;;  %v961_v49 = vpop.f32.mrf.mxu2  ;;  %v1221_v50 = vpop.f32.mrf.mxu3 }
 0x138   : > { %2196 = vtanh.f32 %v1465_v37  ;;  %v1370_v52 = vmul.f32 %v1338_v42, %v1306_v44  ;;  %v1011_v48 = vadd.f32 %v961_v49, %v734_v45  ;;  %v510_v53 = vpop.f32.mrf.mxu0  ;;  %v735_v54 = vpop.f32.mrf.mxu1 }
 0x139   : > { %v1560_v51 = vmul.f32 0.5, %v1528_v43  ;;  %v736_v4 = vadd.f32 %v735_v54, %v510_v53 }
 0x13a   : > { %v1402_v55 = vmul.f32 0.044715, %v1370_v52  ;;  %v1271_v56 = vadd.f32 %v1221_v50, %v1011_v48 }
 0x13b   : > { %v1592_v57 = vmul.f32 %v1560_v51, %v1304_v7 }
 0x13c   : > { %v1434_v59 = vadd.f32 %v1402_v55, %v1306_v44  ;;  %v1307_v62 = vadd.f32 %v2371_v58, %v1271_v56 }
 0x13d   : > { %v1624_v63 = vpack.c.bf16 %v1592_v57, %v1592_v57 }
 0x13e   : > { %v2197_v0 = vpop.eup %2196  ;;  %v1466_v1 = vmul.f32 0.7978846, %v1434_v59  ;;  %v1339_v60 = vmul.f32 %v1307_v62, %v1307_v62 }
 0x13f   : > { %1657 = vst.msk [vmem:[%s2406_s15 + $0x44] sm:$0xf] %vm1639_vm2, %v1624_v63  ;;  %v1529_v61 = vadd.f32 1.0, %v2197_v0  ;;  %v963_v5 = vpop.f32.mrf.mxu2  ;;  %v1223_v6 = vpop.f32.mrf.mxu3 }
 0x140   : > { %2198 = vtanh.f32 %v1466_v1  ;;  %v1371_v2 = vmul.f32 %v1339_v60, %v1307_v62  ;;  %v1012_v3 = vadd.f32 %v963_v5, %v736_v4  ;;  %v513_v8 = vpop.f32.mrf.mxu0  ;;  %v738_v9 = vpop.f32.mrf.mxu1 }
 0x141   : > { %v1561_v7 = vmul.f32 0.5, %v1529_v61  ;;  %v739_v16 = vadd.f32 %v738_v9, %v513_v8 }
 0x142   : > { %v1403_v10 = vmul.f32 0.044715, %v1371_v2  ;;  %v1272_v11 = vadd.f32 %v1223_v6, %v1012_v3  ;;  %v2589_v6 = vld [vmem:[%s2626_s2] ss:$0 sm:$0xff] }
 0x143   : > { %v1593_v12 = vmul.f32 %v1561_v7, %v1305_v20 }
 0x144   : > { %v1435_v13 = vadd.f32 %v1403_v10, %v1307_v62  ;;  %v1308_v15 = vadd.f32 %v2371_v58, %v1272_v11 }
 0x145   : > { %v1625_v17 = vpack.c.bf16 %v1593_v12, %v1593_v12 }
 0x146   : > { %v2199_v18 = vpop.eup %2198  ;;  %v1467_v14 = vmul.f32 0.7978846, %v1435_v13  ;;  %v1340_v21 = vmul.f32 %v1308_v15, %v1308_v15 }
 0x147   : > { %1658 = vst.msk [vmem:[%s2406_s15 + $0x48] sm:$0xf] %vm1639_vm2, %v1625_v17  ;;  %v1530_v22 = vadd.f32 1.0, %v2199_v18  ;;  %v966_v23 = vpop.f32.mrf.mxu2  ;;  %v1226_v24 = vpop.f32.mrf.mxu3 }
 0x148   : > { %2200 = vtanh.f32 %v1467_v14  ;;  %v1372_v26 = vmul.f32 %v1340_v21, %v1308_v15  ;;  %v1013_v28 = vadd.f32 %v966_v23, %v739_v16  ;;  %v515_v29 = vpop.f32.mrf.mxu0  ;;  %v740_v19 = vpop.f32.mrf.mxu1 }
 0x149   : > { %v1562_v20 = vmul.f32 0.5, %v1530_v22  ;;  %v741_v38 = vadd.f32 %v740_v19, %v515_v29 }
 0x14a   : > { %v1404_v30 = vmul.f32 0.044715, %v1372_v26  ;;  %v1273_v25 = vadd.f32 %v1226_v24, %v1013_v28 }
 0x14b   : > { %v1594_v27 = vmul.f32 %v1562_v20, %v1306_v44 }
 0x14c   : > { %v1436_v31 = vadd.f32 %v1404_v30, %v1308_v15  ;;  %v1309_v33 = vadd.f32 %v2371_v58, %v1273_v25 }
 0x14d   : > { %v1626_v34 = vpack.c.bf16 %v1594_v27, %v1594_v27 }
 0x14e   : > { %v2201_v35 = vpop.eup %2200  ;;  %v1468_v36 = vmul.f32 0.7978846, %v1436_v31  ;;  %v1341_v32 = vmul.f32 %v1309_v33, %v1309_v33 }
 0x14f   : > { %1659 = vst.msk [vmem:[%s2406_s15 + $0x4c] sm:$0xf] %vm1639_vm2, %v1626_v34  ;;  %v1531_v39 = vadd.f32 1.0, %v2201_v35  ;;  %v968_v40 = vpop.f32.mrf.mxu2  ;;  %v1228_v41 = vpop.f32.mrf.mxu3 }
 0x150   : > { %2202 = vtanh.f32 %v1468_v36  ;;  %v1373_v45 = vmul.f32 %v1341_v32, %v1309_v33  ;;  %v1014_v46 = vadd.f32 %v968_v40, %v741_v38  ;;  %v518_v47 = vpop.f32.mrf.mxu0  ;;  %v743_v37 = vpop.f32.mrf.mxu1 }
 0x151   : > { %v1563_v44 = vmul.f32 0.5, %v1531_v39  ;;  %v744_v48 = vadd.f32 %v743_v37, %v518_v47 }
 0x152   : > { %v1405_v42 = vmul.f32 0.044715, %v1373_v45  ;;  %v1274_v43 = vadd.f32 %v1228_v41, %v1014_v46 }
 0x153   : > { %v1595_v49 = vmul.f32 %v1563_v44, %v1307_v62 }
 0x154   : > { %v1437_v50 = vadd.f32 %v1405_v42, %v1309_v33  ;;  %v1310_v52 = vadd.f32 %v2371_v58, %v1274_v43 }
 0x155   : > { %v1627_v53 = vpack.c.bf16 %v1595_v49, %v1595_v49 }
 0x156   : > { %v2203_v54 = vpop.eup %2202  ;;  %v1469_v51 = vmul.f32 0.7978846, %v1437_v50  ;;  %v1342_v55 = vmul.f32 %v1310_v52, %v1310_v52 }
 0x157   : > { %1660 = vst.msk [vmem:[%s2406_s15 + $0x50] sm:$0xf] %vm1639_vm2, %v1627_v53  ;;  %v1532_v56 = vadd.f32 1.0, %v2203_v54  ;;  %v971_v57 = vpop.f32.mrf.mxu2  ;;  %v1231_v59 = vpop.f32.mrf.mxu3 }
 0x158   : > { %2204 = vtanh.f32 %v1469_v51  ;;  %v1374_v63 = vmul.f32 %v1342_v55, %v1310_v52  ;;  %v1015_v0 = vadd.f32 %v971_v57, %v744_v48  ;;  %v520_v1 = vpop.f32.mrf.mxu0  ;;  %v745_v60 = vpop.f32.mrf.mxu1 }
 0x159   : > { %v1564_v62 = vmul.f32 0.5, %v1532_v56  ;;  %v746_v10 = vadd.f32 %v745_v60, %v520_v1 }
 0x15a   : > { %v1406_v4 = vmul.f32 0.044715, %v1374_v63  ;;  %v1275_v61 = vadd.f32 %v1231_v59, %v1015_v0 }
 0x15b   : > { %v1596_v58 = vmul.f32 %v1564_v62, %v1308_v15 }
 0x15c   : > { %v1438_v5 = vadd.f32 %v1406_v4, %v1310_v52  ;;  %v1311_v2 = vadd.f32 %v2589_v6, %v1275_v61 }
 0x15d   : > { %v1628_v3 = vpack.c.bf16 %v1596_v58, %v1596_v58 }
 0x15e   : > { %v2205_v8 = vpop.eup %2204  ;;  %v1470_v9 = vmul.f32 0.7978846, %v1438_v5  ;;  %v1343_v7 = vmul.f32 %v1311_v2, %v1311_v2 }
 0x15f   : > { %1661 = vst.msk [vmem:[%s2406_s15 + $0x54] sm:$0xf] %vm1639_vm2, %v1628_v3  ;;  %v1533_v11 = vadd.f32 1.0, %v2205_v8  ;;  %v973_v12 = vpop.f32.mrf.mxu2  ;;  %v1233_v13 = vpop.f32.mrf.mxu3 }
 0x160   : > { %2206 = vtanh.f32 %v1470_v9  ;;  %v1375_v15 = vmul.f32 %v1343_v7, %v1311_v2  ;;  %v1016_v16 = vadd.f32 %v973_v12, %v746_v10  ;;  %v523_v17 = vpop.f32.mrf.mxu0  ;;  %v748_v18 = vpop.f32.mrf.mxu1 }
 0x161   : > { %v1565_v14 = vmul.f32 0.5, %v1533_v11  ;;  %v749_v28 = vadd.f32 %v748_v18, %v523_v17 }
 0x162   : > { %v1407_v21 = vmul.f32 0.044715, %v1375_v15  ;;  %v1276_v22 = vadd.f32 %v1233_v13, %v1016_v16 }
 0x163   : > { %v1597_v23 = vmul.f32 %v1565_v14, %v1309_v33 }
 0x164   : > { %v1439_v24 = vadd.f32 %v1407_v21, %v1311_v2  ;;  %v1312_v26 = vadd.f32 %v2589_v6, %v1276_v22 }
 0x165   : > { %v1629_v29 = vpack.c.bf16 %v1597_v23, %v1597_v23 }
 0x166   : > { %v2207_v19 = vpop.eup %2206  ;;  %v1471_v20 = vmul.f32 0.7978846, %v1439_v24  ;;  %v1344_v30 = vmul.f32 %v1312_v26, %v1312_v26 }
 0x167   : > { %1662 = vst.msk [vmem:[%s2406_s15 + $0x58] sm:$0xf] %vm1639_vm2, %v1629_v29  ;;  %v1534_v25 = vadd.f32 1.0, %v2207_v19  ;;  %v976_v27 = vpop.f32.mrf.mxu2  ;;  %v1236_v31 = vpop.f32.mrf.mxu3 }
 0x168   : > { %2208 = vtanh.f32 %v1471_v20  ;;  %v1376_v34 = vmul.f32 %v1344_v30, %v1312_v26  ;;  %v1017_v35 = vadd.f32 %v976_v27, %v749_v28  ;;  %v525_v36 = vpop.f32.mrf.mxu0  ;;  %v750_v32 = vpop.f32.mrf.mxu1 }
 0x169   : > { %v1566_v33 = vmul.f32 0.5, %v1534_v25  ;;  %v751_v42 = vadd.f32 %v750_v32, %v525_v36 }
 0x16a   : > { %v1408_v38 = vmul.f32 0.044715, %v1376_v34  ;;  %v1277_v39 = vadd.f32 %v1236_v31, %v1017_v35 }
 0x16b   : > { %v1598_v40 = vmul.f32 %v1566_v33, %v1310_v52 }
 0x16c   : > { %v1440_v41 = vadd.f32 %v1408_v38, %v1312_v26  ;;  %v1313_v45 = vadd.f32 %v2589_v6, %v1277_v39 }
 0x16d   : > { %v1630_v46 = vpack.c.bf16 %v1598_v40, %v1598_v40 }
 0x16e   : > { %v2209_v47 = vpop.eup %2208  ;;  %v1472_v37 = vmul.f32 0.7978846, %v1440_v41  ;;  %v1345_v44 = vmul.f32 %v1313_v45, %v1313_v45 }
 0x16f   : > { %1663 = vst.msk [vmem:[%s2406_s15 + $0x5c] sm:$0xf] %vm1639_vm2, %v1630_v46  ;;  %v1535_v43 = vadd.f32 1.0, %v2209_v47  ;;  %v978_v49 = vpop.f32.mrf.mxu2  ;;  %v1238_v50 = vpop.f32.mrf.mxu3 }
 0x170   : > { %2210 = vtanh.f32 %v1472_v37  ;;  %v1377_v48 = vmul.f32 %v1345_v44, %v1313_v45  ;;  %v1018_v53 = vadd.f32 %v978_v49, %v751_v42  ;;  %v528_v54 = vpop.f32.mrf.mxu0  ;;  %v753_v51 = vpop.f32.mrf.mxu1 }
 0x171   : > { %v1567_v52 = vmul.f32 0.5, %v1535_v43  ;;  %v754_v0 = vadd.f32 %v753_v51, %v528_v54 }
 0x172   : > { %v1409_v55 = vmul.f32 0.044715, %v1377_v48  ;;  %v1278_v56 = vadd.f32 %v1238_v50, %v1018_v53 }
 0x173   : > { %v1599_v57 = vmul.f32 %v1567_v52, %v1311_v2 }
 0x174   : > { %v1441_v59 = vadd.f32 %v1409_v55, %v1313_v45  ;;  %v1314_v63 = vadd.f32 %v2589_v6, %v1278_v56 }
 0x175   : > { %v1631_v1 = vpack.c.bf16 %v1599_v57, %v1599_v57 }
 0x176   : > { %v2211_v60 = vpop.eup %2210  ;;  %v1473_v62 = vmul.f32 0.7978846, %v1441_v59  ;;  %v1346_v4 = vmul.f32 %v1314_v63, %v1314_v63 }
 0x177   : > { %1664 = vst.msk [vmem:[%s2406_s15 + $0x60] sm:$0xf] %vm1639_vm2, %v1631_v1  ;;  %v1536_v61 = vadd.f32 1.0, %v2211_v60  ;;  %v981_v58 = vpop.f32.mrf.mxu2  ;;  %v1241_v5 = vpop.f32.mrf.mxu3 }
 0x178   : > { %2212 = vtanh.f32 %v1473_v62  ;;  %v1378_v3 = vmul.f32 %v1346_v4, %v1314_v63  ;;  %v1019_v8 = vadd.f32 %v981_v58, %v754_v0  ;;  %v530_v9 = vpop.f32.mrf.mxu0  ;;  %v755_v7 = vpop.f32.mrf.mxu1 }
 0x179   : > { %v1568_v2 = vmul.f32 0.5, %v1536_v61  ;;  %v756_v21 = vadd.f32 %v755_v7, %v530_v9 }
 0x17a   : > { %v1410_v10 = vmul.f32 0.044715, %v1378_v3  ;;  %v1279_v11 = vadd.f32 %v1241_v5, %v1019_v8 }
 0x17b   : > { %v1600_v12 = vmul.f32 %v1568_v2, %v1312_v26 }
 0x17c   : > { %v1442_v13 = vadd.f32 %v1410_v10, %v1314_v63  ;;  %v1315_v15 = vadd.f32 %v2589_v6, %v1279_v11 }
 0x17d   : > { %v1632_v16 = vpack.c.bf16 %v1600_v12, %v1600_v12 }
 0x17e   : > { %v2213_v17 = vpop.eup %2212  ;;  %v1474_v18 = vmul.f32 0.7978846, %v1442_v13  ;;  %v1347_v14 = vmul.f32 %v1315_v15, %v1315_v15 }
 0x17f   : > { %1665 = vst.msk [vmem:[%s2406_s15 + $0x64] sm:$0xf] %vm1639_vm2, %v1632_v16  ;;  %v1537_v22 = vadd.f32 1.0, %v2213_v17  ;;  %v983_v23 = vpop.f32.mrf.mxu2  ;;  %v1243_v24 = vpop.f32.mrf.mxu3 }
 0x180   : > { %2214 = vtanh.f32 %v1474_v18  ;;  %v1379_v28 = vmul.f32 %v1347_v14, %v1315_v15  ;;  %v1020_v29 = vadd.f32 %v983_v23, %v756_v21  ;;  %v533_v20 = vpop.f32.mrf.mxu0  ;;  %v758_v26 = vpop.f32.mrf.mxu1 }
 0x181   : > { %v1569_v19 = vmul.f32 0.5, %v1537_v22  ;;  %v759_v35 = vadd.f32 %v758_v26, %v533_v20 }
 0x182   : > { %v1411_v30 = vmul.f32 0.044715, %v1379_v28  ;;  %v1280_v25 = vadd.f32 %v1243_v24, %v1020_v29 }
 0x183   : > { %v1601_v27 = vmul.f32 %v1569_v19, %v1313_v45 }
 0x184   : > { %v1443_v31 = vadd.f32 %v1411_v30, %v1315_v15  ;;  %v1316_v34 = vadd.f32 %v2589_v6, %v1280_v25 }
 0x185   : > { %v1633_v36 = vpack.c.bf16 %v1601_v27, %v1601_v27 }
 0x186   : > { %v2215_v32 = vpop.eup %2214  ;;  %v1475_v33 = vmul.f32 0.7978846, %v1443_v31  ;;  %v1348_v38 = vmul.f32 %v1316_v34, %v1316_v34 }
 0x187   : > { %1666 = vst.msk [vmem:[%s2406_s15 + $0x68] sm:$0xf] %vm1639_vm2, %v1633_v36  ;;  %v1538_v39 = vadd.f32 1.0, %v2215_v32  ;;  %v986_v40 = vpop.f32.mrf.mxu2  ;;  %v1246_v41 = vpop.f32.mrf.mxu3 }
 0x188   : > { %2216 = vtanh.f32 %v1475_v33  ;;  %v1380_v46 = vmul.f32 %v1348_v38, %v1316_v34  ;;  %v1021_v47 = vadd.f32 %v986_v40, %v759_v35  ;;  %v535_v43 = vpop.f32.mrf.mxu0  ;;  %v760_v49 = vpop.f32.mrf.mxu1 }
 0x189   : > { %v1570_v37 = vmul.f32 0.5, %v1538_v39  ;;  %v761_v55 = vadd.f32 %v760_v49, %v535_v43 }
 0x18a   : > { %v1412_v44 = vmul.f32 0.044715, %v1380_v46  ;;  %v1281_v45 = vadd.f32 %v1246_v41, %v1021_v47 }
 0x18b   : > { %v1602_v42 = vmul.f32 %v1570_v37, %v1314_v63 }
 0x18c   : > { %v1444_v50 = vadd.f32 %v1412_v44, %v1316_v34  ;;  %v1317_v48 = vadd.f32 %v2589_v6, %v1281_v45 }
 0x18d   : > { %v1634_v53 = vpack.c.bf16 %v1602_v42, %v1602_v42 }
 0x18e   : > { %v2217_v54 = vpop.eup %2216  ;;  %v1476_v51 = vmul.f32 0.7978846, %v1444_v50  ;;  %v1349_v52 = vmul.f32 %v1317_v48, %v1317_v48 }
 0x18f   : > { %1667 = vst.msk [vmem:[%s2406_s15 + $0x6c] sm:$0xf] %vm1639_vm2, %v1634_v53  ;;  %v1539_v56 = vadd.f32 1.0, %v2217_v54  ;;  %v988_v57 = vpop.f32.mrf.mxu2  ;;  %v1248_v63 = vpop.f32.mrf.mxu3 }
 0x190   : > { %2218 = vtanh.f32 %v1476_v51  ;;  %v1381_v59 = vmul.f32 %v1349_v52, %v1317_v48  ;;  %v1022_v0 = vadd.f32 %v988_v57, %v761_v55 }
 0x191   : > { %v1571_v1 = vmul.f32 0.5, %v1539_v56 }
 0x192   : > { %v1413_v60 = vmul.f32 0.044715, %v1381_v59  ;;  %v1282_v62 = vadd.f32 %v1248_v63, %v1022_v0 }
 0x193   : > { %v1603_v4 = vmul.f32 %v1571_v1, %v1315_v15 }
 0x194   : > { %v1445_v61 = vadd.f32 %v1413_v60, %v1317_v48  ;;  %v1318_v58 = vadd.f32 %v2589_v6, %v1282_v62 }
 0x195   : > { %v1635_v5 = vpack.c.bf16 %v1603_v4, %v1603_v4 }
 0x196   : > { %v2219_v3 = vpop.eup %2218  ;;  %v1477_v8 = vmul.f32 0.7978846, %v1445_v61  ;;  %v1350_v9 = vmul.f32 %v1318_v58, %v1318_v58 }
 0x197   : > { %1668 = vst.msk [vmem:[%s2406_s15 + $0x70] sm:$0xf] %vm1639_vm2, %v1635_v5  ;;  %v1540_v7 = vadd.f32 1.0, %v2219_v3 }
 0x198   : > { %2220 = vtanh.f32 %v1477_v8  ;;  %v1382_v2 = vmul.f32 %v1350_v9, %v1318_v58 }
 0x199   : > { %v1572_v10 = vmul.f32 0.5, %v1540_v7 }
 0x19a   : > { %v1414_v11 = vmul.f32 0.044715, %v1382_v2 }
 0x19b   : > { %v1604_v12 = vmul.f32 %v1572_v10, %v1316_v34 }
 0x19c   : > { %v1446_v13 = vadd.f32 %v1414_v11, %v1318_v58 }
 0x19d   : > { %v1636_v15 = vpack.c.bf16 %v1604_v12, %v1604_v12 }
 0x19e   : > { %v2221_v16 = vpop.eup %2220  ;;  %v1478_v17 = vmul.f32 0.7978846, %v1446_v13 }
 0x19f   : > { %1669 = vst.msk [vmem:[%s2406_s15 + $0x74] sm:$0xf] %vm1639_vm2, %v1636_v15  ;;  %v1541_v6 = vadd.f32 1.0, %v2221_v16 }
 0x1a0   : > { %2222 = vtanh.f32 %v1478_v17 }
 0x1a1   : > { %v1573_v18 = vmul.f32 0.5, %v1541_v6 }
 0x1a3   : > { %v1605_v14 = vmul.f32 %v1573_v18, %v1317_v48 }
 0x1a5   : > { %v1637_v21 = vpack.c.bf16 %v1605_v14, %v1605_v14 }
 0x1a6   : > { %v2223_v22 = vpop.eup %2222 }
 0x1a7   : > { %1670 = vst.msk [vmem:[%s2406_s15 + $0x78] sm:$0xf] %vm1639_vm2, %v1637_v21  ;;  %v1542_v23 = vadd.f32 1.0, %v2223_v22 }
 0x1a9   : > { %v1574_v24 = vmul.f32 0.5, %v1542_v23 }
 0x1ab   : > { %v1606_v28 = vmul.f32 %v1574_v24, %v1318_v58 }
 0x1ad   : > { %v1638_v29 = vpack.c.bf16 %v1606_v28, %v1606_v28 }
 0x1af   : > { %1671 = vst.msk [vmem:[%s2406_s15 + $0x7c] sm:$0xf] %vm1639_vm2, %v1638_v29 }
 0x1b0 PF: > { %s13_s12 = sadd.s32 1, %s2231_s12  }
 0x1b1   : > { %p10_p5 = scmp.ge.s32.totalorder %s13_s12, 4  }
 0x1b3   :  { %12 = sbr.rel (!%p10_p5) target bundleno = 1 (0x1), region = 65 }

// kernel: upocr_forward.10
= control target key start
LH: loop header
LB: loop body
LE: loop exit
PB: predicated region body
PF: predicated region fallthrough
CT: control target
= control target key end

     0   :  { %s564_s1 = inlined_call_operand.vmem [shape: bf16[2,128,128], index: 1, kind: input, shape index: {}]   ;;  %s565_s0 = inlined_call_operand.vmem [shape: bf16[8,2,4,128], index: 0, kind: input, shape index: {}]   ;;  %s566_s2 = inlined_call_operand.vmem [shape: f32[1,128], index: 2, kind: input, shape index: {}]   ;;  %s567_s3 = inlined_call_operand.vmem [shape: bf16[32,128], index: 3, kind: output, shape index: {}]  }
   0x1   :  { %v402_v0 = vld [vmem:[%s564_s1 + $0x78] sm:$0xff]  ;;  %v401_v2 = vld [vmem:[%s564_s1 + $0x70] sm:$0xff]  ;;  %v15_v4 = vld [vmem:[%s565_s0 + $0x2] sm:$0x3] }
   0x2   :  { %v394_v1 = vld [vmem:[%s564_s1 + $0x38] sm:$0xff]  ;;  %138 = vmatpush.bf16.msra.mxu0 %v402_v0  ;;  %414 = vmatpush.bf16.msra.mxu2 %v402_v0  ;;  %v393_v3 = vld [vmem:[%s564_s1 + $0x30] sm:$0xff]  ;;  %v400_v5 = vld [vmem:[%s564_s1 + $0x68] sm:$0xff]  ;;  %64 = vst [vmem:[#allocation1] ss:$4 sm:$0xff] %v15_v4 }
   0x3   :  { %232 = vmatpush.bf16.msra.mxu1 %v394_v1  ;;  %422 = vmatpush.bf16.msra.mxu3 %v394_v1  ;;  %v17_v6 = vld [vmem:[%s565_s0 + $0x6] sm:$0x3]  ;;  %v392_v7 = vld [vmem:[%s564_s1 + $0x28] sm:$0xff]  ;;  %v23_v10 = vld [vmem:[%s565_s0 + $0x12] sm:$0x3] }
   0x4   :  { %v19_v8 = vld [vmem:[%s565_s0 + $0xa] sm:$0x3]  ;;  %v21_v9 = vld [vmem:[%s565_s0 + $0xe] sm:$0x3]  ;;  %67 = vst [vmem:[#allocation1 + $0x1] ss:$4 sm:$0xff] %v17_v6 }
   0x5   :  { %v399_v11 = vld [vmem:[%s564_s1 + $0x60] sm:$0xff]  ;;  %70 = vst [vmem:[#allocation1 + $0x2] ss:$4 sm:$0xff] %v19_v8  ;;  %v25_v12 = vld [vmem:[%s565_s0 + $0x16] sm:$0x3]  ;;  %v398_v16 = vld [vmem:[%s564_s1 + $0x58] sm:$0xff] }
   0x6   :  { %139 = vmatpush.bf16.msra.mxu0 %v401_v2  ;;  %415 = vmatpush.bf16.msra.mxu2 %v401_v2  ;;  %v391_v13 = vld [vmem:[%s564_s1 + $0x20] sm:$0xff]  ;;  %73 = vst [vmem:[#allocation1 + $0x3] ss:$4 sm:$0xff] %v21_v9  ;;  %v27_v14 = vld [vmem:[%s565_s0 + $0x1a] sm:$0x3]  ;;  %v397_v20 = vld [vmem:[%s564_s1 + $0x50] sm:$0xff] }
   0x7   :  { %233 = vmatpush.bf16.msra.mxu1 %v393_v3  ;;  %423 = vmatpush.bf16.msra.mxu3 %v393_v3  ;;  %v29_v15 = vld [vmem:[%s565_s0 + $0x1e] sm:$0x3]  ;;  %76 = vst [vmem:[#allocation1 + $0x20] ss:$4 sm:$0xff] %v23_v10  ;;  %v14_v18 = vld [vmem:[%s565_s0] sm:$0x3] }
   0x8   :  { %79 = vst [vmem:[#allocation1 + $0x21] ss:$4 sm:$0xff] %v25_v12  ;;  %v390_v17 = vld [vmem:[%s564_s1 + $0x18] sm:$0xff]  ;;  %v16_v19 = vld [vmem:[%s565_s0 + $0x4] sm:$0x3]  ;;  %v389_v23 = vld [vmem:[%s564_s1 + $0x10] sm:$0xff] }
   0x9   :  { %82 = vst [vmem:[#allocation1 + $0x22] ss:$4 sm:$0xff] %v27_v14  ;;  %v18_v21 = vld [vmem:[%s565_s0 + $0x8] sm:$0x3]  ;;  %v20_v24 = vld [vmem:[%s565_s0 + $0xc] sm:$0x3] }
   0xa   :  { %140 = vmatpush.bf16.msra.mxu0 %v400_v5  ;;  %416 = vmatpush.bf16.msra.mxu2 %v400_v5  ;;  %85 = vst [vmem:[#allocation1 + $0x23] ss:$4 sm:$0xff] %v29_v15  ;;  %v22_v25 = vld [vmem:[%s565_s0 + $0x10] sm:$0x3]  ;;  %v24_v26 = vld [vmem:[%s565_s0 + $0x14] sm:$0x3] }
   0xb   :  { %234 = vmatpush.bf16.msra.mxu1 %v392_v7  ;;  %424 = vmatpush.bf16.msra.mxu3 %v392_v7  ;;  %v26_v27 = vld [vmem:[%s565_s0 + $0x18] sm:$0x3]  ;;  %v396_v28 = vld [vmem:[%s564_s1 + $0x48] sm:$0xff]  ;;  %v28_v31 = vld [vmem:[%s565_s0 + $0x1c] sm:$0x3] }
   0xc   :  { %v388_v30 = vld [vmem:[%s564_s1 + $0x8] sm:$0xff]  ;;  %v395_v32 = vld [vmem:[%s564_s1 + $0x40] sm:$0xff] }
   0xd   :  { %v86_v22 = vld.sshfl [vmem:[#allocation1] sm:$0xff pattern:$0x73625140] }
   0xe   :  { %141 = vmatpush.bf16.msra.mxu0 %v399_v11  ;;  %417 = vmatpush.bf16.msra.mxu2 %v399_v11  ;;  %158 = vst [vmem:[#allocation1] ss:$4 sm:$0xff] %v14_v18  ;;  %v387_v33 = vld [vmem:[%s564_s1] sm:$0xff] }
   0xf   :  { %235 = vmatpush.bf16.msra.mxu1 %v391_v13  ;;  %425 = vmatpush.bf16.msra.mxu3 %v391_v13  ;;  %161 = vst [vmem:[#allocation1 + $0x1] ss:$4 sm:$0xff] %v16_v19  ;;  %v430_v37 = vld [vmem:[%s566_s2] ss:$0 sm:$0xff] }
  0x10   :  { %164 = vst [vmem:[#allocation1 + $0x2] ss:$4 sm:$0xff] %v18_v21 }
  0x11   :  { %167 = vst [vmem:[#allocation1 + $0x3] ss:$4 sm:$0xff] %v20_v24  ;;  %v87_v29 = vld.sshfl [vmem:[#allocation1 + $0x20] sm:$0xff pattern:$0x73625140] }
  0x12   :  { %142 = vmatpush.bf16.msra.mxu0 %v398_v16  ;;  %418 = vmatpush.bf16.msra.mxu2 %v398_v16  ;;  %170 = vst [vmem:[#allocation1 + $0x20] ss:$4 sm:$0xff] %v22_v25 }
  0x13   :  { %236 = vmatpush.bf16.msra.mxu1 %v390_v17  ;;  %426 = vmatpush.bf16.msra.mxu3 %v390_v17  ;;  %173 = vst [vmem:[#allocation1 + $0x21] ss:$4 sm:$0xff] %v24_v26 }
  0x14   :  { %176 = vst [vmem:[#allocation1 + $0x22] ss:$4 sm:$0xff] %v26_v27 }
  0x15   :  { %179 = vst [vmem:[#allocation1 + $0x23] ss:$4 sm:$0xff] %v28_v31 }
  0x16   :  { %143 = vmatpush.bf16.msra.mxu0 %v397_v20  ;;  %419 = vmatpush.bf16.msra.mxu2 %v397_v20 }
  0x17   :  { %237 = vmatpush.bf16.msra.mxu1 %v389_v23  ;;  %427 = vmatpush.bf16.msra.mxu3 %v389_v23 }
  0x18   :  { %v180_v34 = vld.sshfl [vmem:[#allocation1] sm:$0xff pattern:$0x73625140] }
  0x1a   :  { %144 = vmatpush.bf16.msra.mxu0 %v396_v28  ;;  %420 = vmatpush.bf16.msra.mxu2 %v396_v28 }
  0x1b   :  { %238 = vmatpush.bf16.msra.mxu1 %v388_v30  ;;  %428 = vmatpush.bf16.msra.mxu3 %v388_v30 }
  0x1c   :  { %v181_v35 = vld.sshfl [vmem:[#allocation1 + $0x20] sm:$0xff pattern:$0x73625140] }
  0x1e   :  { %145 = vmatpush.bf16.msra.mxu0 %v395_v32  ;;  %421 = vmatpush.bf16.msra.mxu2 %v395_v32 }
  0x1f   :  { %239 = vmatpush.bf16.msra.mxu1 %v387_v33  ;;  %429 = vmatpush.bf16.msra.mxu3 %v387_v33 }
  0x21   :  { %146 = vmatmul.bf16.vlgmr.msra.gmra.mxu0 %v86_v22  ;;  %151 = vmatmul.bf16.vlgmr.msra.gmra.mxu2 %v87_v29 }
  0x22   :  { %240 = vmatmul.bf16.vlgmr.msra.gmra.mxu1 %v180_v34  ;;  %245 = vmatmul.bf16.vlgmr.msra.gmra.mxu3 %v181_v35 }
  0x9e   :  { %v147_v36 = vpop.f32.mrf.mxu0 }
  0x9f   :  { %v241_v38 = vpop.f32.mrf.mxu1 }
  0xa0   :  { %v242_v39 = vadd.f32 %v241_v38, %v147_v36 }
  0xa2   :  { %v255_v40 = vadd.f32 %v430_v37, %v242_v39 }
  0xa4   :  { %v259_v41 = vmul.f32 %v255_v40, %v255_v40  ;;  %v152_v42 = vpop.f32.mrf.mxu2 }
  0xa5   :  { %v246_v43 = vpop.f32.mrf.mxu3 }
  0xa6   :  { %v263_v44 = vmul.f32 %v259_v41, %v255_v40  ;;  %v247_v45 = vadd.f32 %v246_v43, %v152_v42  ;;  %v149_v46 = vpop.f32.mrf.mxu0 }
  0xa7   :  { %v243_v47 = vpop.f32.mrf.mxu1 }
  0xa8   :  { %v267_v48 = vmul.f32 0.044715, %v263_v44  ;;  %v257_v49 = vadd.f32 %v430_v37, %v247_v45  ;;  %v244_v50 = vadd.f32 %v243_v47, %v149_v46 }
  0xaa   :  { %v271_v51 = vadd.f32 %v267_v48, %v255_v40  ;;  %v261_v52 = vmul.f32 %v257_v49, %v257_v49  ;;  %v256_v53 = vadd.f32 %v430_v37, %v244_v50 }
  0xac   :  { %v275_v54 = vmul.f32 0.7978846, %v271_v51  ;;  %v265_v55 = vmul.f32 %v261_v52, %v257_v49  ;;  %v260_v56 = vmul.f32 %v256_v53, %v256_v53  ;;  %v154_v57 = vpop.f32.mrf.mxu2 }
  0xad   :  { %v248_v58 = vpop.f32.mrf.mxu3 }
  0xae   :  { %v269_v59 = vmul.f32 0.044715, %v265_v55  ;;  %v264_v60 = vmul.f32 %v260_v56, %v256_v53  ;;  %v249_v61 = vadd.f32 %v248_v58, %v154_v57  ;;  %431 = vtanh.f32 %v275_v54 }
  0xb0   :  { %v273_v62 = vadd.f32 %v269_v59, %v257_v49  ;;  %v268_v63 = vmul.f32 0.044715, %v264_v60  ;;  %v258_v0 = vadd.f32 %v430_v37, %v249_v61 }
  0xb2   :  { %v277_v1 = vmul.f32 0.7978846, %v273_v62  ;;  %v272_v2 = vadd.f32 %v268_v63, %v256_v53  ;;  %v262_v3 = vmul.f32 %v258_v0, %v258_v0 }
  0xb4   :  { %v276_v4 = vmul.f32 0.7978846, %v272_v2  ;;  %v266_v5 = vmul.f32 %v262_v3, %v258_v0  ;;  %433 = vtanh.f32 %v277_v1  ;;  %v432_v6 = vpop.eup %431 }
  0xb5   :  { %v283_v9 = vadd.f32 1.0, %v432_v6 }
  0xb6   :  { %435 = vtanh.f32 %v276_v4  ;;  %v270_v7 = vmul.f32 0.044715, %v266_v5 }
  0xb7   :  { %v287_v13 = vmul.f32 0.5, %v283_v9 }
  0xb8   :  { %v274_v8 = vadd.f32 %v270_v7, %v258_v0 }
  0xb9   :  { %v291_v17 = vmul.f32 %v287_v13, %v255_v40 }
  0xba   :  { %v278_v10 = vmul.f32 0.7978846, %v274_v8  ;;  %v434_v11 = vpop.eup %433 }
  0xbb   :  { %v285_v15 = vadd.f32 1.0, %v434_v11 }
  0xbc   :  { %v436_v12 = vpop.eup %435  ;;  %437 = vtanh.f32 %v278_v10 }
  0xbd   :  { %v284_v14 = vadd.f32 1.0, %v436_v12  ;;  %v289_v20 = vmul.f32 0.5, %v285_v15 }
  0xbf   :  { %v288_v16 = vmul.f32 0.5, %v284_v14  ;;  %v293_v24 = vmul.f32 %v289_v20, %v257_v49 }
  0xc1   :  { %v292_v18 = vmul.f32 %v288_v16, %v256_v53 }
  0xc2   :  { %v438_v19 = vpop.eup %437 }
  0xc3   :  { %v406_v21 = vpack.c.bf16 %v292_v18, %v291_v17  ;;  %v286_v22 = vadd.f32 1.0, %v438_v19 }
  0xc5   :  { %407 = vst [vmem:[%s567_s3] sm:$0xff] %v406_v21   ;;  %v290_v23 = vmul.f32 0.5, %v286_v22 }
  0xc7   :  { %v294_v25 = vmul.f32 %v290_v23, %v258_v0 }
  0xc9   :  { %v411_v26 = vpack.c.bf16 %v294_v25, %v293_v24 }
  0xcb   :  { %413 = vst [vmem:[%s567_s3 + $0x8] sm:$0xff] %v411_v26  }

// kernel: upocr_forward.11
= control target key start
LH: loop header
LB: loop body
LE: loop exit
PB: predicated region body
PF: predicated region fallthrough
CT: control target
= control target key end

     0   :  { %s1363_s1 = inlined_call_operand.vmem [shape: bf16[2,256,256], index: 1, kind: input, shape index: {}]   ;;  %s1364_s0 = inlined_call_operand.vmem [shape: bf16[4,2,2,256], index: 0, kind: input, shape index: {}]   ;;  %s1365_s2 = inlined_call_operand.vmem [shape: f32[1,256], index: 2, kind: input, shape index: {}]   ;;  %s1366_s3 = inlined_call_operand.vmem [shape: bf16[8,256], index: 3, kind: output, shape index: {}]  }
   0x1   :  { %v663_v0 = vld [vmem:[%s1363_s1 + $0x170] sm:$0xf]  ;;  %v908_v1 = vld [vmem:[%s1363_s1 + $0x174] sm:$0xf0]  ;;  %v907_v5 = vld [vmem:[%s1363_s1 + $0x174] sm:$0xf] }
   0x2   :  { %v727_v2 = vld [vmem:[%s1363_s1 + $0x1f0] sm:$0xf]  ;;  %v664_v3 = vor.u32 %v908_v1, %v663_v0  ;;  %v924_v4 = vld [vmem:[%s1363_s1 + $0x1f4] sm:$0xf0]  ;;  %v665_v6 = vld [vmem:[%s1363_s1 + $0x178] sm:$0xf0] }
   0x3   :  { %v728_v7 = vor.u32 %v924_v4, %v727_v2  ;;  %v668_v8 = vor.u32 %v907_v5, %v665_v6  ;;  %v923_v9 = vld [vmem:[%s1363_s1 + $0x1f4] sm:$0xf]  ;;  %v729_v10 = vld [vmem:[%s1363_s1 + $0x1f8] sm:$0xf0]  ;;  %v655_v11 = vld [vmem:[%s1363_s1 + $0x160] sm:$0xf] }
   0x4   :  { %262 = vmatpush.bf16.msra.mxu0 %v664_v3  ;;  %v732_v12 = vor.u32 %v923_v9, %v729_v10  ;;  %v906_v13 = vld [vmem:[%s1363_s1 + $0x164] sm:$0xf0]  ;;  %v719_v14 = vld [vmem:[%s1363_s1 + $0x1e0] sm:$0xf]  ;;  %v905_v18 = vld [vmem:[%s1363_s1 + $0x164] sm:$0xf] }
   0x5   :  { %v922_v15 = vld [vmem:[%s1363_s1 + $0x1e4] sm:$0xf0]  ;;  %275 = vmatpush.bf16.msra.mxu1 %v728_v7  ;;  %288 = vmatpush.bf16.msra.mxu2 %v668_v8  ;;  %v656_v16 = vor.u32 %v906_v13, %v655_v11  ;;  %v657_v19 = vld [vmem:[%s1363_s1 + $0x168] sm:$0xf0]  ;;  %v921_v20 = vld [vmem:[%s1363_s1 + $0x1e4] sm:$0xf] }
   0x6   :  { %v720_v17 = vor.u32 %v922_v15, %v719_v14  ;;  %301 = vmatpush.bf16.msra.mxu3 %v732_v12  ;;  %v660_v21 = vor.u32 %v905_v18, %v657_v19  ;;  %v721_v22 = vld [vmem:[%s1363_s1 + $0x1e8] sm:$0xf0]  ;;  %v647_v23 = vld [vmem:[%s1363_s1 + $0x150] sm:$0xf]  ;;  %v904_v24 = vld [vmem:[%s1363_s1 + $0x154] sm:$0xf0] }
   0x7   :  { %v724_v25 = vor.u32 %v921_v20, %v721_v22  ;;  %v711_v26 = vld [vmem:[%s1363_s1 + $0x1d0] sm:$0xf]  ;;  %v920_v27 = vld [vmem:[%s1363_s1 + $0x1d4] sm:$0xf0]  ;;  %v903_v28 = vld [vmem:[%s1363_s1 + $0x154] sm:$0xf]  ;;  %v648_v29 = vor.u32 %v904_v24, %v647_v23 }
   0x8   :  { %263 = vmatpush.bf16.msra.mxu0 %v656_v16  ;;  %v649_v30 = vld [vmem:[%s1363_s1 + $0x158] sm:$0xf0]  ;;  %v919_v31 = vld [vmem:[%s1363_s1 + $0x1d4] sm:$0xf]  ;;  %v712_v33 = vor.u32 %v920_v27, %v711_v26  ;;  %v639_v35 = vld [vmem:[%s1363_s1 + $0x140] sm:$0xf] }
   0x9   :  { %v713_v32 = vld [vmem:[%s1363_s1 + $0x1d8] sm:$0xf0]  ;;  %276 = vmatpush.bf16.msra.mxu1 %v720_v17  ;;  %289 = vmatpush.bf16.msra.mxu2 %v660_v21  ;;  %v652_v34 = vor.u32 %v903_v28, %v649_v30  ;;  %v902_v36 = vld [vmem:[%s1363_s1 + $0x144] sm:$0xf0]  ;;  %v703_v37 = vld [vmem:[%s1363_s1 + $0x1c0] sm:$0xf] }
   0xa   :  { %302 = vmatpush.bf16.msra.mxu3 %v724_v25  ;;  %v716_v38 = vor.u32 %v919_v31, %v713_v32  ;;  %v918_v39 = vld [vmem:[%s1363_s1 + $0x1c4] sm:$0xf0]  ;;  %v901_v40 = vld [vmem:[%s1363_s1 + $0x144] sm:$0xf]  ;;  %v641_v41 = vld [vmem:[%s1363_s1 + $0x148] sm:$0xf0]  ;;  %v640_v44 = vor.u32 %v902_v36, %v639_v35 }
   0xb   :  { %v917_v42 = vld [vmem:[%s1363_s1 + $0x1c4] sm:$0xf]  ;;  %v705_v43 = vld [vmem:[%s1363_s1 + $0x1c8] sm:$0xf0]  ;;  %v704_v45 = vor.u32 %v918_v39, %v703_v37  ;;  %v644_v46 = vor.u32 %v901_v40, %v641_v41  ;;  %v631_v47 = vld [vmem:[%s1363_s1 + $0x130] sm:$0xf] }
   0xc   :  { %264 = vmatpush.bf16.msra.mxu0 %v648_v29  ;;  %v900_v48 = vld [vmem:[%s1363_s1 + $0x134] sm:$0xf0]  ;;  %v695_v49 = vld [vmem:[%s1363_s1 + $0x1b0] sm:$0xf]  ;;  %v708_v50 = vor.u32 %v917_v42, %v705_v43  ;;  %v899_v52 = vld [vmem:[%s1363_s1 + $0x134] sm:$0xf] }
   0xd   :  { %277 = vmatpush.bf16.msra.mxu1 %v712_v33  ;;  %290 = vmatpush.bf16.msra.mxu2 %v652_v34  ;;  %v916_v51 = vld [vmem:[%s1363_s1 + $0x1b4] sm:$0xf0]  ;;  %v633_v53 = vld [vmem:[%s1363_s1 + $0x138] sm:$0xf0]  ;;  %v915_v54 = vld [vmem:[%s1363_s1 + $0x1b4] sm:$0xf]  ;;  %v632_v56 = vor.u32 %v900_v48, %v631_v47 }
   0xe   :  { %303 = vmatpush.bf16.msra.mxu3 %v716_v38  ;;  %v697_v55 = vld [vmem:[%s1363_s1 + $0x1b8] sm:$0xf0]  ;;  %v696_v57 = vor.u32 %v916_v51, %v695_v49  ;;  %v636_v58 = vor.u32 %v899_v52, %v633_v53  ;;  %v623_v59 = vld [vmem:[%s1363_s1 + $0x120] sm:$0xf]  ;;  %v898_v60 = vld [vmem:[%s1363_s1 + $0x124] sm:$0xf0] }
   0xf   :  { %v687_v61 = vld [vmem:[%s1363_s1 + $0x1a0] sm:$0xf]  ;;  %v700_v62 = vor.u32 %v915_v54, %v697_v55  ;;  %v914_v63 = vld [vmem:[%s1363_s1 + $0x1a4] sm:$0xf0]  ;;  %v897_v0 = vld [vmem:[%s1363_s1 + $0x124] sm:$0xf]  ;;  %v624_v4 = vor.u32 %v898_v60, %v623_v59 }
  0x10   :  { %265 = vmatpush.bf16.msra.mxu0 %v640_v44  ;;  %v625_v1 = vld [vmem:[%s1363_s1 + $0x128] sm:$0xf0]  ;;  %v913_v2 = vld [vmem:[%s1363_s1 + $0x1a4] sm:$0xf]  ;;  %v615_v5 = vld [vmem:[%s1363_s1 + $0x110] sm:$0xf]  ;;  %v688_v6 = vor.u32 %v914_v63, %v687_v61 }
  0x11   :  { %278 = vmatpush.bf16.msra.mxu1 %v704_v45  ;;  %291 = vmatpush.bf16.msra.mxu2 %v644_v46  ;;  %v689_v3 = vld [vmem:[%s1363_s1 + $0x1a8] sm:$0xf0]  ;;  %v628_v7 = vor.u32 %v897_v0, %v625_v1  ;;  %v896_v8 = vld [vmem:[%s1363_s1 + $0x114] sm:$0xf0]  ;;  %v679_v9 = vld [vmem:[%s1363_s1 + $0x190] sm:$0xf] }
  0x12   :  { %304 = vmatpush.bf16.msra.mxu3 %v708_v50  ;;  %v912_v10 = vld [vmem:[%s1363_s1 + $0x194] sm:$0xf0]  ;;  %v692_v11 = vor.u32 %v913_v2, %v689_v3  ;;  %v895_v12 = vld [vmem:[%s1363_s1 + $0x114] sm:$0xf]  ;;  %v617_v13 = vld [vmem:[%s1363_s1 + $0x118] sm:$0xf0]  ;;  %v616_v18 = vor.u32 %v896_v8, %v615_v5 }
  0x13   :  { %v911_v14 = vld [vmem:[%s1363_s1 + $0x194] sm:$0xf]  ;;  %v681_v15 = vld [vmem:[%s1363_s1 + $0x198] sm:$0xf0]  ;;  %v607_v16 = vld [vmem:[%s1363_s1 + $0x100] sm:$0xf]  ;;  %v680_v23 = vor.u32 %v912_v10, %v679_v9  ;;  %v620_v24 = vor.u32 %v895_v12, %v617_v13 }
  0x14   :  { %266 = vmatpush.bf16.msra.mxu0 %v632_v56  ;;  %v894_v17 = vld [vmem:[%s1363_s1 + $0x104] sm:$0xf0]  ;;  %v671_v19 = vld [vmem:[%s1363_s1 + $0x180] sm:$0xf]  ;;  %v893_v21 = vld [vmem:[%s1363_s1 + $0x104] sm:$0xf]  ;;  %v684_v28 = vor.u32 %v911_v14, %v681_v15 }
  0x15   :  { %279 = vmatpush.bf16.msra.mxu1 %v696_v57  ;;  %292 = vmatpush.bf16.msra.mxu2 %v636_v58  ;;  %v910_v20 = vld [vmem:[%s1363_s1 + $0x184] sm:$0xf0]  ;;  %v609_v22 = vld [vmem:[%s1363_s1 + $0x108] sm:$0xf0]  ;;  %v909_v25 = vld [vmem:[%s1363_s1 + $0x184] sm:$0xf]  ;;  %v608_v35 = vor.u32 %v894_v17, %v607_v16 }
  0x16   :  { %305 = vmatpush.bf16.msra.mxu3 %v700_v62  ;;  %v673_v26 = vld [vmem:[%s1363_s1 + $0x188] sm:$0xf0]  ;;  %v791_v27 = vld [vmem:[%s1363_s1 + $0x70] sm:$0xf]  ;;  %v876_v29 = vld [vmem:[%s1363_s1 + $0x74] sm:$0xf0]  ;;  %v672_v39 = vor.u32 %v910_v20, %v671_v19  ;;  %v612_v40 = vor.u32 %v893_v21, %v609_v22 }
  0x17   :  { %v855_v30 = vld [vmem:[%s1363_s1 + $0xf0] sm:$0xf]  ;;  %v892_v31 = vld [vmem:[%s1363_s1 + $0xf4] sm:$0xf0]  ;;  %v875_v32 = vld [vmem:[%s1363_s1 + $0x74] sm:$0xf]  ;;  %v676_v43 = vor.u32 %v909_v25, %v673_v26  ;;  %v792_v44 = vor.u32 %v876_v29, %v791_v27 }
  0x18   :  { %267 = vmatpush.bf16.msra.mxu0 %v624_v4  ;;  %v793_v33 = vld [vmem:[%s1363_s1 + $0x78] sm:$0xf0]  ;;  %v15_v34 = vld [vmem:[%s1364_s0 + $0x2] sm:$0x3]  ;;  %v891_v36 = vld [vmem:[%s1363_s1 + $0xf4] sm:$0xf]  ;;  %v856_v47 = vor.u32 %v892_v31, %v855_v30 }
  0x19   :  { %280 = vmatpush.bf16.msra.mxu1 %v688_v6  ;;  %293 = vmatpush.bf16.msra.mxu2 %v628_v7  ;;  %v17_v37 = vld [vmem:[%s1364_s0 + $0x6] sm:$0x3]  ;;  %v19_v38 = vld [vmem:[%s1364_s0 + $0xa] sm:$0x3]  ;;  %v857_v41 = vld [vmem:[%s1363_s1 + $0xf8] sm:$0xf0]  ;;  %v796_v48 = vor.u32 %v875_v32, %v793_v33 }
  0x1a   :  { %306 = vmatpush.bf16.msra.mxu3 %v692_v11  ;;  %v21_v42 = vld [vmem:[%s1364_s0 + $0xe] sm:$0x3]  ;;  %88 = vst [vmem:[#allocation1] ss:$9 sm:$0xff] %v15_v34  ;;  %v783_v45 = vld [vmem:[%s1363_s1 + $0x60] sm:$0xf]  ;;  %v860_v51 = vor.u32 %v891_v36, %v857_v41 }
  0x1b   :  { %v874_v46 = vld [vmem:[%s1363_s1 + $0x64] sm:$0xf0]  ;;  %91 = vst [vmem:[#allocation1 + $0x1] ss:$9 sm:$0xff] %v17_v37  ;;  %v847_v49 = vld [vmem:[%s1363_s1 + $0xe0] sm:$0xf] }
  0x1c   :  { %268 = vmatpush.bf16.msra.mxu0 %v616_v18  ;;  %v890_v50 = vld [vmem:[%s1363_s1 + $0xe4] sm:$0xf0]  ;;  %94 = vst [vmem:[#allocation1 + $0x2] ss:$9 sm:$0xff] %v19_v38  ;;  %v873_v52 = vld [vmem:[%s1363_s1 + $0x64] sm:$0xf]  ;;  %v784_v56 = vor.u32 %v874_v46, %v783_v45 }
  0x1d   :  { %281 = vmatpush.bf16.msra.mxu1 %v680_v23  ;;  %294 = vmatpush.bf16.msra.mxu2 %v620_v24  ;;  %v785_v53 = vld [vmem:[%s1363_s1 + $0x68] sm:$0xf0]  ;;  %97 = vst [vmem:[#allocation1 + $0x3] ss:$9 sm:$0xff] %v21_v42  ;;  %v889_v54 = vld [vmem:[%s1363_s1 + $0xe4] sm:$0xf]  ;;  %v848_v59 = vor.u32 %v890_v50, %v847_v49 }
  0x1e   :  { %307 = vmatpush.bf16.msra.mxu3 %v684_v28  ;;  %v849_v55 = vld [vmem:[%s1363_s1 + $0xe8] sm:$0xf0]  ;;  %v775_v57 = vld [vmem:[%s1363_s1 + $0x50] sm:$0xf]  ;;  %v872_v58 = vld [vmem:[%s1363_s1 + $0x54] sm:$0xf0]  ;;  %v788_v60 = vor.u32 %v873_v52, %v785_v53 }
  0x1f   :  { %v839_v61 = vld [vmem:[%s1363_s1 + $0xd0] sm:$0xf]  ;;  %v888_v62 = vld [vmem:[%s1363_s1 + $0xd4] sm:$0xf0]  ;;  %v871_v63 = vld [vmem:[%s1363_s1 + $0x54] sm:$0xf]  ;;  %v852_v0 = vor.u32 %v889_v54, %v849_v55  ;;  %v776_v7 = vor.u32 %v872_v58, %v775_v57 }
  0x20   :  { %269 = vmatpush.bf16.msra.mxu0 %v608_v35  ;;  %v777_v1 = vld [vmem:[%s1363_s1 + $0x58] sm:$0xf0]  ;;  %v887_v2 = vld [vmem:[%s1363_s1 + $0xd4] sm:$0xf]  ;;  %v14_v4 = vld [vmem:[%s1364_s0] sm:$0x3]  ;;  %v840_v13 = vor.u32 %v888_v62, %v839_v61 }
  0x21   :  { %282 = vmatpush.bf16.msra.mxu1 %v672_v39  ;;  %295 = vmatpush.bf16.msra.mxu2 %v612_v40  ;;  %v841_v3 = vld [vmem:[%s1363_s1 + $0xd8] sm:$0xf0]  ;;  %v16_v5 = vld [vmem:[%s1364_s0 + $0x4] sm:$0x3]  ;;  %v18_v6 = vld [vmem:[%s1364_s0 + $0x8] sm:$0x3]  ;;  %v780_v14 = vor.u32 %v871_v63, %v777_v1 }
  0x22   :  { %308 = vmatpush.bf16.msra.mxu3 %v676_v43  ;;  %v20_v8 = vld [vmem:[%s1364_s0 + $0xc] sm:$0x3]  ;;  %v767_v9 = vld [vmem:[%s1363_s1 + $0x40] sm:$0xf]  ;;  %v870_v10 = vld [vmem:[%s1363_s1 + $0x44] sm:$0xf0]  ;;  %v844_v17 = vor.u32 %v887_v2, %v841_v3 }
  0x23   :  { %v831_v11 = vld [vmem:[%s1363_s1 + $0xc0] sm:$0xf]  ;;  %v886_v16 = vld [vmem:[%s1363_s1 + $0xc4] sm:$0xf0]  ;;  %v869_v18 = vld [vmem:[%s1363_s1 + $0x44] sm:$0xf]  ;;  %v768_v22 = vor.u32 %v870_v10, %v767_v9 }
  0x24   :  { %489 = vmatpush.bf16.msrb.mxu0 %v792_v44  ;;  %v98_v12 = vld [vmem:[#allocation1] sm:$0xff]  ;;  %v99_v15 = vld [vmem:[#allocation1 + $0x9] sm:$0xff]  ;;  %v832_v24 = vor.u32 %v886_v16, %v831_v11  ;;  %v868_v26 = vld [vmem:[%s1363_s1 + $0x34] sm:$0xf0] }
  0x25   :  { %502 = vmatpush.bf16.msrb.mxu1 %v856_v47  ;;  %515 = vmatpush.bf16.msrb.mxu2 %v796_v48  ;;  %315 = vst [vmem:[#allocation1] ss:$9 sm:$0xff] %v14_v4  ;;  %v769_v19 = vld [vmem:[%s1363_s1 + $0x48] sm:$0xf0]  ;;  %v885_v20 = vld [vmem:[%s1363_s1 + $0xc4] sm:$0xf] }
  0x26   :  { %528 = vmatpush.bf16.msrb.mxu3 %v860_v51  ;;  %296 = vmatmul.bf16.vlgmr.msra.gmra.mxu2 %v98_v12  ;;  %318 = vst [vmem:[#allocation1 + $0x1] ss:$9 sm:$0xff] %v16_v5  ;;  %v833_v21 = vld [vmem:[%s1363_s1 + $0xc8] sm:$0xf0]  ;;  %v759_v23 = vld [vmem:[%s1363_s1 + $0x30] sm:$0xf]  ;;  %v772_v25 = vor.u32 %v869_v18, %v769_v19 }
  0x27   :  { %309 = vmatmul.bf16.vlgmr.msra.gmra.mxu3 %v99_v15  ;;  %270 = vmatmul.bf16.vlgmr.msra.gmra.mxu0 %v98_v12  ;;  %321 = vst [vmem:[#allocation1 + $0x2] ss:$9 sm:$0xff] %v18_v6  ;;  %v823_v27 = vld [vmem:[%s1363_s1 + $0xb0] sm:$0xf]  ;;  %v836_v28 = vor.u32 %v885_v20, %v833_v21  ;;  %v884_v29 = vld [vmem:[%s1363_s1 + $0xb4] sm:$0xf0]  ;;  %v760_v34 = vor.u32 %v868_v26, %v759_v23 }
  0x28   :  { %490 = vmatpush.bf16.msrb.mxu0 %v784_v56  ;;  %283 = vmatmul.bf16.vlgmr.msra.gmra.mxu1 %v99_v15  ;;  %324 = vst [vmem:[#allocation1 + $0x3] ss:$9 sm:$0xff] %v20_v8  ;;  %v867_v30 = vld [vmem:[%s1363_s1 + $0x34] sm:$0xf]  ;;  %v761_v31 = vld [vmem:[%s1363_s1 + $0x38] sm:$0xf0]  ;;  %v824_v35 = vor.u32 %v884_v29, %v823_v27 }
  0x29   :  { %503 = vmatpush.bf16.msrb.mxu1 %v848_v59  ;;  %516 = vmatpush.bf16.msrb.mxu2 %v788_v60  ;;  %v883_v32 = vld [vmem:[%s1363_s1 + $0xb4] sm:$0xf]  ;;  %v825_v33 = vld [vmem:[%s1363_s1 + $0xb8] sm:$0xf0]  ;;  %v764_v36 = vor.u32 %v867_v30, %v761_v31  ;;  %v751_v37 = vld [vmem:[%s1363_s1 + $0x20] sm:$0xf] }
  0x2a   :  { %529 = vmatpush.bf16.msrb.mxu3 %v852_v0  ;;  %v866_v38 = vld [vmem:[%s1363_s1 + $0x24] sm:$0xf0]  ;;  %v815_v39 = vld [vmem:[%s1363_s1 + $0xa0] sm:$0xf]  ;;  %v828_v40 = vor.u32 %v883_v32, %v825_v33  ;;  %v865_v42 = vld [vmem:[%s1363_s1 + $0x24] sm:$0xf] }
  0x2b   :  { %v882_v41 = vld [vmem:[%s1363_s1 + $0xa4] sm:$0xf0]  ;;  %v753_v43 = vld [vmem:[%s1363_s1 + $0x28] sm:$0xf0]  ;;  %v881_v44 = vld [vmem:[%s1363_s1 + $0xa4] sm:$0xf]  ;;  %v752_v46 = vor.u32 %v866_v38, %v751_v37 }
  0x2c   :  { %491 = vmatpush.bf16.msrb.mxu0 %v776_v7  ;;  %v817_v45 = vld [vmem:[%s1363_s1 + $0xa8] sm:$0xf0]  ;;  %v816_v47 = vor.u32 %v882_v41, %v815_v39  ;;  %v756_v48 = vor.u32 %v865_v42, %v753_v43  ;;  %v743_v49 = vld [vmem:[%s1363_s1 + $0x10] sm:$0xf]  ;;  %v864_v50 = vld [vmem:[%s1363_s1 + $0x14] sm:$0xf0] }
  0x2d   :  { %504 = vmatpush.bf16.msrb.mxu1 %v840_v13  ;;  %517 = vmatpush.bf16.msrb.mxu2 %v780_v14  ;;  %v807_v51 = vld [vmem:[%s1363_s1 + $0x90] sm:$0xf]  ;;  %v820_v52 = vor.u32 %v881_v44, %v817_v45  ;;  %v880_v53 = vld [vmem:[%s1363_s1 + $0x94] sm:$0xf0]  ;;  %v863_v54 = vld [vmem:[%s1363_s1 + $0x14] sm:$0xf]  ;;  %v744_v58 = vor.u32 %v864_v50, %v743_v49 }
  0x2e   :  { %530 = vmatpush.bf16.msrb.mxu3 %v844_v17  ;;  %v745_v55 = vld [vmem:[%s1363_s1 + $0x18] sm:$0xf0]  ;;  %v879_v56 = vld [vmem:[%s1363_s1 + $0x94] sm:$0xf]  ;;  %v808_v59 = vor.u32 %v880_v53, %v807_v51  ;;  %v735_v61 = vld [vmem:[%s1363_s1] sm:$0xf] }
  0x2f   :  { %v809_v57 = vld [vmem:[%s1363_s1 + $0x98] sm:$0xf0]  ;;  %v748_v60 = vor.u32 %v863_v54, %v745_v55  ;;  %v862_v62 = vld [vmem:[%s1363_s1 + $0x4] sm:$0xf0]  ;;  %v799_v63 = vld [vmem:[%s1363_s1 + $0x80] sm:$0xf] }
  0x30   :  { %492 = vmatpush.bf16.msrb.mxu0 %v768_v22  ;;  %v812_v0 = vor.u32 %v879_v56, %v809_v57  ;;  %v878_v1 = vld [vmem:[%s1363_s1 + $0x84] sm:$0xf0]  ;;  %v861_v2 = vld [vmem:[%s1363_s1 + $0x4] sm:$0xf]  ;;  %v737_v3 = vld [vmem:[%s1363_s1 + $0x8] sm:$0xf0]  ;;  %v736_v6 = vor.u32 %v862_v62, %v735_v61 }
  0x31   :  { %505 = vmatpush.bf16.msrb.mxu1 %v832_v24  ;;  %518 = vmatpush.bf16.msrb.mxu2 %v772_v25  ;;  %v877_v4 = vld [vmem:[%s1363_s1 + $0x84] sm:$0xf]  ;;  %v801_v5 = vld [vmem:[%s1363_s1 + $0x88] sm:$0xf0]  ;;  %v800_v7 = vor.u32 %v878_v1, %v799_v63  ;;  %v740_v8 = vor.u32 %v861_v2, %v737_v3  ;;  %v541_v20 = vld [vmem:[%s1365_s2] sm:$0x3] }
  0x32   :  { %531 = vmatpush.bf16.msrb.mxu3 %v836_v28  ;;  %v804_v9 = vor.u32 %v877_v4, %v801_v5  ;;  %v325_v10 = vld [vmem:[#allocation1] sm:$0xff]  ;;  %v326_v11 = vld [vmem:[#allocation1 + $0x9] sm:$0xff]  ;;  %v543_v25 = vperm.slane %v541_v20, 0  ;;  %v544_v33 = vperm.slane %v541_v20, 1 }
  0x34   :  { %493 = vmatpush.bf16.msrb.mxu0 %v760_v34 }
  0x35   :  { %506 = vmatpush.bf16.msrb.mxu1 %v824_v35  ;;  %519 = vmatpush.bf16.msrb.mxu2 %v764_v36 }
  0x36   :  { %532 = vmatpush.bf16.msrb.mxu3 %v828_v40 }
  0x38   :  { %494 = vmatpush.bf16.msrb.mxu0 %v752_v46 }
  0x39   :  { %507 = vmatpush.bf16.msrb.mxu1 %v816_v47  ;;  %520 = vmatpush.bf16.msrb.mxu2 %v756_v48 }
  0x3a   :  { %533 = vmatpush.bf16.msrb.mxu3 %v820_v52 }
  0x3c   :  { %495 = vmatpush.bf16.msrb.mxu0 %v744_v58 }
  0x3d   :  { %508 = vmatpush.bf16.msrb.mxu1 %v808_v59  ;;  %521 = vmatpush.bf16.msrb.mxu2 %v748_v60 }
  0x3e   :  { %534 = vmatpush.bf16.msrb.mxu3 %v812_v0 }
  0x40   :  { %496 = vmatpush.bf16.msrb.mxu0 %v736_v6 }
  0x41   :  { %509 = vmatpush.bf16.msrb.mxu1 %v800_v7  ;;  %522 = vmatpush.bf16.msrb.mxu2 %v740_v8 }
  0x42   :  { %535 = vmatpush.bf16.msrb.mxu3 %v804_v9 }
  0x43   :  { %497 = vmatmul.bf16.vlgmr.msrb.gmra.mxu0 %v325_v10 }
  0x44   :  { %510 = vmatmul.bf16.vlgmr.msrb.gmra.mxu1 %v326_v11  ;;  %523 = vmatmul.bf16.vlgmr.msrb.gmra.mxu2 %v325_v10 }
  0x45   :  { %536 = vmatmul.bf16.vlgmr.msrb.gmra.mxu3 %v326_v11 }
  0xa4   :  { %v271_v12 = vpop.f32.mrf.mxu0 }
  0xa5   :  { %v284_v13 = vpop.f32.mrf.mxu1 }
  0xa6   :  { %v285_v21 = vadd.f32 %v284_v13, %v271_v12 }
  0xa9   :  { %v297_v14 = vpop.f32.mrf.mxu2 }
  0xaa   :  { %v310_v15 = vpop.f32.mrf.mxu3 }
  0xab   :  { %v311_v28 = vadd.f32 %v310_v15, %v297_v14 }
  0xac   :  { %v273_v16 = vpop.f32.mrf.mxu0 }
  0xad   :  { %v286_v17 = vpop.f32.mrf.mxu1 }
  0xb1   :  { %v299_v18 = vpop.f32.mrf.mxu2 }
  0xb2   :  { %v312_v19 = vpop.f32.mrf.mxu3 }
  0xc0   :  { %v498_v22 = vpop.f32.mrf.mxu0 }
  0xc1   :  { %v499_v23 = vadd.f32 %v498_v22, %v285_v21  ;;  %v511_v24 = vpop.f32.mrf.mxu1 }
  0xc3   :  { %v512_v26 = vadd.f32 %v511_v24, %v499_v23 }
  0xc5   :  { %v547_v27 = vadd.f32 %v543_v25, %v512_v26 }
  0xc7   :  { %v549_v29 = vmul.f32 %v547_v27, %v547_v27  ;;  %v524_v30 = vpop.f32.mrf.mxu2 }
  0xc8   :  { %v525_v31 = vadd.f32 %v524_v30, %v311_v28  ;;  %v537_v32 = vpop.f32.mrf.mxu3  ;;  %v500_v34 = vpop.f32.mrf.mxu0 }
  0xc9   :  { %v551_v35 = vmul.f32 %v549_v29, %v547_v27  ;;  %v513_v36 = vpop.f32.mrf.mxu1 }
  0xca   :  { %v538_v37 = vadd.f32 %v537_v32, %v525_v31 }
  0xcb   :  { %v553_v38 = vmul.f32 0.044715, %v551_v35 }
  0xcc   :  { %v548_v39 = vadd.f32 %v544_v33, %v538_v37 }
  0xcd   :  { %v555_v40 = vadd.f32 %v553_v38, %v547_v27 }
  0xce   :  { %v550_v41 = vmul.f32 %v548_v39, %v548_v39 }
  0xcf   :  { %v557_v42 = vmul.f32 0.7978846, %v555_v40  ;;  %v526_v43 = vpop.f32.mrf.mxu2 }
  0xd0   :  { %v552_v44 = vmul.f32 %v550_v41, %v548_v39  ;;  %v539_v45 = vpop.f32.mrf.mxu3 }
  0xd1   :  { %925 = vtanh.f32 %v557_v42 }
  0xd2   :  { %v554_v46 = vmul.f32 0.044715, %v552_v44 }
  0xd4   :  { %v556_v47 = vadd.f32 %v554_v46, %v548_v39 }
  0xd6   :  { %v558_v48 = vmul.f32 0.7978846, %v556_v47 }
  0xd7   :  { %v926_v49 = vpop.eup %925 }
  0xd8   :  { %927 = vtanh.f32 %v558_v48  ;;  %v561_v50 = vadd.f32 1.0, %v926_v49 }
  0xda   :  { %v563_v52 = vmul.f32 0.5, %v561_v50 }
  0xdc   :  { %v565_v55 = vmul.f32 %v563_v52, %v547_v27 }
  0xde   :  { %v928_v51 = vpop.eup %927 }
  0xdf   :  { %v562_v53 = vadd.f32 1.0, %v928_v51 }
  0xe1   :  { %v564_v54 = vmul.f32 0.5, %v562_v53 }
  0xe3   :  { %v566_v56 = vmul.f32 %v564_v54, %v548_v39 }
  0xe5   :  { %v567_v57 = vpack.c.bf16 %v566_v56, %v565_v55 }
  0xe7   :  { %568 = vst [vmem:[%s1366_s3] sm:$0xff] %v567_v57 }

// kernel: upocr_forward.12
= control target key start
LH: loop header
LB: loop body
LE: loop exit
PB: predicated region body
PF: predicated region fallthrough
CT: control target
= control target key end

     0   :  { %s821_s18 = smov 0   ;;  %s823_s19 = smov 0   ;;  %s937_s0 = inlined_call_operand.vmem [shape: bf16[2,4,256], index: 0, kind: input, shape index: {}]   ;;  %s938_s1 = inlined_call_operand.vmem [shape: bf16[256,128], index: 1, kind: input, shape index: {}]   ;;  %s939_s2 = inlined_call_operand.vmem [shape: f32[1,128], index: 2, kind: input, shape index: {}]   ;;  %s940_s3 = inlined_call_operand.vmem [shape: f32[2,1,128], index: 3, kind: input, shape index: {}]   ;;  %s941_s4 = inlined_call_operand.vmem [shape: bf16[128,128], index: 4, kind: input, shape index: {}]   ;;  %s942_s5 = inlined_call_operand.vmem [shape: bf16[2,4,128], index: 5, kind: output, shape index: {}]  }
   0x1   :  { %s825_s20 = smov 0  }
   0x2 LB: > { %s27_s21 = sadd.s32 1, %s785_s19  ;;  %p614_p0 = scmp.ge.s32.totalorder %s789_s20, 1  ;;  %s789_s20 = sphi %s825_s20, %s15_s20   ;;  %s785_s19 = sphi %s823_s19, %s944_s19   ;;  %s781_s18 = sphi %s821_s18, %s943_s18  }
   0x3   : > { %p29_p1 = scmp.ge.s32.totalorder %s27_s21, 2  ;;  %p215_p2 = scmp.lt.s32.totalorder %s789_s20, 3 }
   0x5   : > { %s946_s21 = smov (%p29_p1, %s27_s21), 0  ;;  %p216_p3 = pnand %p614_p0, %p215_p2 }
   0x6   : > { %p252_p4 = scmp.lt.s32.totalorder (!%p216_p3), %s781_s18, 1 }
   0x7   : > { %219 = sbr.rel (%p216_p3) target bundleno = 318 (0x13e), region = 40 }
   0xc   : > { %v724_v0 = vld [vmem:[%s938_s1 + $0x38] sm:$0xff]  ;;  %v723_v2 = vld [vmem:[%s938_s1 + $0x30] sm:$0xff]  ;;  %s948_s18 = smov (!%p252_p4, %s781_s18), 1  ;;  %v722_v5 = vld [vmem:[%s938_s1 + $0x28] sm:$0xff] }
   0xd   : > { %v732_v1 = vld [vmem:[%s938_s1 + $0x78] sm:$0xff]  ;;  %410 = vmatpush.bf16.msra.mxu0 %v724_v0  ;;  %v731_v3 = vld [vmem:[%s938_s1 + $0x70] sm:$0xff]  ;;  %s716_s30 = sshll.u32 %s948_s18, 2  ;;  %v730_v6 = vld [vmem:[%s938_s1 + $0x68] sm:$0xff]  ;;  %s617_s12 = sshll.u32 %s948_s18, 1 }
   0xe   : > { %423 = vmatpush.bf16.msra.mxu1 %v732_v1  ;;  %s260_s8 = scalar_lea.vmem %s937_s0, %s716_s30  ;;  %v740_v4 = vld [vmem:[%s941_s4 + $0x38] sm:$0xff]  ;;  %v739_v8 = vld [vmem:[%s941_s4 + $0x30] sm:$0xff]  ;;  %v721_v9 = vld [vmem:[%s938_s1 + $0x20] sm:$0xff]  ;;  %s263_s30 = scalar_lea.vmem %s940_s3, %s948_s18 }
   0xf   : > { %v271_v7 = vld [vmem:[%s260_s8] sm:$0xf]  ;;  %506 = vmatpush.bf16.msra.mxu2 %v740_v4  ;;  %v738_v11 = vld [vmem:[%s941_s4 + $0x28] sm:$0xff]  ;;  %v720_v12 = vld [vmem:[%s938_s1 + $0x18] sm:$0xff]  ;;  %s270_s15 = scalar_lea.vmem %s942_s5, %s617_s12 }
  0x10   : > { %309 = vst [vmem:[#allocation1] ss:$4 sm:$0xff] %v271_v7  ;;  %v729_v10 = vld [vmem:[%s938_s1 + $0x60] sm:$0xff]  ;;  %v728_v13 = vld [vmem:[%s938_s1 + $0x58] sm:$0xff]  ;;  %v719_v15 = vld [vmem:[%s938_s1 + $0x10] sm:$0xff] }
  0x11   : > { %411 = vmatpush.bf16.msra.mxu0 %v723_v2  ;;  %v737_v14 = vld [vmem:[%s941_s4 + $0x20] sm:$0xff]  ;;  %v727_v16 = vld [vmem:[%s938_s1 + $0x50] sm:$0xff]  ;;  %v736_v17 = vld [vmem:[%s941_s4 + $0x18] sm:$0xff] }
  0x12   : > { %424 = vmatpush.bf16.msra.mxu1 %v731_v3  ;;  %v718_v18 = vld [vmem:[%s938_s1 + $0x8] sm:$0xff]  ;;  %v735_v20 = vld [vmem:[%s941_s4 + $0x10] sm:$0xff]  ;;  %v717_v21 = vld [vmem:[%s938_s1] sm:$0xff] }
  0x13   : > { %507 = vmatpush.bf16.msra.mxu2 %v739_v8  ;;  %v726_v19 = vld [vmem:[%s938_s1 + $0x48] sm:$0xff]  ;;  %v725_v22 = vld [vmem:[%s938_s1 + $0x40] sm:$0xff] }
  0x14   : > { %v734_v25 = vld [vmem:[%s941_s4 + $0x8] sm:$0xff]  ;;  %v733_v26 = vld [vmem:[%s941_s4] sm:$0xff] }
  0x15   : > { %412 = vmatpush.bf16.msra.mxu0 %v722_v5  ;;  %v765_v27 = vld [vmem:[%s939_s2] ss:$0 sm:$0xff] }
  0x16   : > { %425 = vmatpush.bf16.msra.mxu1 %v730_v6  ;;  %v766_v31 = vld [vmem:[%s263_s30] ss:$0 sm:$0xff] }
  0x17   : > { %508 = vmatpush.bf16.msra.mxu2 %v738_v11  ;;  %v310_v23 = vld.sshfl [vmem:[#allocation1] sm:$0xff pattern:$0x73625140]  ;;  %v311_v24 = vld.sshfl [vmem:[#allocation1 + $0x8] sm:$0xff pattern:$0x73625140] }
  0x19   : > { %413 = vmatpush.bf16.msra.mxu0 %v721_v9 }
  0x1a   : > { %426 = vmatpush.bf16.msra.mxu1 %v729_v10 }
  0x1b   : > { %509 = vmatpush.bf16.msra.mxu2 %v737_v14 }
  0x1d   : > { %414 = vmatpush.bf16.msra.mxu0 %v720_v12 }
  0x1e   : > { %427 = vmatpush.bf16.msra.mxu1 %v728_v13 }
  0x1f   : > { %510 = vmatpush.bf16.msra.mxu2 %v736_v17 }
  0x21   : > { %415 = vmatpush.bf16.msra.mxu0 %v719_v15 }
  0x22   : > { %428 = vmatpush.bf16.msra.mxu1 %v727_v16 }
  0x23   : > { %511 = vmatpush.bf16.msra.mxu2 %v735_v20 }
  0x25   : > { %416 = vmatpush.bf16.msra.mxu0 %v718_v18 }
  0x26   : > { %429 = vmatpush.bf16.msra.mxu1 %v726_v19 }
  0x27   : > { %512 = vmatpush.bf16.msra.mxu2 %v734_v25 }
  0x29   : > { %417 = vmatpush.bf16.msra.mxu0 %v717_v21 }
  0x2a   : > { %430 = vmatpush.bf16.msra.mxu1 %v725_v22 }
  0x2b   : > { %513 = vmatpush.bf16.msra.mxu2 %v733_v26 }
  0x2c   : > { %418 = vmatmul.bf16.vlgmr.msra.gmra.mxu0 %v310_v23 }
  0x2d   : > { %431 = vmatmul.bf16.vlgmr.msra.gmra.mxu1 %v311_v24 }
  0xa9   : > { %v419_v28 = vpop.f32.mrf.mxu0 }
  0xaa   : > { %v432_v29 = vpop.f32.mrf.mxu1  ;;  %v420_v30 = vadd.f32 %v765_v27, %v419_v28 }
  0xac   : > { %v433_v32 = vadd.f32 %v432_v29, %v420_v30 }
  0xae   : > { %v440_v33 = vadd.f32 %v766_v31, %v433_v32 }
  0xb0   : > { %v441_v34 = vpack.c.bf16 %v440_v33, %v440_v33 }
  0xb1   : > { %v421_v35 = vpop.f32.mrf.mxu0 }
  0xb2   : > { %v434_v36 = vpop.f32.mrf.mxu1  ;;  %514 = vmatmul.bf16.vlgmr.msra.gmra.mxu2 %v441_v34 }
 0x135   : > { %v515_v37 = vpop.f32.mrf.mxu2 }
 0x136   : > { %v519_v38 = vpack.c.bf16 %v515_v37, %v515_v37 }
 0x138   : > { %520 = vst [vmem:[%s270_s15] sm:$0x3] %v519_v38 }
 0x13d   : > { %v517_v39 = vpop.f32.mrf.mxu2 }
 0x13e PF: > { %s15_s20 = sadd.s32 1, %s789_s20   ;;  %s943_s18 = smov %s785_s19 }
 0x13f   : > { %p12_p5 = scmp.ge.s32.totalorder %s15_s20, 4   ;;  %s944_s19 = smov %s946_s21 }
 0x141   :  { %14 = sbr.rel (!%p12_p5) target bundleno = 2 (0x2), region = 73 }

// kernel: upocr_forward.13
= control target key start
LH: loop header
LB: loop body
LE: loop exit
PB: predicated region body
PF: predicated region fallthrough
CT: control target
= control target key end

     0   :  { %vm233_vm0 = vcmask 523264   ;;  %vm263_vm1 = vcmask 519168   ;;  %s460_s2 = inlined_call_operand.vmem [shape: bf16[128,64], index: 2, kind: input, shape index: {}]   ;;  %s461_s1 = inlined_call_operand.vmem [shape: bf16[4,4,64], index: 1, kind: input, shape index: {}]   ;;  %s462_s3 = inlined_call_operand.vmem [shape: f32[1,64], index: 3, kind: input, shape index: {}]   ;;  %s463_s0 = inlined_call_operand.vmem [shape: bf16[32,128], index: 0, kind: input, shape index: {}]   ;;  %s464_s4 = inlined_call_operand.vmem [shape: bf16[64,64], index: 4, kind: input, shape index: {}]   ;;  %s465_s5 = inlined_call_operand.vmem [shape: bf16[32,64], index: 5, kind: output, shape index: {}]  }
   0x1   :  { %v339_v0 = vld [vmem:[%s460_s2 + $0x38] sm:$0xff]  ;;  %v338_v1 = vld [vmem:[%s460_s2 + $0x30] sm:$0xff]  ;;  %v41_v2 = vld [vmem:[%s461_s1] sm:$0x3] }
   0x2   :  { %136 = vmatpush.bf16.msra.mxu0 %v339_v0  ;;  %344 = vmatpush.bf16.msra.mxu2 %v339_v0  ;;  %v45_v3 = vunpack.c.l.bf16 %v41_v2  ;;  %v337_v4 = vld [vmem:[%s460_s2 + $0x28] sm:$0xff]  ;;  %v336_v5 = vld [vmem:[%s460_s2 + $0x20] sm:$0xff]  ;;  %v335_v6 = vld [vmem:[%s460_s2 + $0x18] sm:$0xff] }
   0x3   :  { %v334_v7 = vld [vmem:[%s460_s2 + $0x10] sm:$0xff]  ;;  %v333_v8 = vld [vmem:[%s460_s2 + $0x8] sm:$0xff]  ;;  %v332_v9 = vld [vmem:[%s460_s2] sm:$0xff] }
   0x4   :  { %113 = vst [vmem:[#allocation1] ss:$2 sm:$0xff] %v45_v3  ;;  %v330_v10 = vld [vmem:[%s463_s0] sm:$0xff]  ;;  %v331_v11 = vld [vmem:[%s463_s0 + $0x8] sm:$0xff]  ;;  %v343_v18 = vld [vmem:[%s464_s4 + $0x18] sm:$0xff] }
   0x5   :  { %115 = vst [vmem:[#allocation1 + $0x1] ss:$2 sm:$0xff] %v45_v3  ;;  %v43_v12 = vld [vmem:[%s461_s1 + $0x4] sm:$0x3]  ;;  %v42_v14 = vld [vmem:[%s461_s1 + $0x2] sm:$0x3]  ;;  %244 = vmatpush.bf16.msra.mxu1 %v343_v18 }
   0x6   :  { %137 = vmatpush.bf16.msra.mxu0 %v338_v1  ;;  %345 = vmatpush.bf16.msra.mxu2 %v338_v1  ;;  %v47_v13 = vunpack.c.l.bf16 %v43_v12  ;;  %v46_v15 = vunpack.c.l.bf16 %v42_v14  ;;  %v44_v16 = vld [vmem:[%s461_s1 + $0x6] sm:$0x3]  ;;  %v342_v19 = vld [vmem:[%s464_s4 + $0x10] sm:$0xff]  ;;  %v341_v20 = vld [vmem:[%s464_s4 + $0x8] sm:$0xff] }
   0x7   :  { %v48_v17 = vunpack.c.l.bf16 %v44_v16  ;;  %v352_v22 = vld [vmem:[%s462_s3] ss:$0 sm:$0xff] }
   0x8   :  { %121 = vst [vmem:[#allocation1 + $0x20] ss:$2 sm:$0xff] %v47_v13  ;;  %v340_v23 = vld [vmem:[%s464_s4] sm:$0xff] }
   0x9   :  { %123 = vst [vmem:[#allocation1 + $0x21] ss:$2 sm:$0xff] %v47_v13  ;;  %245 = vmatpush.bf16.msra.mxu1 %v342_v19 }
   0xa   :  { %138 = vmatpush.bf16.msra.mxu0 %v337_v4  ;;  %346 = vmatpush.bf16.msra.mxu2 %v337_v4  ;;  %117 = vst [vmem:[#allocation1 + $0x10] ss:$2 sm:$0xff] %v46_v15 }
   0xb   :  { %119 = vst [vmem:[#allocation1 + $0x11] ss:$2 sm:$0xff] %v46_v15 }
   0xc   :  { %125 = vst [vmem:[#allocation1 + $0x30] ss:$2 sm:$0xff] %v48_v17  ;;  %v128_v21 = vld.sshfl [vmem:[#allocation1] sm:$0xff pattern:$0x75316420] }
   0xd   :  { %127 = vst [vmem:[#allocation1 + $0x31] ss:$2 sm:$0xff] %v48_v17  ;;  %246 = vmatpush.bf16.msra.mxu1 %v341_v20 }
   0xe   :  { %139 = vmatpush.bf16.msra.mxu0 %v336_v5  ;;  %347 = vmatpush.bf16.msra.mxu2 %v336_v5 }
  0x10   :  { %v130_v27 = vld.sshfl [vmem:[#allocation1 + $0x20] sm:$0xff pattern:$0x75316420] }
  0x11   :  { %247 = vmatpush.bf16.msra.mxu1 %v340_v23 }
  0x12   :  { %140 = vmatpush.bf16.msra.mxu0 %v335_v6  ;;  %348 = vmatpush.bf16.msra.mxu2 %v335_v6  ;;  %v129_v30 = vld.sshfl [vmem:[#allocation1 + $0x10] sm:$0xff pattern:$0x75316420] }
  0x14   :  { %v131_v39 = vld.sshfl [vmem:[#allocation1 + $0x30] sm:$0xff pattern:$0x75316420] }
  0x16   :  { %141 = vmatpush.bf16.msra.mxu0 %v334_v7  ;;  %349 = vmatpush.bf16.msra.mxu2 %v334_v7 }
  0x1a   :  { %142 = vmatpush.bf16.msra.mxu0 %v333_v8  ;;  %350 = vmatpush.bf16.msra.mxu2 %v333_v8 }
  0x1e   :  { %143 = vmatpush.bf16.msra.mxu0 %v332_v9  ;;  %351 = vmatpush.bf16.msra.mxu2 %v332_v9 }
  0x21   :  { %144 = vmatmul.bf16.vlgmr.msra.gmra.mxu0 %v330_v10  ;;  %149 = vmatmul.bf16.vlgmr.msra.gmra.mxu2 %v331_v11 }
  0x9e   :  { %v145_v24 = vpop.f32.mrf.mxu0 }
  0x9f   :  { %v146_v25 = vadd.f32 %v145_v24, %v128_v21 }
  0xa1   :  { %v159_v26 = vadd.f32 %v352_v22, %v146_v25 }
  0xa3   :  { %v163_v28 = vmul.f32 %v159_v26, %v159_v26 }
  0xa4   :  { %v150_v29 = vpop.f32.mrf.mxu2 }
  0xa5   :  { %v167_v31 = vmul.f32 %v163_v28, %v159_v26  ;;  %v151_v32 = vadd.f32 %v150_v29, %v130_v27 }
  0xa6   :  { %v147_v33 = vpop.f32.mrf.mxu0 }
  0xa7   :  { %v171_v34 = vmul.f32 0.044715, %v167_v31  ;;  %v161_v35 = vadd.f32 %v352_v22, %v151_v32  ;;  %v148_v36 = vadd.f32 %v147_v33, %v129_v30 }
  0xa9   :  { %v175_v37 = vadd.f32 %v171_v34, %v159_v26  ;;  %v160_v38 = vadd.f32 %v352_v22, %v148_v36  ;;  %v165_v40 = vmul.f32 %v161_v35, %v161_v35 }
  0xab   :  { %v164_v41 = vmul.f32 %v160_v38, %v160_v38  ;;  %v179_v42 = vmul.f32 0.7978846, %v175_v37  ;;  %v169_v46 = vmul.f32 %v165_v40, %v161_v35 }
  0xac   :  { %v152_v43 = vpop.f32.mrf.mxu2 }
  0xad   :  { %v168_v44 = vmul.f32 %v164_v41, %v160_v38  ;;  %v153_v45 = vadd.f32 %v152_v43, %v131_v39  ;;  %353 = vtanh.f32 %v179_v42  ;;  %v173_v51 = vmul.f32 0.044715, %v169_v46 }
  0xaf   :  { %v172_v47 = vmul.f32 0.044715, %v168_v44  ;;  %v162_v48 = vadd.f32 %v352_v22, %v153_v45  ;;  %v177_v56 = vadd.f32 %v173_v51, %v161_v35 }
  0xb1   :  { %v176_v49 = vadd.f32 %v172_v47, %v160_v38  ;;  %v166_v50 = vmul.f32 %v162_v48, %v162_v48  ;;  %v181_v61 = vmul.f32 0.7978846, %v177_v56 }
  0xb3   :  { %v170_v52 = vmul.f32 %v166_v50, %v162_v48  ;;  %v180_v53 = vmul.f32 0.7978846, %v176_v49  ;;  %v354_v54 = vpop.eup %353 }
  0xb4   :  { %v187_v58 = vadd.f32 1.0, %v354_v54 }
  0xb5   :  { %v174_v55 = vmul.f32 0.044715, %v170_v52  ;;  %355 = vtanh.f32 %v180_v53 }
  0xb6   :  { %v191_v63 = vmul.f32 0.5, %v187_v58 }
  0xb7   :  { %v178_v57 = vadd.f32 %v174_v55, %v162_v48 }
  0xb8   :  { %v195_v1 = vmul.f32 %v191_v63, %v159_v26 }
  0xb9   :  { %v182_v59 = vmul.f32 0.7978846, %v178_v57 }
  0xbb   :  { %v356_v60 = vpop.eup %355  ;;  %357 = vtanh.f32 %v182_v59 }
  0xbc   :  { %v188_v62 = vadd.f32 1.0, %v356_v60  ;;  %359 = vtanh.f32 %v181_v61 }
  0xbe   :  { %v192_v0 = vmul.f32 0.5, %v188_v62 }
  0xc0   :  { %v196_v2 = vmul.f32 %v192_v0, %v160_v38 }
  0xc1   :  { %v358_v4 = vpop.eup %357 }
  0xc2   :  { %v199_v3 = vpack.c.bf16 %v196_v2, %v195_v1  ;;  %v360_v5 = vpop.eup %359  ;;  %v190_v6 = vadd.f32 1.0, %v358_v4 }
  0xc3   :  { %v189_v7 = vadd.f32 1.0, %v360_v5 }
  0xc4   :  { %328 = vmatmul.msk.bf16.vlgmr.msra.gmra.mxu1 %vm233_vm0, %v199_v3  ;;  %v194_v8 = vmul.f32 0.5, %v190_v6 }
  0xc5   :  { %v193_v9 = vmul.f32 0.5, %v189_v7 }
  0xc6   :  { %v198_v10 = vmul.f32 %v194_v8, %v162_v48 }
  0xc7   :  { %v197_v11 = vmul.f32 %v193_v9, %v161_v35 }
  0xc9   :  { %v200_v12 = vpack.c.bf16 %v198_v10, %v197_v11 }
  0xd4   :  { %329 = vmatmul.msk.bf16.gmra.mxu1 %vm233_vm0, %v200_v12 }
 0x141   :  { %v249_v13 = vpop.f32.mrf.mxu1 }
 0x142   :  { %v259_v14 = vpack.c.bf16 %v249_v13, %v249_v13 }
 0x144   :  { %264 = vst.msk [vmem:[%s465_s5] sm:$0xf] %vm263_vm1, %v259_v14 }
 0x149   :  { %v251_v15 = vpop.f32.mrf.mxu1 }
 0x14a   :  { %v260_v16 = vpack.c.bf16 %v251_v15, %v251_v15 }
 0x14c   :  { %265 = vst.msk [vmem:[%s465_s5 + $0x4] sm:$0xf] %vm263_vm1, %v260_v16 }
 0x151   :  { %v254_v17 = vpop.f32.mrf.mxu1 }
 0x152   :  { %v261_v18 = vpack.c.bf16 %v254_v17, %v254_v17 }
 0x154   :  { %266 = vst.msk [vmem:[%s465_s5 + $0x8] sm:$0xf] %vm263_vm1, %v261_v18 }
 0x159   :  { %v256_v19 = vpop.f32.mrf.mxu1 }
 0x15a   :  { %v262_v20 = vpack.c.bf16 %v256_v19, %v256_v19 }
 0x15c   :  { %267 = vst.msk [vmem:[%s465_s5 + $0xc] sm:$0xf] %vm263_vm1, %v262_v20 }

// kernel: upocr_forward.14
= control target key start
LH: loop header
LB: loop body
LE: loop exit
PB: predicated region body
PF: predicated region fallthrough
CT: control target
= control target key end

     0   :  { %vm125_vm0 = vcmask 523264   ;;  %vm387_vm1 = vcmask 261120   ;;  %vm477_vm2 = vcmask 257024   ;;  %s938_s2 = inlined_call_operand.vmem [shape: bf16[64,32], index: 2, kind: input, shape index: {}]   ;;  %s939_s3 = inlined_call_operand.vmem [shape: f32[1,32], index: 3, kind: input, shape index: {}]   ;;  %s940_s0 = inlined_call_operand.vmem [shape: bf16[128,64], index: 0, kind: input, shape index: {}]   ;;  %s941_s1 = inlined_call_operand.vmem [shape: bf16[8,8,32], index: 1, kind: input, shape index: {}]   ;;  %s942_s4 = inlined_call_operand.vmem [shape: bf16[32,32], index: 4, kind: input, shape index: {}]   ;;  %s943_s5 = inlined_call_operand.vmem [shape: bf16[128,32], index: 5, kind: output, shape index: {}]  }
   0x1   :  { %v581_v0 = vld [vmem:[%s938_s2 + $0x18] sm:$0xff]  ;;  %v580_v1 = vld [vmem:[%s938_s2 + $0x10] sm:$0xff]  ;;  %v579_v2 = vld [vmem:[%s938_s2 + $0x8] sm:$0xff] }
   0x2   :  { %154 = vmatpush.bf16.msra.mxu0 %v581_v0  ;;  %603 = vmatpush.bf16.msra.mxu2 %v581_v0  ;;  %v578_v3 = vld [vmem:[%s938_s2] sm:$0xff]  ;;  %v571_v6 = vld [vmem:[%s940_s0 + $0x8] sm:$0xff]  ;;  %v572_v8 = vld [vmem:[%s940_s0 + $0x10] sm:$0xff] }
   0x3   :  { %v570_v4 = vld [vmem:[%s940_s0] sm:$0xff]  ;;  %v575_v7 = vld [vmem:[%s940_s0 + $0x28] sm:$0xff]  ;;  %v576_v9 = vld [vmem:[%s940_s0 + $0x30] sm:$0xff] }
   0x4   :  { %v574_v5 = vld [vmem:[%s940_s0 + $0x20] sm:$0xff]  ;;  %v573_v10 = vld [vmem:[%s940_s0 + $0x18] sm:$0xff]  ;;  %v583_v14 = vld [vmem:[%s942_s4 + $0x8] sm:$0xff] }
   0x5   :  { %v577_v11 = vld [vmem:[%s940_s0 + $0x38] sm:$0xff]  ;;  %v585_v12 = vld [vmem:[%s941_s1] sm:$0xff]   ;;  %418 = vmatpush.bf16.msra.mxu1 %v583_v14  ;;  %607 = vmatpush.bf16.msra.mxu3 %v583_v14  ;;  %v722_v17 = vld [vmem:[%s941_s1 + $0x10] sm:$0xff]  }
   0x6   :  { %155 = vmatpush.bf16.msra.mxu0 %v580_v1  ;;  %604 = vmatpush.bf16.msra.mxu2 %v580_v1  ;;  %v586_v13 = vunpack.c.l.bf16 %v585_v12  ;;  %v717_v15 = vld [vmem:[%s939_s3] ss:$0 sm:$0xff]  ;;  %v594_v21 = vunpack.c.l.bf16 %v722_v17  ;;  %v587_v35 = vunpack.c.h.bf16 %v585_v12  ;;  %v595_v46 = vunpack.c.h.bf16 %v722_v17  ;;  %v769_v0 = vld [vmem:[%s941_s1 + $0x8] sm:$0xff]  }
   0x7   :  { %v582_v19 = vld [vmem:[%s942_s4] sm:$0xff] }
   0x9   :  { %419 = vmatpush.bf16.msra.mxu1 %v582_v19  ;;  %608 = vmatpush.bf16.msra.mxu3 %v582_v19  ;;  %v785_v19 = vld [vmem:[%s941_s1 + $0x18] sm:$0xff]  }
   0xa   :  { %156 = vmatpush.bf16.msra.mxu0 %v579_v2  ;;  %605 = vmatpush.bf16.msra.mxu2 %v579_v2 }
   0xe   :  { %157 = vmatpush.bf16.msra.mxu0 %v578_v3  ;;  %606 = vmatpush.bf16.msra.mxu2 %v578_v3 }
  0x11   :  { %546 = vmatmul.msk.bf16.vlgmr.msra.gmra.mxu0 %vm125_vm0, %v570_v4  ;;  %550 = vmatmul.msk.bf16.vlgmr.msra.gmra.mxu2 %vm125_vm0, %v574_v5 }
  0x21   :  { %547 = vmatmul.msk.bf16.gmra.mxu0 %vm125_vm0, %v571_v6  ;;  %551 = vmatmul.msk.bf16.gmra.mxu2 %vm125_vm0, %v575_v7  ;;  %v590_v7 = vunpack.c.l.bf16 %v769_v0 }
  0x31   :  { %548 = vmatmul.msk.bf16.gmra.mxu0 %vm125_vm0, %v572_v8  ;;  %552 = vmatmul.msk.bf16.gmra.mxu2 %vm125_vm0, %v576_v9 }
  0x41   :  { %549 = vmatmul.msk.bf16.gmra.mxu0 %vm125_vm0, %v573_v10  ;;  %553 = vmatmul.msk.bf16.gmra.mxu2 %vm125_vm0, %v577_v11 }
  0x8e   :  { %v159_v16 = vpop.f32.mrf.mxu0 }
  0x8f   :  { %v160_v18 = vadd.f32 %v586_v13, %v159_v16 }
  0x91   :  { %v728_v20 = vadd.f32 %v717_v15, %v160_v18 }
  0x93   :  { %v219_v22 = vmul.f32 %v728_v20, %v728_v20 }
  0x94   :  { %v179_v23 = vpop.f32.mrf.mxu2 }
  0x95   :  { %v235_v24 = vmul.f32 %v219_v22, %v728_v20  ;;  %v180_v25 = vadd.f32 %v594_v21, %v179_v23 }
  0x96   :  { %v161_v26 = vpop.f32.mrf.mxu0 }
  0x97   :  { %v251_v27 = vmul.f32 0.044715, %v235_v24  ;;  %v735_v28 = vadd.f32 %v717_v15, %v180_v25  ;;  %v162_v29 = vadd.f32 %v586_v13, %v161_v26 }
  0x99   :  { %v267_v30 = vadd.f32 %v251_v27, %v728_v20  ;;  %v227_v31 = vmul.f32 %v735_v28, %v735_v28  ;;  %v741_v32 = vadd.f32 %v717_v15, %v162_v29  ;;  %v598_v29 = vunpack.c.l.bf16 %v785_v19 }
  0x9b   :  { %v243_v33 = vmul.f32 %v227_v31, %v735_v28  ;;  %v220_v34 = vmul.f32 %v741_v32, %v741_v32  ;;  %v283_v36 = vmul.f32 0.7978846, %v267_v30 }
  0x9c   :  { %v181_v37 = vpop.f32.mrf.mxu2 }
  0x9d   :  { %v259_v38 = vmul.f32 0.044715, %v243_v33  ;;  %v236_v39 = vmul.f32 %v220_v34, %v741_v32  ;;  %v182_v40 = vadd.f32 %v594_v21, %v181_v37  ;;  %610 = vtanh.f32 %v283_v36 }
  0x9e   :  { %v164_v41 = vpop.f32.mrf.mxu0 }
  0x9f   :  { %v275_v42 = vadd.f32 %v259_v38, %v735_v28  ;;  %v252_v43 = vmul.f32 0.044715, %v236_v39  ;;  %v749_v44 = vadd.f32 %v717_v15, %v182_v40  ;;  %v165_v45 = vadd.f32 %v587_v35, %v164_v41 }
  0xa1   :  { %v268_v47 = vadd.f32 %v252_v43, %v741_v32  ;;  %v228_v48 = vmul.f32 %v749_v44, %v749_v44  ;;  %v756_v49 = vadd.f32 %v717_v15, %v165_v45  ;;  %v291_v50 = vmul.f32 0.7978846, %v275_v42 }
  0xa3   :  { %v244_v51 = vmul.f32 %v228_v48, %v749_v44  ;;  %v221_v52 = vmul.f32 %v756_v49, %v756_v49  ;;  %v284_v53 = vmul.f32 0.7978846, %v268_v47  ;;  %v611_v54 = vpop.eup %610  ;;  %612 = vtanh.f32 %v291_v50 }
  0xa4   :  { %v184_v55 = vpop.f32.mrf.mxu2  ;;  %v315_v1 = vadd.f32 1.0, %v611_v54 }
  0xa5   :  { %v260_v56 = vmul.f32 0.044715, %v244_v51  ;;  %v237_v57 = vmul.f32 %v221_v52, %v756_v49  ;;  %v185_v58 = vadd.f32 %v595_v46, %v184_v55  ;;  %614 = vtanh.f32 %v284_v53 }
  0xa6   :  { %v166_v59 = vpop.f32.mrf.mxu0  ;;  %v331_v14 = vmul.f32 0.5, %v315_v1 }
  0xa7   :  { %v276_v60 = vadd.f32 %v260_v56, %v749_v44  ;;  %v253_v61 = vmul.f32 0.044715, %v237_v57  ;;  %v764_v62 = vadd.f32 %v717_v15, %v185_v58  ;;  %v167_v63 = vadd.f32 %v587_v35, %v166_v59 }
  0xa8   :  { %v347_v30 = vmul.f32 %v331_v14, %v728_v20 }
  0xa9   :  { %v269_v2 = vadd.f32 %v253_v61, %v756_v49  ;;  %v229_v3 = vmul.f32 %v764_v62, %v764_v62  ;;  %v775_v4 = vadd.f32 %v717_v15, %v167_v63  ;;  %v292_v5 = vmul.f32 0.7978846, %v276_v60  ;;  %v613_v6 = vpop.eup %612 }
  0xaa   :  { %v323_v23 = vadd.f32 1.0, %v613_v6  ;;  %v591_v63 = vunpack.c.h.bf16 %v769_v0 }
  0xab   :  { %v615_v8 = vpop.eup %614  ;;  %v245_v9 = vmul.f32 %v229_v3, %v764_v62  ;;  %v222_v10 = vmul.f32 %v775_v4, %v775_v4  ;;  %v285_v11 = vmul.f32 0.7978846, %v269_v2  ;;  %616 = vtanh.f32 %v292_v5 }
  0xac   :  { %v186_v12 = vpop.f32.mrf.mxu2  ;;  %v316_v13 = vadd.f32 1.0, %v615_v8  ;;  %v339_v40 = vmul.f32 0.5, %v323_v23 }
  0xad   :  { %v261_v16 = vmul.f32 0.044715, %v245_v9  ;;  %v238_v17 = vmul.f32 %v222_v10, %v775_v4  ;;  %v187_v18 = vadd.f32 %v595_v46, %v186_v12  ;;  %618 = vtanh.f32 %v285_v11 }
  0xae   :  { %v169_v21 = vpop.f32.mrf.mxu0  ;;  %v332_v22 = vmul.f32 0.5, %v316_v13  ;;  %v806_v51 = vmul.f32 %v339_v40, %v735_v28 }
  0xaf   :  { %v277_v24 = vadd.f32 %v261_v16, %v764_v62  ;;  %v254_v25 = vmul.f32 0.044715, %v238_v17  ;;  %v789_v26 = vadd.f32 %v717_v15, %v187_v18  ;;  %v170_v27 = vadd.f32 %v590_v7, %v169_v21 }
  0xb0   :  { %v348_v31 = vmul.f32 %v332_v22, %v741_v32  ;;  %v599_v21 = vunpack.c.h.bf16 %v785_v19 }
  0xb1   :  { %v617_v33 = vpop.eup %616  ;;  %v270_v34 = vadd.f32 %v254_v25, %v775_v4  ;;  %v230_v35 = vmul.f32 %v789_v26, %v789_v26  ;;  %v798_v36 = vadd.f32 %v717_v15, %v170_v27  ;;  %v293_v37 = vmul.f32 0.7978846, %v277_v24 }
  0xb2   :  { %v363_v38 = vpack.c.bf16 %v348_v31, %v347_v30  ;;  %v324_v39 = vadd.f32 1.0, %v617_v33 }
  0xb3   :  { %v246_v41 = vmul.f32 %v230_v35, %v789_v26  ;;  %v223_v20 = vmul.f32 %v798_v36, %v798_v36  ;;  %v286_v32 = vmul.f32 0.7978846, %v270_v34  ;;  %v619_v42 = vpop.eup %618  ;;  %620 = vtanh.f32 %v293_v37 }
  0xb4   :  { %v189_v43 = vpop.f32.mrf.mxu2  ;;  %562 = vmatmul.msk.bf16.vlgmr.msra.gmra.mxu1 %vm387_vm1, %v363_v38  ;;  %v340_v45 = vmul.f32 0.5, %v324_v39  ;;  %v317_v57 = vadd.f32 1.0, %v619_v42 }
  0xb5   :  { %v262_v46 = vmul.f32 0.044715, %v246_v41  ;;  %v239_v47 = vmul.f32 %v223_v20, %v798_v36  ;;  %v190_v48 = vadd.f32 %v598_v29, %v189_v43  ;;  %622 = vtanh.f32 %v286_v32 }
  0xb6   :  { %v171_v50 = vpop.f32.mrf.mxu0  ;;  %v809_v52 = vmul.f32 %v340_v45, %v749_v44  ;;  %v333_v8 = vmul.f32 0.5, %v317_v57 }
  0xb7   :  { %v278_v53 = vadd.f32 %v262_v46, %v789_v26  ;;  %v255_v54 = vmul.f32 0.044715, %v239_v47  ;;  %v813_v55 = vadd.f32 %v717_v15, %v190_v48  ;;  %v172_v56 = vadd.f32 %v590_v7, %v171_v50 }
  0xb8   :  { %v367_v58 = vpack.c.bf16 %v809_v52, %v806_v51  ;;  %v349_v22 = vmul.f32 %v333_v8, %v756_v49 }
  0xb9   :  { %v271_v59 = vadd.f32 %v255_v54, %v798_v36  ;;  %v231_v28 = vmul.f32 %v813_v55, %v813_v55  ;;  %v821_v60 = vadd.f32 %v717_v15, %v172_v56  ;;  %v294_v44 = vmul.f32 0.7978846, %v278_v53  ;;  %v621_v61 = vpop.eup %620 }
  0xba   :  { %v325_v14 = vadd.f32 1.0, %v621_v61 }
  0xbb   :  { %v623_v1 = vpop.eup %622  ;;  %v247_v2 = vmul.f32 %v231_v28, %v813_v55  ;;  %v224_v3 = vmul.f32 %v821_v60, %v821_v60  ;;  %624 = vtanh.f32 %v294_v44  ;;  %v287_v5 = vmul.f32 0.7978846, %v271_v59 }
  0xbc   :  { %v191_v6 = vpop.f32.mrf.mxu2  ;;  %v318_v7 = vadd.f32 1.0, %v623_v1  ;;  %v341_v34 = vmul.f32 0.5, %v325_v14 }
  0xbd   :  { %v263_v9 = vmul.f32 0.044715, %v247_v2  ;;  %v240_v10 = vmul.f32 %v224_v3, %v821_v60  ;;  %v192_v11 = vadd.f32 %v598_v29, %v191_v6  ;;  %626 = vtanh.f32 %v287_v5 }
  0xbe   :  { %v174_v12 = vpop.f32.mrf.mxu0  ;;  %v334_v13 = vmul.f32 0.5, %v318_v7  ;;  %v357_v32 = vmul.f32 %v341_v34, %v764_v62 }
  0xbf   :  { %v279_v0 = vadd.f32 %v263_v9, %v813_v55  ;;  %v256_v16 = vmul.f32 0.044715, %v240_v10  ;;  %v830_v17 = vadd.f32 %v717_v15, %v192_v11  ;;  %v175_v18 = vadd.f32 %v591_v63, %v174_v12 }
  0xc0   :  { %v350_v23 = vmul.f32 %v334_v13, %v775_v4 }
  0xc1   :  { %v625_v24 = vpop.eup %624  ;;  %v272_v25 = vadd.f32 %v256_v16, %v821_v60  ;;  %v232_v27 = vmul.f32 %v830_v17, %v830_v17  ;;  %v839_v29 = vadd.f32 %v717_v15, %v175_v18  ;;  %v295_v30 = vmul.f32 0.7978846, %v279_v0 }
  0xc2   :  { %v364_v31 = vpack.c.bf16 %v350_v23, %v349_v22  ;;  %v326_v33 = vadd.f32 1.0, %v625_v24 }
  0xc3   :  { %v248_v35 = vmul.f32 %v232_v27, %v830_v17  ;;  %v225_v49 = vmul.f32 %v839_v29, %v839_v29  ;;  %v288_v19 = vmul.f32 0.7978846, %v272_v25  ;;  %v627_v4 = vpop.eup %626  ;;  %628 = vtanh.f32 %v295_v30 }
  0xc4   :  { %v194_v37 = vpop.f32.mrf.mxu2  ;;  %563 = vmatmul.msk.bf16.gmra.mxu1 %vm387_vm1, %v364_v31  ;;  %v342_v38 = vmul.f32 0.5, %v326_v33  ;;  %v319_v50 = vadd.f32 1.0, %v627_v4 }
  0xc5   :  { %v264_v39 = vmul.f32 0.044715, %v248_v35  ;;  %v241_v40 = vmul.f32 %v225_v49, %v839_v29  ;;  %v195_v41 = vadd.f32 %v599_v21, %v194_v37  ;;  %630 = vtanh.f32 %v288_v19 }
  0xc6   :  { %v176_v20 = vpop.f32.mrf.mxu0  ;;  %v358_v42 = vmul.f32 %v342_v38, %v789_v26  ;;  %v335_v1 = vmul.f32 0.5, %v319_v50 }
  0xc7   :  { %v280_v43 = vadd.f32 %v264_v39, %v830_v17  ;;  %v257_v45 = vmul.f32 0.044715, %v241_v40  ;;  %v850_v46 = vadd.f32 %v717_v15, %v195_v41  ;;  %v177_v47 = vadd.f32 %v591_v63, %v176_v20 }
  0xc8   :  { %v368_v48 = vpack.c.bf16 %v358_v42, %v357_v32  ;;  %v351_v11 = vmul.f32 %v335_v1, %v798_v36 }
  0xc9   :  { %v273_v53 = vadd.f32 %v257_v45, %v839_v29  ;;  %v233_v54 = vmul.f32 %v850_v46, %v850_v46  ;;  %v210_v56 = vadd.f32 %v717_v15, %v177_v47  ;;  %v296_v57 = vmul.f32 0.7978846, %v280_v43  ;;  %v629_v62 = vpop.eup %628 }
  0xca   :  { %567 = vmatmul.msk.bf16.vlgmr.msra.gmra.mxu3 %vm387_vm1, %v368_v48  ;;  %v327_v7 = vadd.f32 1.0, %v629_v62 }
  0xcb   :  { %v631_v26 = vpop.eup %630  ;;  %v249_v59 = vmul.f32 %v233_v54, %v850_v46  ;;  %v226_v28 = vmul.f32 %v210_v56, %v210_v56  ;;  %632 = vtanh.f32 %v296_v57  ;;  %v289_v44 = vmul.f32 0.7978846, %v273_v53 }
  0xcc   :  { %v196_v61 = vpop.f32.mrf.mxu2  ;;  %v320_v63 = vadd.f32 1.0, %v631_v26  ;;  %v343_v23 = vmul.f32 0.5, %v327_v7 }
  0xcd   :  { %v265_v2 = vmul.f32 0.044715, %v249_v59  ;;  %v242_v3 = vmul.f32 %v226_v28, %v210_v56  ;;  %v197_v5 = vadd.f32 %v599_v21, %v196_v61  ;;  %634 = vtanh.f32 %v289_v44 }
  0xce   :  { %v336_v6 = vmul.f32 0.5, %v320_v63  ;;  %v359_v36 = vmul.f32 %v343_v23, %v813_v55 }
  0xcf   :  { %v281_v8 = vadd.f32 %v265_v2, %v850_v46  ;;  %v258_v9 = vmul.f32 0.044715, %v242_v3  ;;  %v218_v10 = vadd.f32 %v717_v15, %v197_v5 }
  0xd0   :  { %v352_v12 = vmul.f32 %v336_v6, %v821_v60 }
  0xd1   :  { %v633_v13 = vpop.eup %632  ;;  %v274_v14 = vadd.f32 %v258_v9, %v210_v56  ;;  %v234_v0 = vmul.f32 %v218_v10, %v218_v10  ;;  %v297_v16 = vmul.f32 0.7978846, %v281_v8 }
  0xd2   :  { %v365_v18 = vpack.c.bf16 %v352_v12, %v351_v11  ;;  %v328_v22 = vadd.f32 1.0, %v633_v13 }
  0xd3   :  { %v250_v21 = vmul.f32 %v234_v0, %v218_v10  ;;  %v290_v24 = vmul.f32 0.7978846, %v274_v14  ;;  %636 = vtanh.f32 %v297_v16  ;;  %v635_v27 = vpop.eup %634 }
  0xd4   :  { %564 = vmatmul.msk.bf16.gmra.mxu1 %vm387_vm1, %v365_v18  ;;  %v344_v25 = vmul.f32 0.5, %v328_v22  ;;  %v321_v33 = vadd.f32 1.0, %v635_v27 }
  0xd5   :  { %v266_v15 = vmul.f32 0.044715, %v250_v21  ;;  %638 = vtanh.f32 %v290_v24 }
  0xd6   :  { %v360_v60 = vmul.f32 %v344_v25, %v830_v17  ;;  %v337_v4 = vmul.f32 0.5, %v321_v33 }
  0xd7   :  { %v282_v30 = vadd.f32 %v266_v15, %v218_v10 }
  0xd8   :  { %v369_v31 = vpack.c.bf16 %v360_v60, %v359_v36  ;;  %v353_v39 = vmul.f32 %v337_v4, %v839_v29 }
  0xd9   :  { %v298_v34 = vmul.f32 0.7978846, %v282_v30  ;;  %v637_v35 = vpop.eup %636 }
  0xda   :  { %568 = vmatmul.msk.bf16.gmra.mxu3 %vm387_vm1, %v369_v31  ;;  %v329_v38 = vadd.f32 1.0, %v637_v35 }
  0xdb   :  { %v639_v49 = vpop.eup %638  ;;  %640 = vtanh.f32 %v298_v34 }
  0xdc   :  { %v322_v19 = vadd.f32 1.0, %v639_v49  ;;  %v345_v17 = vmul.f32 0.5, %v329_v38 }
  0xde   :  { %v338_v37 = vmul.f32 0.5, %v322_v19  ;;  %v361_v42 = vmul.f32 %v345_v17, %v850_v46 }
  0xe0   :  { %v354_v40 = vmul.f32 %v338_v37, %v210_v56 }
  0xe1   :  { %v641_v41 = vpop.eup %640 }
  0xe2   :  { %v366_v55 = vpack.c.bf16 %v354_v40, %v353_v39  ;;  %v330_v20 = vadd.f32 1.0, %v641_v41 }
  0xe4   :  { %565 = vmatmul.msk.bf16.gmra.mxu1 %vm387_vm1, %v366_v55  ;;  %v346_v32 = vmul.f32 0.5, %v330_v20 }
  0xe6   :  { %v362_v43 = vmul.f32 %v346_v32, %v218_v10 }
  0xe8   :  { %v370_v45 = vpack.c.bf16 %v362_v43, %v361_v42 }
  0xea   :  { %569 = vmatmul.msk.bf16.gmra.mxu3 %vm387_vm1, %v370_v45 }
  0xf4   :  { %566 = vmatmul.msk.bf16.gmra.mxu1 %vm387_vm1, %v367_v58 }
 0x131   :  { %v421_v29 = vpop.f32.mrf.mxu1 }
 0x132   :  { %v461_v47 = vpack.c.bf16 %v421_v29, %v421_v29 }
 0x134   :  { %478 = vst.msk [vmem:[%s943_s5] sm:$0xf] %vm477_vm2, %v461_v47 }
 0x139   :  { %v423_v48 = vpop.f32.mrf.mxu1 }
 0x13a   :  { %v462_v50 = vpack.c.bf16 %v423_v48, %v423_v48 }
 0x13c   :  { %479 = vst.msk [vmem:[%s943_s5 + $0x4] sm:$0xf] %vm477_vm2, %v462_v50 }
 0x141   :  { %v426_v46 = vpop.f32.mrf.mxu1 }
 0x142   :  { %v463_v53 = vpack.c.bf16 %v426_v46, %v426_v46 }
 0x144   :  { %480 = vst.msk [vmem:[%s943_s5 + $0x8] sm:$0xf] %vm477_vm2, %v463_v53 }
 0x149   :  { %v428_v51 = vpop.f32.mrf.mxu1 }
 0x14a   :  { %v464_v52 = vpack.c.bf16 %v428_v51, %v428_v51 }
 0x14c   :  { %481 = vst.msk [vmem:[%s943_s5 + $0xc] sm:$0xf] %vm477_vm2, %v464_v52 }
 0x14d   :  { %v446_v58 = vpop.f32.mrf.mxu3 }
 0x14e   :  { %v471_v54 = vpack.c.bf16 %v446_v58, %v446_v58 }
 0x150   :  { %488 = vst.msk [vmem:[%s943_s5 + $0x28] sm:$0xf] %vm477_vm2, %v471_v54 }
 0x151   :  { %v431_v56 = vpop.f32.mrf.mxu1 }
 0x152   :  { %v465_v57 = vpack.c.bf16 %v431_v56, %v431_v56 }
 0x154   :  { %482 = vst.msk [vmem:[%s943_s5 + $0x10] sm:$0xf] %vm477_vm2, %v465_v57 }
 0x155   :  { %v448_v62 = vpop.f32.mrf.mxu3 }
 0x156   :  { %v472_v26 = vpack.c.bf16 %v448_v62, %v448_v62 }
 0x158   :  { %489 = vst.msk [vmem:[%s943_s5 + $0x2c] sm:$0xf] %vm477_vm2, %v472_v26 }
 0x159   :  { %v433_v59 = vpop.f32.mrf.mxu1 }
 0x15a   :  { %v466_v28 = vpack.c.bf16 %v433_v59, %v433_v59 }
 0x15c   :  { %483 = vst.msk [vmem:[%s943_s5 + $0x14] sm:$0xf] %vm477_vm2, %v466_v28 }
 0x15d   :  { %v451_v44 = vpop.f32.mrf.mxu3 }
 0x15e   :  { %v473_v61 = vpack.c.bf16 %v451_v44, %v451_v44 }
 0x160   :  { %490 = vst.msk [vmem:[%s943_s5 + $0x30] sm:$0xf] %vm477_vm2, %v473_v61 }
 0x161   :  { %v436_v63 = vpop.f32.mrf.mxu1 }
 0x162   :  { %v467_v1 = vpack.c.bf16 %v436_v63, %v436_v63 }
 0x164   :  { %484 = vst.msk [vmem:[%s943_s5 + $0x18] sm:$0xf] %vm477_vm2, %v467_v1 }
 0x165   :  { %v453_v2 = vpop.f32.mrf.mxu3 }
 0x166   :  { %v474_v3 = vpack.c.bf16 %v453_v2, %v453_v2 }
 0x168   :  { %491 = vst.msk [vmem:[%s943_s5 + $0x34] sm:$0xf] %vm477_vm2, %v474_v3 }
 0x169   :  { %v438_v5 = vpop.f32.mrf.mxu1 }
 0x16a   :  { %v468_v6 = vpack.c.bf16 %v438_v5, %v438_v5 }
 0x16c   :  { %485 = vst.msk [vmem:[%s943_s5 + $0x1c] sm:$0xf] %vm477_vm2, %v468_v6 }
 0x16d   :  { %v456_v7 = vpop.f32.mrf.mxu3 }
 0x16e   :  { %v475_v8 = vpack.c.bf16 %v456_v7, %v456_v7 }
 0x170   :  { %492 = vst.msk [vmem:[%s943_s5 + $0x38] sm:$0xf] %vm477_vm2, %v475_v8 }
 0x171   :  { %v441_v9 = vpop.f32.mrf.mxu1 }
 0x172   :  { %v469_v10 = vpack.c.bf16 %v441_v9, %v441_v9 }
 0x174   :  { %486 = vst.msk [vmem:[%s943_s5 + $0x20] sm:$0xf] %vm477_vm2, %v469_v10 }
 0x175   :  { %v458_v11 = vpop.f32.mrf.mxu3 }
 0x176   :  { %v476_v12 = vpack.c.bf16 %v458_v11, %v458_v11 }
 0x178   :  { %493 = vst.msk [vmem:[%s943_s5 + $0x3c] sm:$0xf] %vm477_vm2, %v476_v12 }
 0x179   :  { %v443_v13 = vpop.f32.mrf.mxu1 }
 0x17a   :  { %v470_v14 = vpack.c.bf16 %v443_v13, %v443_v13 }
 0x17c   :  { %487 = vst.msk [vmem:[%s943_s5 + $0x24] sm:$0xf] %vm477_vm2, %v470_v14 }

// kernel: upocr_forward.15
= control target key start
LH: loop header
LB: loop body
LE: loop exit
PB: predicated region body
PF: predicated region fallthrough
CT: control target
= control target key end

     0   :  { %s1503_s21 = smov 0   ;;  %s2038_s0 = inlined_call_operand.vmem [shape: bf16[512,32], index: 0, kind: input, shape index: {}]   ;;  %s2039_s1 = inlined_call_operand.vmem [shape: bf16[16,16,16], index: 1, kind: input, shape index: {}]   ;;  %s2040_s2 = inlined_call_operand.vmem [shape: bf16[32,16], index: 2, kind: input, shape index: {}]   ;;  %s2041_s3 = inlined_call_operand.vmem [shape: f32[1,16], index: 3, kind: input, shape index: {}]   ;;  %s2042_s4 = inlined_call_operand.vmem [shape: bf16[16,3], index: 4, kind: input, shape index: {}]   ;;  %s2043_s5 = inlined_call_operand.vmem [shape: f32[1,3], index: 5, kind: input, shape index: {}]   ;;  %s2044_s6 = inlined_call_operand.vmem [shape: bf16[512,3], index: 6, kind: output, shape index: {}]  }
   0x1 LB: > { %s1202_s22 = sadd.s32 4294967295, %s1466_s21   ;;  %p1206_p0 = scmp.ge.s32.totalorder %s1466_s21, 1  ;;  %s1466_s21 = sphi %s1503_s21, %s16_s21  }
   0x2   : > { %p225_p1 = scmp.lt.s32.totalorder %s1466_s21, 3 }
   0x4   : > { %p226_p2 = pnand %p1206_p0, %p225_p1 }
   0x5   : > { %s1207_s25 = sshll.u32 (!%p226_p2), %s1202_s22, 5  ;;  %s1209_s8 = sshll.u32 (!%p226_p2), %s1202_s22, 3 }
   0x6   : > { %229 = sbr.rel (%p226_p2) target bundleno = 449 (0x1c1), region = 44  ;;  %p262_p3 = scmp.lt.s32.totalorder (!%p226_p2), %s1207_s25, 63 }
   0x7   : > { %p268_p4 = scmp.lt.s32.totalorder (!%p226_p2), %s1209_s8, 15 }
   0xb   : > { %v1342_v0 = vld [vmem:[%s2040_s2 + $0x8] sm:$0xff]  ;;  %v1341_v1 = vld [vmem:[%s2040_s2] sm:$0xff]  ;;  %s2046_s25 = smov (!%p262_p3, %s1207_s25), 63  ;;  %vm441_vm0 = vcmask 261120   ;;  %s2048_s8 = smov (!%p268_p4, %s1209_s8), 15  ;;  %vm931_vm1 = vcmask 130048  }
   0xc   : > { %496 = vmatpush.bf16.msra.mxu0 %v1342_v0  ;;  %1383 = vmatpush.bf16.msra.mxu2 %v1342_v0  ;;  %s1208_s28 = sshll.u32 %s2046_s25, 2  ;;  %s1324_s9 = sshll.u32 %s2048_s8, 3  ;;  %v1572_v20 = vld [vmem:[%s2041_s3] ss:$0 sm:$0xff]  ;;  %vm1101_vm2 = vcmask 19456  }
   0xd   : > { %s1527_s7 = scalar_lea.vmem %s2038_s0, %s1208_s28  ;;  %s1566_s12 = scalar_lea.vmem %s2039_s1, %s1324_s9  ;;  %v1343_v24 = vld [vmem:[%s2042_s4] sm:$0xff] }
   0xe   : > { %v1325_v2 = vld [vmem:[%s1527_s7] sm:$0xff]  ;;  %v1326_v4 = vld [vmem:[%s1527_s7 + $0x8] sm:$0xff]  ;;  %v1327_v6 = vld [vmem:[%s1527_s7 + $0x10] sm:$0xff]  ;;  %987 = vmatpush.bf16.msra.mxu1 %v1343_v24  ;;  %1385 = vmatpush.bf16.msra.mxu3 %v1343_v24  ;;  %s1934_s22 = scalar_lea.vmem %s2044_s6, %s1208_s28 }
   0xf   : > { %v1333_v3 = vld [vmem:[%s1527_s7 + $0x40] sm:$0xff]  ;;  %v1334_v5 = vld [vmem:[%s1527_s7 + $0x48] sm:$0xff]  ;;  %v1335_v7 = vld [vmem:[%s1527_s7 + $0x50] sm:$0xff] }
  0x10   : > { %497 = vmatpush.bf16.msra.mxu0 %v1341_v1  ;;  %1384 = vmatpush.bf16.msra.mxu2 %v1341_v1  ;;  %v1328_v8 = vld [vmem:[%s1527_s7 + $0x18] sm:$0xff]  ;;  %v1329_v10 = vld [vmem:[%s1527_s7 + $0x20] sm:$0xff]  ;;  %v1330_v12 = vld [vmem:[%s1527_s7 + $0x28] sm:$0xff] }
  0x11   : > { %v1336_v9 = vld [vmem:[%s1527_s7 + $0x58] sm:$0xff]  ;;  %v1337_v11 = vld [vmem:[%s1527_s7 + $0x60] sm:$0xff]  ;;  %v1338_v13 = vld [vmem:[%s1527_s7 + $0x68] sm:$0xff] }
  0x12   : > { %v1331_v14 = vld [vmem:[%s1527_s7 + $0x30] sm:$0xff]  ;;  %v1332_v16 = vld [vmem:[%s1527_s7 + $0x38] sm:$0xff]  ;;  %v1345_v18 = vld [vmem:[%s1566_s12] sm:$0xff]  }
  0x13   : > { %1286 = vmatmul.msk.bf16.vlgmr.msra.gmra.mxu0 %vm441_vm0, %v1325_v2  ;;  %1294 = vmatmul.msk.bf16.vlgmr.msra.gmra.mxu2 %vm441_vm0, %v1333_v3  ;;  %v1339_v15 = vld [vmem:[%s1527_s7 + $0x70] sm:$0xff]  ;;  %v1340_v17 = vld [vmem:[%s1527_s7 + $0x78] sm:$0xff]  ;;  %v1346_v19 = vunpack.c.l.bf16 %v1345_v18  ;;  %v1575_v22 = vld [vmem:[%s1566_s12 + $0x20] sm:$0xff]   ;;  %v1347_v28 = vunpack.c.h.bf16 %v1345_v18 }
  0x14   : > { %v1362_v26 = vunpack.c.l.bf16 %v1575_v22  ;;  %v1363_v39 = vunpack.c.h.bf16 %v1575_v22  ;;  %v1634_v24 = vld [vmem:[%s1566_s12 + $0x28] sm:$0xff]  }
  0x23   : > { %1287 = vmatmul.msk.bf16.gmra.mxu0 %vm441_vm0, %v1326_v4  ;;  %1295 = vmatmul.msk.bf16.gmra.mxu2 %vm441_vm0, %v1334_v5  ;;  %v1620_v5 = vld [vmem:[%s1566_s12 + $0x8] sm:$0xff]  }
  0x33   : > { %1288 = vmatmul.msk.bf16.gmra.mxu0 %vm441_vm0, %v1327_v6  ;;  %1296 = vmatmul.msk.bf16.gmra.mxu2 %vm441_vm0, %v1335_v7 }
  0x43   : > { %1289 = vmatmul.msk.bf16.gmra.mxu0 %vm441_vm0, %v1328_v8  ;;  %1297 = vmatmul.msk.bf16.gmra.mxu2 %vm441_vm0, %v1336_v9 }
  0x53   : > { %1290 = vmatmul.msk.bf16.gmra.mxu0 %vm441_vm0, %v1329_v10  ;;  %1298 = vmatmul.msk.bf16.gmra.mxu2 %vm441_vm0, %v1337_v11 }
  0x63   : > { %1291 = vmatmul.msk.bf16.gmra.mxu0 %vm441_vm0, %v1330_v12  ;;  %1299 = vmatmul.msk.bf16.gmra.mxu2 %vm441_vm0, %v1338_v13  ;;  %v1350_v12 = vunpack.c.l.bf16 %v1620_v5 }
  0x73   : > { %1292 = vmatmul.msk.bf16.gmra.mxu0 %vm441_vm0, %v1331_v14  ;;  %1300 = vmatmul.msk.bf16.gmra.mxu2 %vm441_vm0, %v1339_v15 }
  0x83   : > { %1293 = vmatmul.msk.bf16.gmra.mxu0 %vm441_vm0, %v1332_v16  ;;  %1301 = vmatmul.msk.bf16.gmra.mxu2 %vm441_vm0, %v1340_v17 }
  0x90   : > { %v499_v21 = vpop.f32.mrf.mxu0 }
  0x91   : > { %v500_v23 = vadd.f32 %v1346_v19, %v499_v21 }
  0x93   : > { %v1581_v25 = vadd.f32 %v1572_v20, %v500_v23 }
  0x95   : > { %v615_v27 = vmul.f32 %v1581_v25, %v1581_v25 }
  0x96   : > { %v539_v29 = vpop.f32.mrf.mxu2 }
  0x97   : > { %v647_v30 = vmul.f32 %v615_v27, %v1581_v25  ;;  %v540_v31 = vadd.f32 %v1362_v26, %v539_v29 }
  0x98   : > { %v501_v32 = vpop.f32.mrf.mxu0 }
  0x99   : > { %v679_v33 = vmul.f32 0.044715, %v647_v30  ;;  %v1588_v34 = vadd.f32 %v1572_v20, %v540_v31  ;;  %v502_v35 = vadd.f32 %v1347_v28, %v501_v32 }
  0x9b   : > { %v711_v36 = vadd.f32 %v679_v33, %v1581_v25  ;;  %v631_v37 = vmul.f32 %v1588_v34, %v1588_v34  ;;  %v1594_v38 = vadd.f32 %v1572_v20, %v502_v35  ;;  %v1366_v33 = vunpack.c.l.bf16 %v1634_v24 }
  0x9d   : > { %v663_v40 = vmul.f32 %v631_v37, %v1588_v34  ;;  %v616_v41 = vmul.f32 %v1594_v38, %v1594_v38  ;;  %v743_v42 = vmul.f32 0.7978846, %v711_v36 }
  0x9e   : > { %v541_v43 = vpop.f32.mrf.mxu2 }
  0x9f   : > { %v695_v44 = vmul.f32 0.044715, %v663_v40  ;;  %v648_v45 = vmul.f32 %v616_v41, %v1594_v38  ;;  %v542_v46 = vadd.f32 %v1363_v39, %v541_v43  ;;  %1396 = vtanh.f32 %v743_v42 }
  0xa0   : > { %v504_v47 = vpop.f32.mrf.mxu0 }
  0xa1   : > { %v727_v48 = vadd.f32 %v695_v44, %v1588_v34  ;;  %v680_v49 = vmul.f32 0.044715, %v648_v45  ;;  %v1603_v50 = vadd.f32 %v1572_v20, %v542_v46  ;;  %v505_v51 = vadd.f32 %v1346_v19, %v504_v47 }
  0xa3   : > { %v712_v52 = vadd.f32 %v680_v49, %v1594_v38  ;;  %v632_v53 = vmul.f32 %v1603_v50, %v1603_v50  ;;  %v1609_v54 = vadd.f32 %v1572_v20, %v505_v51  ;;  %v759_v55 = vmul.f32 0.7978846, %v727_v48 }
  0xa5   : > { %v664_v56 = vmul.f32 %v632_v53, %v1603_v50  ;;  %v617_v57 = vmul.f32 %v1609_v54, %v1609_v54  ;;  %v744_v58 = vmul.f32 0.7978846, %v712_v52  ;;  %v1397_v59 = vpop.eup %1396  ;;  %1398 = vtanh.f32 %v759_v55 }
  0xa6   : > { %v544_v60 = vpop.f32.mrf.mxu2  ;;  %v807_v6 = vadd.f32 1.0, %v1397_v59 }
  0xa7   : > { %v696_v61 = vmul.f32 0.044715, %v664_v56  ;;  %v649_v62 = vmul.f32 %v617_v57, %v1609_v54  ;;  %v545_v63 = vadd.f32 %v1362_v26, %v544_v60  ;;  %1400 = vtanh.f32 %v744_v58 }
  0xa8   : > { %v506_v0 = vpop.f32.mrf.mxu0  ;;  %v839_v19 = vmul.f32 0.5, %v807_v6 }
  0xa9   : > { %v728_v1 = vadd.f32 %v696_v61, %v1603_v50  ;;  %v681_v2 = vmul.f32 0.044715, %v649_v62  ;;  %v1617_v3 = vadd.f32 %v1572_v20, %v545_v63  ;;  %v507_v4 = vadd.f32 %v1347_v28, %v506_v0 }
  0xaa   : > { %v871_v35 = vmul.f32 %v839_v19, %v1581_v25  ;;  %v1367_v63 = vunpack.c.h.bf16 %v1634_v24 }
  0xab   : > { %v713_v7 = vadd.f32 %v681_v2, %v1609_v54  ;;  %v633_v8 = vmul.f32 %v1617_v3, %v1617_v3  ;;  %v1626_v9 = vadd.f32 %v1572_v20, %v507_v4  ;;  %v760_v10 = vmul.f32 0.7978846, %v728_v1  ;;  %v1399_v11 = vpop.eup %1398 }
  0xac   : > { %v823_v28 = vadd.f32 1.0, %v1399_v11 }
  0xad   : > { %v1401_v13 = vpop.eup %1400  ;;  %v665_v14 = vmul.f32 %v633_v8, %v1617_v3  ;;  %v618_v15 = vmul.f32 %v1626_v9, %v1626_v9  ;;  %v745_v16 = vmul.f32 0.7978846, %v713_v7  ;;  %1402 = vtanh.f32 %v760_v10 }
  0xae   : > { %v546_v17 = vpop.f32.mrf.mxu2  ;;  %v808_v18 = vadd.f32 1.0, %v1401_v13  ;;  %v855_v45 = vmul.f32 0.5, %v823_v28 }
  0xaf   : > { %v697_v21 = vmul.f32 0.044715, %v665_v14  ;;  %v650_v22 = vmul.f32 %v618_v15, %v1626_v9  ;;  %v547_v23 = vadd.f32 %v1363_v39, %v546_v17  ;;  %1404 = vtanh.f32 %v745_v16 }
  0xb0   : > { %v509_v26 = vpop.f32.mrf.mxu0  ;;  %v840_v27 = vmul.f32 0.5, %v808_v18  ;;  %v1660_v57 = vmul.f32 %v855_v45, %v1588_v34 }
  0xb1   : > { %v729_v29 = vadd.f32 %v697_v21, %v1617_v3  ;;  %v682_v30 = vmul.f32 0.044715, %v650_v22  ;;  %v1638_v31 = vadd.f32 %v1572_v20, %v547_v23  ;;  %v510_v32 = vadd.f32 %v1350_v12, %v509_v26 }
  0xb2   : > { %v872_v36 = vmul.f32 %v840_v27, %v1594_v38  ;;  %v1351_v38 = vunpack.c.h.bf16 %v1620_v5 }
  0xb3   : > { %v1403_v37 = vpop.eup %1402  ;;  %v714_v39 = vadd.f32 %v682_v30, %v1626_v9  ;;  %v634_v40 = vmul.f32 %v1638_v31, %v1638_v31  ;;  %v1649_v41 = vadd.f32 %v1572_v20, %v510_v32  ;;  %v761_v42 = vmul.f32 0.7978846, %v729_v29 }
  0xb4   : > { %v903_v43 = vpack.c.bf16 %v872_v36, %v871_v35  ;;  %v824_v44 = vadd.f32 1.0, %v1403_v37 }
  0xb5   : > { %v666_v46 = vmul.f32 %v634_v40, %v1638_v31  ;;  %v619_v25 = vmul.f32 %v1649_v41, %v1649_v41  ;;  %v746_v47 = vmul.f32 0.7978846, %v714_v39  ;;  %v1405_v48 = vpop.eup %1404  ;;  %1406 = vtanh.f32 %v761_v42 }
  0xb6   : > { %v549_v49 = vpop.f32.mrf.mxu2  ;;  %1306 = vmatmul.msk.bf16.vlgmr.msra.gmra.mxu1 %vm931_vm1, %v903_v43  ;;  %v856_v51 = vmul.f32 0.5, %v824_v44  ;;  %v809_v0 = vadd.f32 1.0, %v1405_v48 }
  0xb7   : > { %v698_v52 = vmul.f32 0.044715, %v666_v46  ;;  %v651_v53 = vmul.f32 %v619_v25, %v1649_v41  ;;  %v550_v55 = vadd.f32 %v1366_v33, %v549_v49  ;;  %1408 = vtanh.f32 %v746_v47 }
  0xb8   : > { %v511_v56 = vpop.f32.mrf.mxu0  ;;  %v1663_v58 = vmul.f32 %v856_v51, %v1603_v50  ;;  %v841_v15 = vmul.f32 0.5, %v809_v0 }
  0xb9   : > { %v730_v59 = vadd.f32 %v698_v52, %v1638_v31  ;;  %v683_v60 = vmul.f32 0.044715, %v651_v53  ;;  %v1667_v61 = vadd.f32 %v1572_v20, %v550_v55  ;;  %v512_v62 = vadd.f32 %v1351_v38, %v511_v56 }
  0xba   : > { %v911_v1 = vpack.c.bf16 %v1663_v58, %v1660_v57  ;;  %v873_v29 = vmul.f32 %v841_v15, %v1609_v54 }
  0xbb   : > { %v715_v34 = vadd.f32 %v683_v60, %v1649_v41  ;;  %v635_v50 = vmul.f32 %v1667_v61, %v1667_v61  ;;  %v1678_v2 = vadd.f32 %v1572_v20, %v512_v62  ;;  %v762_v4 = vmul.f32 0.7978846, %v730_v59  ;;  %v1407_v6 = vpop.eup %1406  ;;  %v1716_v60 = vld [vmem:[%s1566_s12 + $0x10] sm:$0xff]  }
  0xbc   : > { %v825_v22 = vadd.f32 1.0, %v1407_v6  ;;  %v1354_v5 = vunpack.c.l.bf16 %v1716_v60 }
  0xbd   : > { %v1409_v7 = vpop.eup %1408  ;;  %v667_v8 = vmul.f32 %v635_v50, %v1667_v61  ;;  %v620_v10 = vmul.f32 %v1678_v2, %v1678_v2  ;;  %1410 = vtanh.f32 %v762_v4  ;;  %v747_v11 = vmul.f32 0.7978846, %v715_v34 }
  0xbe   : > { %v551_v13 = vpop.f32.mrf.mxu2  ;;  %v810_v14 = vadd.f32 1.0, %v1409_v7  ;;  %v857_v43 = vmul.f32 0.5, %v825_v22 }
  0xbf   : > { %v699_v16 = vmul.f32 0.044715, %v667_v8  ;;  %v652_v17 = vmul.f32 %v620_v10, %v1678_v2  ;;  %v552_v18 = vadd.f32 %v1367_v63, %v551_v13  ;;  %1412 = vtanh.f32 %v747_v11 }
  0xc0   : > { %v514_v19 = vpop.f32.mrf.mxu0  ;;  %v842_v21 = vmul.f32 0.5, %v810_v14  ;;  %v889_v51 = vmul.f32 %v857_v43, %v1617_v3 }
  0xc1   : > { %v731_v23 = vadd.f32 %v699_v16, %v1667_v61  ;;  %v684_v26 = vmul.f32 0.044715, %v652_v17  ;;  %v1688_v27 = vadd.f32 %v1572_v20, %v552_v18  ;;  %v515_v28 = vadd.f32 %v1350_v12, %v514_v19  ;;  %v1733_v16 = vld [vmem:[%s1566_s12 + $0x30] sm:$0xff]  }
  0xc2   : > { %v874_v30 = vmul.f32 %v842_v21, %v1626_v9 }
  0xc3   : > { %v1411_v32 = vpop.eup %1410  ;;  %v716_v35 = vadd.f32 %v684_v26, %v1678_v2  ;;  %v636_v36 = vmul.f32 %v1688_v27, %v1688_v27  ;;  %v1698_v37 = vadd.f32 %v1572_v20, %v515_v28  ;;  %v763_v39 = vmul.f32 0.7978846, %v731_v23 }
  0xc4   : > { %v904_v40 = vpack.c.bf16 %v874_v30, %v873_v29  ;;  %v826_v42 = vadd.f32 1.0, %v1411_v32  ;;  %v1370_v28 = vunpack.c.l.bf16 %v1733_v16 }
  0xc5   : > { %v668_v44 = vmul.f32 %v636_v36, %v1688_v27  ;;  %v621_v54 = vmul.f32 %v1698_v37, %v1698_v37  ;;  %v748_v12 = vmul.f32 0.7978846, %v716_v35  ;;  %v1413_v9 = vpop.eup %1412  ;;  %1414 = vtanh.f32 %v763_v39 }
  0xc6   : > { %v554_v45 = vpop.f32.mrf.mxu2  ;;  %1307 = vmatmul.msk.bf16.gmra.mxu1 %vm931_vm1, %v904_v40  ;;  %v858_v46 = vmul.f32 0.5, %v826_v42  ;;  %v811_v0 = vadd.f32 1.0, %v1413_v9 }
  0xc7   : > { %v700_v25 = vmul.f32 0.044715, %v668_v44  ;;  %v653_v47 = vmul.f32 %v621_v54, %v1698_v37  ;;  %v555_v48 = vadd.f32 %v1366_v33, %v554_v45  ;;  %1416 = vtanh.f32 %v748_v12 }
  0xc8   : > { %v516_v49 = vpop.f32.mrf.mxu0  ;;  %v890_v52 = vmul.f32 %v858_v46, %v1638_v31  ;;  %v843_v11 = vmul.f32 0.5, %v811_v0 }
  0xc9   : > { %v732_v53 = vadd.f32 %v700_v25, %v1688_v27  ;;  %v685_v55 = vmul.f32 0.044715, %v653_v47  ;;  %v1711_v56 = vadd.f32 %v1572_v20, %v555_v48  ;;  %v517_v59 = vadd.f32 %v1351_v38, %v516_v49 }
  0xca   : > { %v912_v62 = vpack.c.bf16 %v890_v52, %v889_v51  ;;  %v875_v24 = vmul.f32 %v843_v11, %v1649_v41 }
  0xcb   : > { %v717_v33 = vadd.f32 %v685_v55, %v1698_v37  ;;  %v637_v3 = vmul.f32 %v1711_v56, %v1711_v56  ;;  %v1722_v31 = vadd.f32 %v1572_v20, %v517_v59  ;;  %v764_v34 = vmul.f32 0.7978846, %v732_v53  ;;  %v1415_v50 = vpop.eup %1414 }
  0xcc   : > { %1315 = vmatmul.msk.bf16.vlgmr.msra.gmra.mxu3 %vm931_vm1, %v912_v62  ;;  %v827_v19 = vadd.f32 1.0, %v1415_v50  ;;  %v1371_v62 = vunpack.c.h.bf16 %v1733_v16 }
  0xcd   : > { %v1417_v38 = vpop.eup %1416  ;;  %v669_v4 = vmul.f32 %v637_v3, %v1711_v56  ;;  %v622_v6 = vmul.f32 %v1722_v31, %v1722_v31  ;;  %1418 = vtanh.f32 %v764_v34  ;;  %v749_v7 = vmul.f32 0.7978846, %v717_v33 }
  0xce   : > { %v556_v8 = vpop.f32.mrf.mxu2  ;;  %v812_v10 = vadd.f32 1.0, %v1417_v38  ;;  %v859_v42 = vmul.f32 0.5, %v827_v19 }
  0xcf   : > { %v701_v13 = vmul.f32 0.044715, %v669_v4  ;;  %v654_v14 = vmul.f32 %v622_v6, %v1722_v31  ;;  %v557_v15 = vadd.f32 %v1367_v63, %v556_v8  ;;  %1420 = vtanh.f32 %v749_v7 }
  0xd0   : > { %v519_v17 = vpop.f32.mrf.mxu0  ;;  %v844_v18 = vmul.f32 0.5, %v812_v10  ;;  %v891_v48 = vmul.f32 %v859_v42, %v1667_v61 }
  0xd1   : > { %v733_v21 = vadd.f32 %v701_v13, %v1711_v56  ;;  %v686_v22 = vmul.f32 0.044715, %v654_v14  ;;  %v1737_v23 = vadd.f32 %v1572_v20, %v557_v15  ;;  %v520_v26 = vadd.f32 %v1354_v5, %v519_v17 }
  0xd2   : > { %v876_v63 = vmul.f32 %v844_v18, %v1678_v2  ;;  %v1355_v2 = vunpack.c.h.bf16 %v1716_v60 }
  0xd3   : > { %v1419_v29 = vpop.eup %1418  ;;  %v718_v30 = vadd.f32 %v686_v22, %v1722_v31  ;;  %v638_v32 = vmul.f32 %v1737_v23, %v1737_v23  ;;  %v1748_v35 = vadd.f32 %v1572_v20, %v520_v26  ;;  %v765_v36 = vmul.f32 0.7978846, %v733_v21 }
  0xd4   : > { %v905_v39 = vpack.c.bf16 %v876_v63, %v875_v24  ;;  %v828_v40 = vadd.f32 1.0, %v1419_v29 }
  0xd5   : > { %v670_v43 = vmul.f32 %v638_v32, %v1737_v23  ;;  %v623_v41 = vmul.f32 %v1748_v35, %v1748_v35  ;;  %v750_v44 = vmul.f32 0.7978846, %v718_v30  ;;  %v1421_v54 = vpop.eup %1420  ;;  %1422 = vtanh.f32 %v765_v36 }
  0xd6   : > { %v559_v12 = vpop.f32.mrf.mxu2  ;;  %1308 = vmatmul.msk.bf16.gmra.mxu1 %vm931_vm1, %v905_v39  ;;  %v860_v9 = vmul.f32 0.5, %v828_v40  ;;  %v813_v0 = vadd.f32 1.0, %v1421_v54 }
  0xd7   : > { %v702_v45 = vmul.f32 0.044715, %v670_v43  ;;  %v655_v46 = vmul.f32 %v623_v41, %v1748_v35  ;;  %v560_v25 = vadd.f32 %v1370_v28, %v559_v12  ;;  %1424 = vtanh.f32 %v750_v44 }
  0xd8   : > { %v521_v47 = vpop.f32.mrf.mxu0  ;;  %v892_v49 = vmul.f32 %v860_v9, %v1688_v27  ;;  %v845_v10 = vmul.f32 0.5, %v813_v0 }
  0xd9   : > { %v734_v51 = vadd.f32 %v702_v45, %v1737_v23  ;;  %v687_v52 = vmul.f32 0.044715, %v655_v46  ;;  %v1762_v53 = vadd.f32 %v1572_v20, %v560_v25  ;;  %v522_v55 = vadd.f32 %v1355_v2, %v521_v47 }
  0xda   : > { %v913_v59 = vpack.c.bf16 %v892_v49, %v891_v48  ;;  %v877_v24 = vmul.f32 %v845_v10, %v1698_v37 }
  0xdb   : > { %v719_v33 = vadd.f32 %v687_v52, %v1748_v35  ;;  %v639_v61 = vmul.f32 %v1762_v53, %v1762_v53  ;;  %v1771_v27 = vadd.f32 %v1572_v20, %v522_v55  ;;  %v766_v3 = vmul.f32 0.7978846, %v734_v51  ;;  %v1423_v34 = vpop.eup %1422  ;;  %v1810_v55 = vld [vmem:[%s1566_s12 + $0x18] sm:$0xff]  }
  0xdc   : > { %1316 = vmatmul.msk.bf16.gmra.mxu3 %vm931_vm1, %v913_v59  ;;  %v829_v18 = vadd.f32 1.0, %v1423_v34  ;;  %v1358_v60 = vunpack.c.l.bf16 %v1810_v55 }
  0xdd   : > { %v1425_v50 = vpop.eup %1424  ;;  %v671_v38 = vmul.f32 %v639_v61, %v1762_v53  ;;  %v624_v4 = vmul.f32 %v1771_v27, %v1771_v27  ;;  %1426 = vtanh.f32 %v766_v3  ;;  %v751_v6 = vmul.f32 0.7978846, %v719_v33 }
  0xde   : > { %v561_v7 = vpop.f32.mrf.mxu2  ;;  %v814_v8 = vadd.f32 1.0, %v1425_v50  ;;  %v861_v43 = vmul.f32 0.5, %v829_v18 }
  0xdf   : > { %v703_v11 = vmul.f32 0.044715, %v671_v38  ;;  %v656_v13 = vmul.f32 %v624_v4, %v1771_v27  ;;  %v562_v14 = vadd.f32 %v1371_v62, %v561_v7  ;;  %1428 = vtanh.f32 %v751_v6 }
  0xe0   : > { %v524_v15 = vpop.f32.mrf.mxu0  ;;  %v846_v17 = vmul.f32 0.5, %v814_v8  ;;  %v893_v25 = vmul.f32 %v861_v43, %v1711_v56 }
  0xe1   : > { %v735_v19 = vadd.f32 %v703_v11, %v1762_v53  ;;  %v688_v21 = vmul.f32 0.044715, %v656_v13  ;;  %v1782_v22 = vadd.f32 %v1572_v20, %v562_v14  ;;  %v525_v26 = vadd.f32 %v1354_v5, %v524_v15  ;;  %v1827_v11 = vld [vmem:[%s1566_s12 + $0x38] sm:$0xff]  }
  0xe2   : > { %v878_v63 = vmul.f32 %v846_v17, %v1722_v31 }
  0xe3   : > { %v1427_v29 = vpop.eup %1426  ;;  %v720_v30 = vadd.f32 %v688_v21, %v1771_v27  ;;  %v640_v32 = vmul.f32 %v1782_v22, %v1782_v22  ;;  %v1792_v36 = vadd.f32 %v1572_v20, %v525_v26  ;;  %v767_v39 = vmul.f32 0.7978846, %v735_v19 }
  0xe4   : > { %v906_v40 = vpack.c.bf16 %v878_v63, %v877_v24  ;;  %v830_v42 = vadd.f32 1.0, %v1427_v29  ;;  %v1374_v26 = vunpack.c.l.bf16 %v1827_v11 }
  0xe5   : > { %v672_v41 = vmul.f32 %v640_v32, %v1782_v22  ;;  %v625_v37 = vmul.f32 %v1792_v36, %v1792_v36  ;;  %v752_v5 = vmul.f32 0.7978846, %v720_v30  ;;  %v1429_v31 = vpop.eup %1428  ;;  %1430 = vtanh.f32 %v767_v39 }
  0xe6   : > { %v564_v44 = vpop.f32.mrf.mxu2  ;;  %1309 = vmatmul.msk.bf16.gmra.mxu1 %vm931_vm1, %v906_v40  ;;  %v862_v54 = vmul.f32 0.5, %v830_v42  ;;  %v815_v0 = vadd.f32 1.0, %v1429_v31 }
  0xe7   : > { %v704_v12 = vmul.f32 0.044715, %v672_v41  ;;  %v657_v9 = vmul.f32 %v625_v37, %v1792_v36  ;;  %v565_v45 = vadd.f32 %v1370_v28, %v564_v44  ;;  %1432 = vtanh.f32 %v752_v5 }
  0xe8   : > { %v526_v46 = vpop.f32.mrf.mxu0  ;;  %v894_v47 = vmul.f32 %v862_v54, %v1737_v23  ;;  %v847_v6 = vmul.f32 0.5, %v815_v0 }
  0xe9   : > { %v736_v48 = vadd.f32 %v704_v12, %v1782_v22  ;;  %v689_v49 = vmul.f32 0.044715, %v657_v9  ;;  %v1805_v51 = vadd.f32 %v1572_v20, %v565_v45  ;;  %v527_v52 = vadd.f32 %v1355_v2, %v526_v46 }
  0xea   : > { %v914_v59 = vpack.c.bf16 %v894_v47, %v893_v25  ;;  %v879_v16 = vmul.f32 %v847_v6, %v1748_v35 }
  0xeb   : > { %v721_v28 = vadd.f32 %v689_v49, %v1792_v36  ;;  %v641_v56 = vmul.f32 %v1805_v51, %v1805_v51  ;;  %v1816_v23 = vadd.f32 %v1572_v20, %v527_v52  ;;  %v768_v33 = vmul.f32 0.7978846, %v736_v48  ;;  %v1431_v61 = vpop.eup %1430 }
  0xec   : > { %1317 = vmatmul.msk.bf16.gmra.mxu3 %vm931_vm1, %v914_v59  ;;  %v831_v15 = vadd.f32 1.0, %v1431_v61  ;;  %v1375_v59 = vunpack.c.h.bf16 %v1827_v11 }
  0xed   : > { %v1433_v2 = vpop.eup %1432  ;;  %v673_v3 = vmul.f32 %v641_v56, %v1805_v51  ;;  %v626_v34 = vmul.f32 %v1816_v23, %v1816_v23  ;;  %1434 = vtanh.f32 %v768_v33  ;;  %v753_v50 = vmul.f32 0.7978846, %v721_v28 }
  0xee   : > { %v566_v38 = vpop.f32.mrf.mxu2  ;;  %v816_v4 = vadd.f32 1.0, %v1433_v2  ;;  %v863_v42 = vmul.f32 0.5, %v831_v15 }
  0xef   : > { %v705_v7 = vmul.f32 0.044715, %v673_v3  ;;  %v658_v8 = vmul.f32 %v626_v34, %v1816_v23  ;;  %v567_v10 = vadd.f32 %v1371_v62, %v566_v38  ;;  %1436 = vtanh.f32 %v753_v50 }
  0xf0   : > { %v529_v13 = vpop.f32.mrf.mxu0  ;;  %v848_v14 = vmul.f32 0.5, %v816_v4  ;;  %v895_v45 = vmul.f32 %v863_v42, %v1762_v53 }
  0xf1   : > { %v737_v17 = vadd.f32 %v705_v7, %v1805_v51  ;;  %v690_v18 = vmul.f32 0.044715, %v658_v8  ;;  %v1831_v19 = vadd.f32 %v1572_v20, %v567_v10  ;;  %v530_v21 = vadd.f32 %v1358_v60, %v529_v13 }
  0xf2   : > { %v880_v62 = vmul.f32 %v848_v14, %v1771_v27  ;;  %v1359_v27 = vunpack.c.h.bf16 %v1810_v55 }
  0xf3   : > { %v1435_v24 = vpop.eup %1434  ;;  %v722_v63 = vadd.f32 %v690_v18, %v1816_v23  ;;  %v642_v29 = vmul.f32 %v1831_v19, %v1831_v19  ;;  %v1842_v30 = vadd.f32 %v1572_v20, %v530_v21  ;;  %v769_v32 = vmul.f32 0.7978846, %v737_v17 }
  0xf4   : > { %v907_v39 = vpack.c.bf16 %v880_v62, %v879_v16  ;;  %v832_v40 = vadd.f32 1.0, %v1435_v24 }
  0xf5   : > { %v674_v43 = vmul.f32 %v642_v29, %v1831_v19  ;;  %v627_v35 = vmul.f32 %v1842_v30, %v1842_v30  ;;  %v754_v41 = vmul.f32 0.7978846, %v722_v63  ;;  %v1437_v37 = vpop.eup %1436  ;;  %1438 = vtanh.f32 %v769_v32 }
  0xf6   : > { %v569_v5 = vpop.f32.mrf.mxu2  ;;  %1310 = vmatmul.msk.bf16.gmra.mxu1 %vm931_vm1, %v907_v39  ;;  %v864_v31 = vmul.f32 0.5, %v832_v40  ;;  %v817_v0 = vadd.f32 1.0, %v1437_v37 }
  0xf7   : > { %v706_v44 = vmul.f32 0.044715, %v674_v43  ;;  %v659_v54 = vmul.f32 %v627_v35, %v1842_v30  ;;  %v570_v12 = vadd.f32 %v1374_v26, %v569_v5  ;;  %1440 = vtanh.f32 %v754_v41 }
  0xf8   : > { %v531_v9 = vpop.f32.mrf.mxu0  ;;  %v896_v46 = vmul.f32 %v864_v31, %v1782_v22  ;;  %v849_v4 = vmul.f32 0.5, %v817_v0 }
  0xf9   : > { %v738_v25 = vadd.f32 %v706_v44, %v1831_v19  ;;  %v691_v47 = vmul.f32 0.044715, %v659_v54  ;;  %v1856_v48 = vadd.f32 %v1572_v20, %v570_v12  ;;  %v532_v49 = vadd.f32 %v1359_v27, %v531_v9 }
  0xfa   : > { %v915_v52 = vpack.c.bf16 %v896_v46, %v895_v45  ;;  %v881_v16 = vmul.f32 %v849_v4, %v1792_v36 }
  0xfb   : > { %v723_v28 = vadd.f32 %v691_v47, %v1842_v30  ;;  %v643_v53 = vmul.f32 %v1856_v48, %v1856_v48  ;;  %v1865_v22 = vadd.f32 %v1572_v20, %v532_v49  ;;  %v770_v56 = vmul.f32 0.7978846, %v738_v25  ;;  %v1439_v33 = vpop.eup %1438 }
  0xfc   : > { %1318 = vmatmul.msk.bf16.gmra.mxu3 %vm931_vm1, %v915_v52  ;;  %v833_v14 = vadd.f32 1.0, %v1439_v33 }
  0xfd   : > { %v1441_v61 = vpop.eup %1440  ;;  %v675_v2 = vmul.f32 %v643_v53, %v1856_v48  ;;  %v628_v3 = vmul.f32 %v1865_v22, %v1865_v22  ;;  %1442 = vtanh.f32 %v770_v56  ;;  %v755_v34 = vmul.f32 0.7978846, %v723_v28 }
  0xfe   : > { %v571_v50 = vpop.f32.mrf.mxu2  ;;  %v818_v38 = vadd.f32 1.0, %v1441_v61  ;;  %v865_v43 = vmul.f32 0.5, %v833_v14 }
  0xff   : > { %v707_v6 = vmul.f32 0.044715, %v675_v2  ;;  %v660_v7 = vmul.f32 %v628_v3, %v1865_v22  ;;  %v572_v8 = vadd.f32 %v1375_v59, %v571_v50  ;;  %1444 = vtanh.f32 %v755_v34 }
 0x100   : > { %v534_v10 = vpop.f32.mrf.mxu0  ;;  %v850_v13 = vmul.f32 0.5, %v818_v38  ;;  %v897_v12 = vmul.f32 %v865_v43, %v1805_v51 }
 0x101   : > { %v739_v15 = vadd.f32 %v707_v6, %v1856_v48  ;;  %v692_v17 = vmul.f32 0.044715, %v660_v7  ;;  %v1876_v18 = vadd.f32 %v1572_v20, %v572_v8  ;;  %v535_v21 = vadd.f32 %v1358_v60, %v534_v10 }
 0x102   : > { %v882_v62 = vmul.f32 %v850_v13, %v1816_v23 }
 0x103   : > { %v1443_v24 = vpop.eup %1442  ;;  %v724_v63 = vadd.f32 %v692_v17, %v1865_v22  ;;  %v644_v29 = vmul.f32 %v1876_v18, %v1876_v18  ;;  %v1886_v32 = vadd.f32 %v1572_v20, %v535_v21  ;;  %v771_v39 = vmul.f32 0.7978846, %v739_v15 }
 0x104   : > { %v908_v40 = vpack.c.bf16 %v882_v62, %v881_v16  ;;  %v834_v42 = vadd.f32 1.0, %v1443_v24 }
 0x105   : > { %v676_v35 = vmul.f32 %v644_v29, %v1876_v18  ;;  %v629_v36 = vmul.f32 %v1886_v32, %v1886_v32  ;;  %v756_v60 = vmul.f32 0.7978846, %v724_v63  ;;  %v1445_v23 = vpop.eup %1444  ;;  %1446 = vtanh.f32 %v771_v39 }
 0x106   : > { %v574_v41 = vpop.f32.mrf.mxu2  ;;  %1311 = vmatmul.msk.bf16.gmra.mxu1 %vm931_vm1, %v908_v40  ;;  %v866_v37 = vmul.f32 0.5, %v834_v42  ;;  %v819_v52 = vadd.f32 1.0, %v1445_v23 }
 0x107   : > { %v708_v5 = vmul.f32 0.044715, %v676_v35  ;;  %v661_v31 = vmul.f32 %v629_v36, %v1886_v32  ;;  %v575_v44 = vadd.f32 %v1374_v26, %v574_v41  ;;  %1448 = vtanh.f32 %v756_v60 }
 0x108   : > { %v536_v54 = vpop.f32.mrf.mxu0  ;;  %v898_v9 = vmul.f32 %v866_v37, %v1831_v19  ;;  %v851_v2 = vmul.f32 0.5, %v819_v52 }
 0x109   : > { %v740_v45 = vadd.f32 %v708_v5, %v1876_v18  ;;  %v693_v46 = vmul.f32 0.044715, %v661_v31  ;;  %v1899_v25 = vadd.f32 %v1572_v20, %v575_v44  ;;  %v537_v47 = vadd.f32 %v1359_v27, %v536_v54 }
 0x10a   : > { %v916_v49 = vpack.c.bf16 %v898_v9, %v897_v12  ;;  %v883_v10 = vmul.f32 %v851_v2, %v1842_v30 }
 0x10b   : > { %v725_v0 = vadd.f32 %v693_v46, %v1886_v32  ;;  %v645_v26 = vmul.f32 %v1899_v25, %v1899_v25  ;;  %v598_v51 = vadd.f32 %v1572_v20, %v537_v47  ;;  %v772_v28 = vmul.f32 0.7978846, %v740_v45  ;;  %v1447_v19 = vpop.eup %1446  ;;  %v1926_v47 = vld [vmem:[%s2043_s5] ss:$0 sm:$0xff] }
 0x10c   : > { %1319 = vmatmul.msk.bf16.gmra.mxu3 %vm931_vm1, %v916_v49  ;;  %v835_v4 = vadd.f32 1.0, %v1447_v19 }
 0x10d   : > { %v1449_v53 = vpop.eup %1448  ;;  %v677_v56 = vmul.f32 %v645_v26, %v1899_v25  ;;  %v630_v33 = vmul.f32 %v598_v51, %v598_v51  ;;  %1450 = vtanh.f32 %v772_v28  ;;  %v757_v55 = vmul.f32 0.7978846, %v725_v0 }
 0x10e   : > { %v576_v27 = vpop.f32.mrf.mxu2  ;;  %v820_v61 = vadd.f32 1.0, %v1449_v53  ;;  %v867_v11 = vmul.f32 0.5, %v835_v4 }
 0x10f   : > { %v709_v3 = vmul.f32 0.044715, %v677_v56  ;;  %v662_v34 = vmul.f32 %v630_v33, %v598_v51  ;;  %v577_v50 = vadd.f32 %v1375_v59, %v576_v27  ;;  %1452 = vtanh.f32 %v757_v55 }
 0x110   : > { %v852_v38 = vmul.f32 0.5, %v820_v61  ;;  %v899_v30 = vmul.f32 %v867_v11, %v1856_v48 }
 0x111   : > { %v741_v6 = vadd.f32 %v709_v3, %v1899_v25  ;;  %v694_v7 = vmul.f32 0.044715, %v662_v34  ;;  %v614_v8 = vadd.f32 %v1572_v20, %v577_v50 }
 0x112   : > { %v884_v13 = vmul.f32 %v852_v38, %v1865_v22 }
 0x113   : > { %v1451_v14 = vpop.eup %1450  ;;  %v726_v15 = vadd.f32 %v694_v7, %v598_v51  ;;  %v646_v17 = vmul.f32 %v614_v8, %v614_v8  ;;  %v773_v21 = vmul.f32 0.7978846, %v741_v6 }
 0x114   : > { %v909_v16 = vpack.c.bf16 %v884_v13, %v883_v10  ;;  %v836_v62 = vadd.f32 1.0, %v1451_v14 }
 0x115   : > { %v678_v59 = vmul.f32 %v646_v17, %v614_v8  ;;  %v758_v24 = vmul.f32 0.7978846, %v726_v15  ;;  %1454 = vtanh.f32 %v773_v21  ;;  %v1453_v29 = vpop.eup %1452 }
 0x116   : > { %1312 = vmatmul.msk.bf16.gmra.mxu1 %vm931_vm1, %v909_v16  ;;  %v868_v63 = vmul.f32 0.5, %v836_v62  ;;  %v821_v42 = vadd.f32 1.0, %v1453_v29 }
 0x117   : > { %v710_v20 = vmul.f32 0.044715, %v678_v59  ;;  %1456 = vtanh.f32 %v758_v24 }
 0x118   : > { %v900_v22 = vmul.f32 %v868_v63, %v1876_v18  ;;  %v853_v23 = vmul.f32 0.5, %v821_v42 }
 0x119   : > { %v742_v39 = vadd.f32 %v710_v20, %v614_v8 }
 0x11a   : > { %v917_v40 = vpack.c.bf16 %v900_v22, %v899_v30  ;;  %v885_v5 = vmul.f32 %v853_v23, %v1886_v32 }
 0x11b   : > { %v774_v43 = vmul.f32 0.7978846, %v742_v39  ;;  %v1455_v35 = vpop.eup %1454 }
 0x11c   : > { %1320 = vmatmul.msk.bf16.gmra.mxu3 %vm931_vm1, %v917_v40  ;;  %v837_v37 = vadd.f32 1.0, %v1455_v35 }
 0x11d   : > { %v1457_v36 = vpop.eup %1456  ;;  %1458 = vtanh.f32 %v774_v43 }
 0x11e   : > { %v822_v60 = vadd.f32 1.0, %v1457_v36  ;;  %v869_v54 = vmul.f32 0.5, %v837_v37 }
 0x120   : > { %v854_v41 = vmul.f32 0.5, %v822_v60  ;;  %v901_v9 = vmul.f32 %v869_v54, %v1899_v25 }
 0x122   : > { %v886_v31 = vmul.f32 %v854_v41, %v598_v51 }
 0x123   : > { %v1459_v48 = vpop.eup %1458 }
 0x124   : > { %v910_v44 = vpack.c.bf16 %v886_v31, %v885_v5  ;;  %v838_v18 = vadd.f32 1.0, %v1459_v48 }
 0x126   : > { %1313 = vmatmul.msk.bf16.gmra.mxu1 %vm931_vm1, %v910_v44  ;;  %v870_v12 = vmul.f32 0.5, %v838_v18 }
 0x128   : > { %v902_v45 = vmul.f32 %v870_v12, %v614_v8 }
 0x12a   : > { %v918_v46 = vpack.c.bf16 %v902_v45, %v901_v9 }
 0x12c   : > { %1321 = vmatmul.msk.bf16.gmra.mxu3 %vm931_vm1, %v918_v46 }
 0x133   : > { %v989_v32 = vpop.f32.mrf.mxu1 }
 0x134   : > { %v990_v49 = vadd.f32 %v1926_v47, %v989_v32 }
 0x136   : > { %v1069_v25 = vpack.c.bf16 %v990_v49, %v990_v49  ;;  %1314 = vmatmul.msk.bf16.gmra.mxu1 %vm931_vm1, %v911_v1 }
 0x138   : > { %1102 = vst.msk [vmem:[%s1934_s22] sm:$0xf] %vm1101_vm2, %v1069_v25 }
 0x13b   : > { %v991_v52 = vpop.f32.mrf.mxu1 }
 0x13c   : > { %v992_v0 = vadd.f32 %v1926_v47, %v991_v52 }
 0x13e   : > { %v1070_v26 = vpack.c.bf16 %v992_v0, %v992_v0 }
 0x140   : > { %1103 = vst.msk [vmem:[%s1934_s22 + $0x4] sm:$0xf] %vm1101_vm2, %v1070_v26 }
 0x143   : > { %v994_v51 = vpop.f32.mrf.mxu1 }
 0x144   : > { %v995_v28 = vadd.f32 %v1926_v47, %v994_v51 }
 0x146   : > { %v1071_v19 = vpack.c.bf16 %v995_v28, %v995_v28 }
 0x148   : > { %1104 = vst.msk [vmem:[%s1934_s22 + $0x8] sm:$0xf] %vm1101_vm2, %v1071_v19 }
 0x14b   : > { %v996_v53 = vpop.f32.mrf.mxu1 }
 0x14c   : > { %v997_v57 = vadd.f32 %v1926_v47, %v996_v53 }
 0x14e   : > { %v1072_v58 = vpack.c.bf16 %v997_v57, %v997_v57 }
 0x14f   : > { %v1034_v1 = vpop.f32.mrf.mxu3 }
 0x150   : > { %1105 = vst.msk [vmem:[%s1934_s22 + $0xc] sm:$0xf] %vm1101_vm2, %v1072_v58  ;;  %v1035_v56 = vadd.f32 %v1926_v47, %v1034_v1 }
 0x152   : > { %v1087_v33 = vpack.c.bf16 %v1035_v56, %v1035_v56 }
 0x153   : > { %v999_v55 = vpop.f32.mrf.mxu1 }
 0x154   : > { %1120 = vst.msk [vmem:[%s1934_s22 + $0x48] sm:$0xf] %vm1101_vm2, %v1087_v33  ;;  %v1000_v27 = vadd.f32 %v1926_v47, %v999_v55 }
 0x156   : > { %v1073_v61 = vpack.c.bf16 %v1000_v27, %v1000_v27 }
 0x157   : > { %v1036_v2 = vpop.f32.mrf.mxu3 }
 0x158   : > { %1106 = vst.msk [vmem:[%s1934_s22 + $0x10] sm:$0xf] %vm1101_vm2, %v1073_v61  ;;  %v1037_v3 = vadd.f32 %v1926_v47, %v1036_v2 }
 0x15a   : > { %v1088_v34 = vpack.c.bf16 %v1037_v3, %v1037_v3 }
 0x15b   : > { %v1001_v50 = vpop.f32.mrf.mxu1 }
 0x15c   : > { %1121 = vst.msk [vmem:[%s1934_s22 + $0x4c] sm:$0xf] %vm1101_vm2, %v1088_v34  ;;  %v1002_v38 = vadd.f32 %v1926_v47, %v1001_v50 }
 0x15e   : > { %v1074_v4 = vpack.c.bf16 %v1002_v38, %v1002_v38 }
 0x15f   : > { %v1039_v6 = vpop.f32.mrf.mxu3 }
 0x160   : > { %1107 = vst.msk [vmem:[%s1934_s22 + $0x14] sm:$0xf] %vm1101_vm2, %v1074_v4  ;;  %v1040_v7 = vadd.f32 %v1926_v47, %v1039_v6 }
 0x162   : > { %v1089_v8 = vpack.c.bf16 %v1040_v7, %v1040_v7 }
 0x163   : > { %v1004_v10 = vpop.f32.mrf.mxu1 }
 0x164   : > { %1122 = vst.msk [vmem:[%s1934_s22 + $0x50] sm:$0xf] %vm1101_vm2, %v1089_v8  ;;  %v1005_v13 = vadd.f32 %v1926_v47, %v1004_v10 }
 0x166   : > { %v1075_v14 = vpack.c.bf16 %v1005_v13, %v1005_v13 }
 0x167   : > { %v1041_v15 = vpop.f32.mrf.mxu3 }
 0x168   : > { %1108 = vst.msk [vmem:[%s1934_s22 + $0x18] sm:$0xf] %vm1101_vm2, %v1075_v14  ;;  %v1042_v17 = vadd.f32 %v1926_v47, %v1041_v15 }
 0x16a   : > { %v1090_v21 = vpack.c.bf16 %v1042_v17, %v1042_v17 }
 0x16b   : > { %v1006_v16 = vpop.f32.mrf.mxu1 }
 0x16c   : > { %1123 = vst.msk [vmem:[%s1934_s22 + $0x54] sm:$0xf] %vm1101_vm2, %v1090_v21  ;;  %v1007_v62 = vadd.f32 %v1926_v47, %v1006_v16 }
 0x16e   : > { %v1076_v11 = vpack.c.bf16 %v1007_v62, %v1007_v62 }
 0x16f   : > { %v1044_v59 = vpop.f32.mrf.mxu3 }
 0x170   : > { %1109 = vst.msk [vmem:[%s1934_s22 + $0x1c] sm:$0xf] %vm1101_vm2, %v1076_v11  ;;  %v1045_v24 = vadd.f32 %v1926_v47, %v1044_v59 }
 0x172   : > { %v1091_v63 = vpack.c.bf16 %v1045_v24, %v1045_v24 }
 0x173   : > { %v1009_v29 = vpop.f32.mrf.mxu1 }
 0x174   : > { %1124 = vst.msk [vmem:[%s1934_s22 + $0x58] sm:$0xf] %vm1101_vm2, %v1091_v63  ;;  %v1010_v20 = vadd.f32 %v1926_v47, %v1009_v29 }
 0x176   : > { %v1077_v30 = vpack.c.bf16 %v1010_v20, %v1010_v20 }
 0x177   : > { %v1046_v22 = vpop.f32.mrf.mxu3 }
 0x178   : > { %1110 = vst.msk [vmem:[%s1934_s22 + $0x20] sm:$0xf] %vm1101_vm2, %v1077_v30  ;;  %v1047_v39 = vadd.f32 %v1926_v47, %v1046_v22 }
 0x17a   : > { %v1092_v40 = vpack.c.bf16 %v1047_v39, %v1047_v39 }
 0x17b   : > { %v1011_v42 = vpop.f32.mrf.mxu1 }
 0x17c   : > { %1125 = vst.msk [vmem:[%s1934_s22 + $0x5c] sm:$0xf] %vm1101_vm2, %v1092_v40  ;;  %v1012_v43 = vadd.f32 %v1926_v47, %v1011_v42 }
 0x17e   : > { %v1078_v35 = vpack.c.bf16 %v1012_v43, %v1012_v43 }
 0x17f   : > { %v1049_v36 = vpop.f32.mrf.mxu3 }
 0x180   : > { %1111 = vst.msk [vmem:[%s1934_s22 + $0x24] sm:$0xf] %vm1101_vm2, %v1078_v35  ;;  %v1050_v60 = vadd.f32 %v1926_v47, %v1049_v36 }
 0x182   : > { %v1093_v23 = vpack.c.bf16 %v1050_v60, %v1050_v60 }
 0x183   : > { %v1014_v41 = vpop.f32.mrf.mxu1 }
 0x184   : > { %1126 = vst.msk [vmem:[%s1934_s22 + $0x60] sm:$0xf] %vm1101_vm2, %v1093_v23  ;;  %v1015_v37 = vadd.f32 %v1926_v47, %v1014_v41 }
 0x186   : > { %v1079_v5 = vpack.c.bf16 %v1015_v37, %v1015_v37 }
 0x187   : > { %v1051_v31 = vpop.f32.mrf.mxu3 }
 0x188   : > { %1112 = vst.msk [vmem:[%s1934_s22 + $0x28] sm:$0xf] %vm1101_vm2, %v1079_v5  ;;  %v1052_v48 = vadd.f32 %v1926_v47, %v1051_v31 }
 0x18a   : > { %v1094_v44 = vpack.c.bf16 %v1052_v48, %v1052_v48 }
 0x18b   : > { %v1016_v18 = vpop.f32.mrf.mxu1 }
 0x18c   : > { %1127 = vst.msk [vmem:[%s1934_s22 + $0x64] sm:$0xf] %vm1101_vm2, %v1094_v44  ;;  %v1017_v54 = vadd.f32 %v1926_v47, %v1016_v18 }
 0x18e   : > { %v1080_v12 = vpack.c.bf16 %v1017_v54, %v1017_v54 }
 0x18f   : > { %v1054_v9 = vpop.f32.mrf.mxu3 }
 0x190   : > { %1113 = vst.msk [vmem:[%s1934_s22 + $0x2c] sm:$0xf] %vm1101_vm2, %v1080_v12  ;;  %v1055_v45 = vadd.f32 %v1926_v47, %v1054_v9 }
 0x192   : > { %v1095_v46 = vpack.c.bf16 %v1055_v45, %v1055_v45 }
 0x193   : > { %v1019_v32 = vpop.f32.mrf.mxu1 }
 0x194   : > { %1128 = vst.msk [vmem:[%s1934_s22 + $0x68] sm:$0xf] %vm1101_vm2, %v1095_v46  ;;  %v1020_v49 = vadd.f32 %v1926_v47, %v1019_v32 }
 0x196   : > { %v1081_v25 = vpack.c.bf16 %v1020_v49, %v1020_v49 }
 0x197   : > { %v1056_v52 = vpop.f32.mrf.mxu3 }
 0x198   : > { %1114 = vst.msk [vmem:[%s1934_s22 + $0x30] sm:$0xf] %vm1101_vm2, %v1081_v25  ;;  %v1057_v0 = vadd.f32 %v1926_v47, %v1056_v52 }
 0x19a   : > { %v1096_v26 = vpack.c.bf16 %v1057_v0, %v1057_v0 }
 0x19b   : > { %v1021_v51 = vpop.f32.mrf.mxu1 }
 0x19c   : > { %1129 = vst.msk [vmem:[%s1934_s22 + $0x6c] sm:$0xf] %vm1101_vm2, %v1096_v26  ;;  %v1022_v28 = vadd.f32 %v1926_v47, %v1021_v51 }
 0x19e   : > { %v1082_v19 = vpack.c.bf16 %v1022_v28, %v1022_v28 }
 0x19f   : > { %v1059_v53 = vpop.f32.mrf.mxu3 }
 0x1a0   : > { %1115 = vst.msk [vmem:[%s1934_s22 + $0x34] sm:$0xf] %vm1101_vm2, %v1082_v19  ;;  %v1060_v57 = vadd.f32 %v1926_v47, %v1059_v53 }
 0x1a2   : > { %v1097_v58 = vpack.c.bf16 %v1060_v57, %v1060_v57 }
 0x1a3   : > { %v1024_v1 = vpop.f32.mrf.mxu1 }
 0x1a4   : > { %1130 = vst.msk [vmem:[%s1934_s22 + $0x70] sm:$0xf] %vm1101_vm2, %v1097_v58  ;;  %v1025_v56 = vadd.f32 %v1926_v47, %v1024_v1 }
 0x1a6   : > { %v1083_v33 = vpack.c.bf16 %v1025_v56, %v1025_v56 }
 0x1a7   : > { %v1061_v55 = vpop.f32.mrf.mxu3 }
 0x1a8   : > { %1116 = vst.msk [vmem:[%s1934_s22 + $0x38] sm:$0xf] %vm1101_vm2, %v1083_v33  ;;  %v1062_v27 = vadd.f32 %v1926_v47, %v1061_v55 }
 0x1aa   : > { %v1098_v61 = vpack.c.bf16 %v1062_v27, %v1062_v27 }
 0x1ab   : > { %v1026_v2 = vpop.f32.mrf.mxu1 }
 0x1ac   : > { %1131 = vst.msk [vmem:[%s1934_s22 + $0x74] sm:$0xf] %vm1101_vm2, %v1098_v61  ;;  %v1027_v3 = vadd.f32 %v1926_v47, %v1026_v2 }
 0x1ae   : > { %v1084_v34 = vpack.c.bf16 %v1027_v3, %v1027_v3 }
 0x1af   : > { %v1064_v50 = vpop.f32.mrf.mxu3 }
 0x1b0   : > { %1117 = vst.msk [vmem:[%s1934_s22 + $0x3c] sm:$0xf] %vm1101_vm2, %v1084_v34  ;;  %v1065_v38 = vadd.f32 %v1926_v47, %v1064_v50 }
 0x1b2   : > { %v1099_v4 = vpack.c.bf16 %v1065_v38, %v1065_v38 }
 0x1b3   : > { %v1029_v6 = vpop.f32.mrf.mxu1 }
 0x1b4   : > { %1132 = vst.msk [vmem:[%s1934_s22 + $0x78] sm:$0xf] %vm1101_vm2, %v1099_v4  ;;  %v1030_v7 = vadd.f32 %v1926_v47, %v1029_v6 }
 0x1b6   : > { %v1085_v8 = vpack.c.bf16 %v1030_v7, %v1030_v7 }
 0x1b7   : > { %v1066_v10 = vpop.f32.mrf.mxu3 }
 0x1b8   : > { %1118 = vst.msk [vmem:[%s1934_s22 + $0x40] sm:$0xf] %vm1101_vm2, %v1085_v8  ;;  %v1067_v13 = vadd.f32 %v1926_v47, %v1066_v10 }
 0x1ba   : > { %v1100_v14 = vpack.c.bf16 %v1067_v13, %v1067_v13 }
 0x1bb   : > { %v1031_v15 = vpop.f32.mrf.mxu1 }
 0x1bc   : > { %1133 = vst.msk [vmem:[%s1934_s22 + $0x7c] sm:$0xf] %vm1101_vm2, %v1100_v14  ;;  %v1032_v17 = vadd.f32 %v1926_v47, %v1031_v15 }
 0x1be   : > { %v1086_v21 = vpack.c.bf16 %v1032_v17, %v1032_v17 }
 0x1c0   : > { %1119 = vst.msk [vmem:[%s1934_s22 + $0x44] sm:$0xf] %vm1101_vm2, %v1086_v21 }
 0x1c1 PF: > { %s16_s21 = sadd.s32 1, %s1466_s21  }
 0x1c2   : > { %p13_p5 = scmp.ge.s32.totalorder %s16_s21, 4  }
 0x1c4   :  { %15 = sbr.rel (!%p13_p5) target bundleno = 1 (0x1), region = 77 }

</bundles_post_ra>
